<compile_context>
chip_gen: v5e
topology: v5e:2x2
jax: 0.10.0
libtpu: 0.0.40
codegen_flags: <defaults>
</compile_context>

<pallas_src>
import math
import jax
import jax.numpy as jnp
from jax.experimental import pallas as pl
from jax.experimental.pallas import tpu as pltpu

# ---- small, TPU-friendly hyper-parameters consistent with the module ----
INPUT_DIM   = 16
D_MODEL     = 128
SEQ_LEN     = 8
NUM_HEADS   = 4
HEAD_DIM    = D_MODEL // NUM_HEADS
NUM_LAYERS  = 2
DFF         = 256
OUTPUT_DIM  = 32
BATCH       = 2
EPS         = 1e-5  # PyTorch LayerNorm / TransformerEncoderLayer default

S1  = SEQ_LEN + 1          # per-batch sequence length incl. class token
S1B = BATCH * S1           # total rows once batch is folded into sublanes

# ---- row layout of the packed (NVEC, 128) vector array ----
ROW_TOK_B    = 0
ROW_IN_LN_W  = 1
ROW_IN_LN_B  = 2
ROW_CLS_POS  = 3           # class_token + pos_enc[0]
ROW_LAYER0   = 4
VPL          = 6           # per layer: wo_b, ln1_w, ln1_b, ffn_b2, ln2_w, ln2_b
ROW_CLS_LN_W = ROW_LAYER0 + NUM_LAYERS * VPL
ROW_CLS_LN_B = ROW_CLS_LN_W + 1
ROW_OUT_B    = ROW_CLS_LN_B + 1
NVEC         = ROW_OUT_B + 1


# ----------------------------- in-kernel helpers -----------------------------
def _layernorm(x, w, b):
    # single-pass variance: one cross-lane reduction fewer per call
    mean = jnp.mean(x, axis=-1, keepdims=True)
    meansq = jnp.mean(x * x, axis=-1, keepdims=True)
    var = meansq - mean * mean
    return (x - mean) * jax.lax.rsqrt(var + EPS) * w + b


# ----------------------------- fused Pallas kernel -----------------------------
def fused_transformer_kernel(
    x_ref,        # (B*S, F)
    wtokT_ref,    # (F, D)     tokenizer weight, pre-transposed
    pos_ref,      # (B*S, D)   positional encoding rows 1..S, tiled per batch
    vec_ref,      # (NVEC, D)  packed (1, D) vectors
    winT_ref,     # (L, D, 3D) in_proj weight, pre-transposed
    bin_ref,      # (L, 1, 3D) in_proj bias
    woutT_ref,    # (L, D, D)  out_proj weight, pre-transposed
    w1T_ref,      # (L, D, DFF)
    b1_ref,       # (L, 1, DFF)
    w2T_ref,      # (L, DFF, D)
    outWT_ref,    # (D, OUT)   output layer weight, pre-transposed
    o_ref,        # (B, OUT)
    h_scr,        # (B*(S+1), D) VMEM scratch
):
    scale = 1.0 / math.sqrt(HEAD_DIM)

    def vrow(i):
        return vec_ref[i:i + 1, :]            # (1, D)

    # ---- tokenizer + input LayerNorm + positional encoding (batch folded) ----
    t = jnp.dot(x_ref[...], wtokT_ref[...], preferred_element_type=jnp.float32)
    t = t + vrow(ROW_TOK_B)
    t = _layernorm(t, vrow(ROW_IN_LN_W), vrow(ROW_IN_LN_B))   # dropout = identity
    t = t + pos_ref[...]                                       # (B*S, D)

    # ---- assemble [cls | seq] per batch into the scratch (static row writes) ----
    cls_row = vrow(ROW_CLS_POS)
    h_scr[0:1, :] = cls_row
    h_scr[1:S1, :] = t[0:SEQ_LEN, :]
    h_scr[S1:S1 + 1, :] = cls_row
    h_scr[S1 + 1:S1B, :] = t[SEQ_LEN:2 * SEQ_LEN, :]
    h = h_scr[...]                                              # (S1B, D)

    # ---- block-diagonal additive mask: no attention across batch items ----
    ri = jax.lax.broadcasted_iota(jnp.int32, (S1B, S1B), 0)
    ci = jax.lax.broadcasted_iota(jnp.int32, (S1B, S1B), 1)
    same_batch = (ri >= S1) == (ci >= S1)
    mask_bias = jnp.where(same_batch, 0.0, -1e30).astype(jnp.float32)

    # ---- encoder layers (unrolled; weights already packed per layer) ----
    for l in range(NUM_LAYERS):
        base = ROW_LAYER0 + l * VPL
        wo_b = vrow(base + 0)
        ln1w, ln1b = vrow(base + 1), vrow(base + 2)
        b2 = vrow(base + 3)
        ln2w, ln2b = vrow(base + 4), vrow(base + 5)

        # fused QKV projection: one full-width matmul for all heads & batches
        qkv = jnp.dot(h, winT_ref[l], preferred_element_type=jnp.float32) + bin_ref[l]

        heads = []
        for hd in range(NUM_HEADS):
            lo = hd * HEAD_DIM
            q = qkv[:, lo:lo + HEAD_DIM]
            k = qkv[:, D_MODEL + lo:D_MODEL + lo + HEAD_DIM]
            v = qkv[:, 2 * D_MODEL + lo:2 * D_MODEL + lo + HEAD_DIM]
            # scores = q @ k^T via last-dim contraction (no explicit transpose)
            s = jax.lax.dot_general(
                q, k, (((1,), (1,)), ((), ())),
                preferred_element_type=jnp.float32) * scale
            s = s + mask_bias
            s = s - jnp.max(s, axis=-1, keepdims=True)
            p = jnp.exp(s)
            p = p * pl.reciprocal(jnp.sum(p, axis=-1, keepdims=True), approx=True)
            heads.append(jnp.dot(p, v, preferred_element_type=jnp.float32))  # (S1B, Dh)

        # lane-concatenate heads (32-aligned) -> single full-K output projection
        attn = jnp.dot(jnp.concatenate(heads, axis=-1), woutT_ref[l],
                       preferred_element_type=jnp.float32) + wo_b

        h = _layernorm(h + attn, ln1w, ln1b)

        # ---- feed-forward (ReLU), batched over all rows ----
        ff = jnp.dot(h, w1T_ref[l], preferred_element_type=jnp.float32) + b1_ref[l]
        ff = jnp.maximum(ff, 0.0)
        ff = jnp.dot(ff, w2T_ref[l], preferred_element_type=jnp.float32) + b2

        h = _layernorm(h + ff, ln2w, ln2b)

    # ---- class-token head (both batch cls rows in one 2-row matmul) ----
    cls2 = jnp.concatenate([h[0:1, :], h[S1:S1 + 1, :]], axis=0)        # (B, D)
    c = _layernorm(cls2, vrow(ROW_CLS_LN_W), vrow(ROW_CLS_LN_B))
    out = jnp.dot(c, outWT_ref[...], preferred_element_type=jnp.float32)
    o_ref[...] = out + vrow(ROW_OUT_B)[:, :OUTPUT_DIM]


# ----------------------------- one-time host-side weight packing -----------------------------
def pack_params(p):
    D = D_MODEL
    vec_rows = [
        p["tok_b"].reshape(D),
        p["in_ln_w"].reshape(D),
        p["in_ln_b"].reshape(D),
        (p["class_token"][0, 0] + p["pos_enc"][0, 0]).reshape(D),
    ]
    winT, bin_, woutT, w1T, b1, w2T = [], [], [], [], [], []
    for lp in p["layers"]:
        winT.append(lp["in_w"].T)                       # (D, 3D)
        bin_.append(lp["in_b"].reshape(1, 3 * D))
        woutT.append(lp["out_w"].T)                     # (D, D)
        w1T.append(lp["l1_w"].T)                        # (D, DFF)
        b1.append(lp["l1_b"].reshape(1, DFF))
        w2T.append(lp["l2_w"].T)                        # (DFF, D)
        vec_rows += [
            lp["out_b"].reshape(D),
            lp["ln1_w"].reshape(D), lp["ln1_b"].reshape(D),
            lp["l2_b"].reshape(D),
            lp["ln2_w"].reshape(D), lp["ln2_b"].reshape(D),
        ]
    vec_rows += [
        p["cls_ln_w"].reshape(D),
        p["cls_ln_b"].reshape(D),
        jnp.pad(p["out_b"].reshape(-1), (0, D - OUTPUT_DIM)),
    ]
    vecs = jnp.stack(vec_rows, axis=0)                               # (NVEC, D)
    assert vecs.shape[0] == NVEC
    pos_body = jnp.tile(p["pos_enc"][0, 1:SEQ_LEN + 1, :], (BATCH, 1))  # (B*S, D)

    return (
        p["tok_w"].T,                # (F, D)
        pos_body,                    # (B*S, D)
        vecs,                        # (NVEC, D)
        jnp.stack(winT),             # (L, D, 3D)
        jnp.stack(bin_),             # (L, 1, 3D)
        jnp.stack(woutT),            # (L, D, D)
        jnp.stack(w1T),              # (L, D, DFF)
        jnp.stack(b1),               # (L, 1, DFF)
        jnp.stack(w2T),              # (L, DFF, D)
        p["out_w"].T,                # (D, OUT)
    )


@jax.jit
def transformer_forward(x, packed):
    x_flat = x.reshape(BATCH * SEQ_LEN, INPUT_DIM)
    args = (x_flat,) + tuple(packed)
    vmem = pl.BlockSpec(memory_space=pltpu.MemorySpace.VMEM)
    return pl.pallas_call(
        fused_transformer_kernel,
        out_shape=jax.ShapeDtypeStruct((BATCH, OUTPUT_DIM), jnp.float32),
        in_specs=[vmem] * len(args),
        out_specs=vmem,
        scratch_shapes=[pltpu.VMEM((S1B, D_MODEL), jnp.float32)],
    )(*args)


# ----------------------------- pure-JAX reference -----------------------------
def reference_forward(x, p):
    def ln(v, w, b):
        m = jnp.mean(v, axis=-1, keepdims=True)
        var = jnp.mean(jnp.square(v - m), axis=-1, keepdims=True)
        return (v - m) / jnp.sqrt(var + EPS) * w.reshape(-1) + b.reshape(-1)

    B = x.shape[0]
    h = x @ p["tok_w"].T + p["tok_b"].reshape(-1)
    h = ln(h, p["in_ln_w"], p["in_ln_b"])
    cls = jnp.broadcast_to(p["class_token"], (B, 1, D_MODEL))
    h = jnp.concatenate([cls, h], axis=1) + p["pos_enc"][:, : SEQ_LEN + 1, :]
    for lp in p["layers"]:
        qkv = h @ lp["in_w"].T + lp["in_b"].reshape(-1)
        q, k, v = jnp.split(qkv, 3, axis=-1)
        S_ = h.shape[1]
        qh = q.reshape(B, S_, NUM_HEADS, HEAD_DIM).transpose(0, 2, 1, 3)
        kh = k.reshape(B, S_, NUM_HEADS, HEAD_DIM).transpose(0, 2, 1, 3)
        vh = v.reshape(B, S_, NUM_HEADS, HEAD_DIM).transpose(0, 2, 1, 3)
        s = jnp.einsum("bhqd,bhkd->bhqk", qh, kh) / math.sqrt(HEAD_DIM)
        a = jax.nn.softmax(s, axis=-1)
        o = jnp.einsum("bhqk,bhkd->bhqd", a, vh).transpose(0, 2, 1, 3).reshape(B, S_, D_MODEL)
        o = o @ lp["out_w"].T + lp["out_b"].reshape(-1)
        h = ln(h + o, lp["ln1_w"], lp["ln1_b"])
        ff = jnp.maximum(h @ lp["l1_w"].T + lp["l1_b"].reshape(-1), 0.0) @ lp["l2_w"].T + lp["l2_b"].reshape(-1)
        h = ln(h + ff, lp["ln2_w"], lp["ln2_b"])
    c = ln(h[:, 0, :], p["cls_ln_w"], p["cls_ln_b"])
    return c @ p["out_w"].T + p["out_b"].reshape(-1)


# ----------------------------- parameter init -----------------------------
def init_params(key):
    def lin(key, out_f, in_f):
        k1, k2 = jax.random.split(key)
        bound = 1.0 / math.sqrt(in_f)
        w = jax.random.uniform(k1, (out_f, in_f), jnp.float32, -bound, bound)
        b = jax.random.uniform(k2, (1, out_f), jnp.float32, -bound, bound)
        return w, b

    keys = jax.random.split(key, 8 + NUM_LAYERS)
    tok_w, tok_b = lin(keys[0], D_MODEL, INPUT_DIM)
    out_w, out_b = lin(keys[1], OUTPUT_DIM, D_MODEL)
    class_token = jax.random.normal(keys[2], (1, 1, D_MODEL), jnp.float32)
    pos_enc = jax.random.normal(keys[3], (1, SEQ_LEN + 1, D_MODEL), jnp.float32)

    ones = lambda n: jnp.ones((1, n), jnp.float32)
    zeros = lambda n: jnp.zeros((1, n), jnp.float32)

    layers = []
    for i in range(NUM_LAYERS):
        k = jax.random.split(keys[8 + i], 4)
        in_w, in_b = lin(k[0], 3 * D_MODEL, D_MODEL)
        o_w, o_b = lin(k[1], D_MODEL, D_MODEL)
        l1_w, l1_b = lin(k[2], DFF, D_MODEL)
        l2_w, l2_b = lin(k[3], D_MODEL, DFF)
        layers.append(dict(in_w=in_w, in_b=in_b, out_w=o_w, out_b=o_b,
                           ln1_w=ones(D_MODEL), ln1_b=zeros(D_MODEL),
                           l1_w=l1_w, l1_b=l1_b, l2_w=l2_w, l2_b=l2_b,
                           ln2_w=ones(D_MODEL), ln2_b=zeros(D_MODEL)))

    return dict(tok_w=tok_w, tok_b=tok_b,
                in_ln_w=ones(D_MODEL), in_ln_b=zeros(D_MODEL),
                class_token=class_token, pos_enc=pos_enc,
                layers=layers,
                cls_ln_w=ones(D_MODEL), cls_ln_b=zeros(D_MODEL),
                out_w=out_w, out_b=out_b)


# ----------------------------- main -----------------------------
if __name__ == "__main__":
    key = jax.random.PRNGKey(0)
    kx, kp = jax.random.split(key)
    x = jax.random.normal(kx, (BATCH, SEQ_LEN, INPUT_DIM), jnp.float32)
    params = init_params(kp)

    # one-time packing (transposes / stacks hoisted out of the per-call forward)
    packed = pack_params(params)
    packed = jax.tree_util.tree_map(jax.block_until_ready, packed)

    out = transformer_forward(x, packed)
    out = jax.block_until_ready(out)
    assert out.shape == (BATCH, OUTPUT_DIM), out.shape

    ref = jax.block_until_ready(reference_forward(x, params))
    # Tolerance slightly relaxed vs pure-f32 because the softmax denominator uses the
    # EUP approximate reciprocal (pl.reciprocal(approx=True)).
    assert jnp.allclose(out, ref, atol=2e-3, rtol=2e-3), float(jnp.max(jnp.abs(out - ref)))

    print("KERNEL_OK")
</pallas_src>

<mosaic_0001>
module attributes {stable_mosaic.version = 11 : i64} {
  func.func @fused_transformer_kernel(%arg0: memref<16x16xf32, #tpu.memory_space<vmem>>, %arg1: memref<16x128xf32, #tpu.memory_space<vmem>>, %arg2: memref<16x128xf32, #tpu.memory_space<vmem>>, %arg3: memref<19x128xf32, #tpu.memory_space<vmem>>, %arg4: memref<2x128x384xf32, #tpu.memory_space<vmem>>, %arg5: memref<2x1x384xf32, #tpu.memory_space<vmem>>, %arg6: memref<2x128x128xf32, #tpu.memory_space<vmem>>, %arg7: memref<2x128x256xf32, #tpu.memory_space<vmem>>, %arg8: memref<2x1x256xf32, #tpu.memory_space<vmem>>, %arg9: memref<2x256x128xf32, #tpu.memory_space<vmem>>, %arg10: memref<128x32xf32, #tpu.memory_space<vmem>>, %arg11: memref<2x32xf32, #tpu.memory_space<vmem>>, %arg12: memref<18x128xf32, #tpu.memory_space<vmem>>) attributes {dimension_semantics = [], scalar_prefetch = 0 : i64, scratch_operands = 1 : i64, tpu.core_type = #tpu.core_type<tc>} {
    %c0 = arith.constant 0 : index
    %c0_0 = arith.constant 0 : index
    %0 = vector.load %arg0[%c0, %c0_0] : memref<16x16xf32, #tpu.memory_space<vmem>>, vector<16x16xf32>
    %c0_1 = arith.constant 0 : index
    %c0_2 = arith.constant 0 : index
    %1 = vector.load %arg1[%c0_1, %c0_2] : memref<16x128xf32, #tpu.memory_space<vmem>>, vector<16x128xf32>
    %cst = arith.constant dense<0.000000e+00> : vector<16x128xf32>
    %2 = tpu.matmul %0, %1, %cst {dimension_numbers = #tpu.dot_dimension_numbers<[1], [0], [0], [1], [0, 0, 1, 1], [], []>} : vector<16x16xf32>, vector<16x128xf32>, vector<16x128xf32> -> vector<16x128xf32>
    %c0_3 = arith.constant 0 : index
    %c0_4 = arith.constant 0 : index
    %3 = vector.load %arg3[%c0_3, %c0_4] : memref<19x128xf32, #tpu.memory_space<vmem>>, vector<1x128xf32>
    %4 = vector.broadcast %3 : vector<1x128xf32> to vector<16x128xf32>
    %5 = arith.addf %2, %4 : vector<16x128xf32>
    %c1 = arith.constant 1 : index
    %c0_5 = arith.constant 0 : index
    %6 = vector.load %arg3[%c1, %c0_5] : memref<19x128xf32, #tpu.memory_space<vmem>>, vector<1x128xf32>
    %c2 = arith.constant 2 : index
    %c0_6 = arith.constant 0 : index
    %7 = vector.load %arg3[%c2, %c0_6] : memref<19x128xf32, #tpu.memory_space<vmem>>, vector<1x128xf32>
    %cst_7 = arith.constant dense<0.000000e+00> : vector<16xf32>
    %8 = vector.multi_reduction <add>, %5, %cst_7 [1] : vector<16x128xf32> to vector<16xf32>
    %9 = vector.shape_cast %8 : vector<16xf32> to vector<16x1xf32>
    %cst_8 = arith.constant 1.280000e+02 : f32
    %10 = vector.broadcast %cst_8 : f32 to vector<16x1xf32>
    %11 = arith.divf %9, %10 : vector<16x1xf32>
    %12 = arith.mulf %5, %5 : vector<16x128xf32>
    %cst_9 = arith.constant dense<0.000000e+00> : vector<16xf32>
    %13 = vector.multi_reduction <add>, %12, %cst_9 [1] : vector<16x128xf32> to vector<16xf32>
    %14 = vector.shape_cast %13 : vector<16xf32> to vector<16x1xf32>
    %cst_10 = arith.constant 1.280000e+02 : f32
    %15 = vector.broadcast %cst_10 : f32 to vector<16x1xf32>
    %16 = arith.divf %14, %15 : vector<16x1xf32>
    %17 = arith.mulf %11, %11 : vector<16x1xf32>
    %18 = arith.subf %16, %17 : vector<16x1xf32>
    %19 = vector.broadcast %11 : vector<16x1xf32> to vector<16x128xf32>
    %20 = arith.subf %5, %19 : vector<16x128xf32>
    %cst_11 = arith.constant 9.99999974E-6 : f32
    %21 = vector.broadcast %cst_11 : f32 to vector<16x1xf32>
    %22 = arith.addf %18, %21 : vector<16x1xf32>
    %23 = math.rsqrt %22 : vector<16x1xf32>
    %24 = vector.broadcast %23 : vector<16x1xf32> to vector<16x128xf32>
    %25 = arith.mulf %20, %24 : vector<16x128xf32>
    %26 = vector.broadcast %6 : vector<1x128xf32> to vector<16x128xf32>
    %27 = arith.mulf %25, %26 : vector<16x128xf32>
    %28 = vector.broadcast %7 : vector<1x128xf32> to vector<16x128xf32>
    %29 = arith.addf %27, %28 : vector<16x128xf32>
    %c0_12 = arith.constant 0 : index
    %c0_13 = arith.constant 0 : index
    %30 = vector.load %arg2[%c0_12, %c0_13] : memref<16x128xf32, #tpu.memory_space<vmem>>, vector<16x128xf32>
    %31 = arith.addf %29, %30 : vector<16x128xf32>
    %c3 = arith.constant 3 : index
    %c0_14 = arith.constant 0 : index
    %32 = vector.load %arg3[%c3, %c0_14] : memref<19x128xf32, #tpu.memory_space<vmem>>, vector<1x128xf32>
    %c0_15 = arith.constant 0 : index
    %c0_16 = arith.constant 0 : index
    %33 = vector.load %arg12[%c0_15, %c0_16] : memref<18x128xf32, #tpu.memory_space<vmem>>, vector<1x128xf32>
    tpu.vector_store %arg12[%c0_15, %c0_16], %32 {strides = array<i32>} : memref<18x128xf32, #tpu.memory_space<vmem>>, vector<1x128xf32>,
    %34 = vector.extract_strided_slice %31 {offsets = [0, 0], sizes = [8, 128], strides = [1, 1]} : vector<16x128xf32> to vector<8x128xf32>
    %c1_17 = arith.constant 1 : index
    %c0_18 = arith.constant 0 : index
    %35 = vector.load %arg12[%c1_17, %c0_18] : memref<18x128xf32, #tpu.memory_space<vmem>>, vector<8x128xf32>
    tpu.vector_store %arg12[%c1_17, %c0_18], %34 {strides = array<i32>} : memref<18x128xf32, #tpu.memory_space<vmem>>, vector<8x128xf32>,
    %c9 = arith.constant 9 : index
    %c0_19 = arith.constant 0 : index
    %36 = vector.load %arg12[%c9, %c0_19] : memref<18x128xf32, #tpu.memory_space<vmem>>, vector<1x128xf32>
    tpu.vector_store %arg12[%c9, %c0_19], %32 {strides = array<i32>} : memref<18x128xf32, #tpu.memory_space<vmem>>, vector<1x128xf32>,
    %37 = vector.extract_strided_slice %31 {offsets = [8, 0], sizes = [8, 128], strides = [1, 1]} : vector<16x128xf32> to vector<8x128xf32>
    %c10 = arith.constant 10 : index
    %c0_20 = arith.constant 0 : index
    %38 = vector.load %arg12[%c10, %c0_20] : memref<18x128xf32, #tpu.memory_space<vmem>>, vector<8x128xf32>
    tpu.vector_store %arg12[%c10, %c0_20], %37 {strides = array<i32>} : memref<18x128xf32, #tpu.memory_space<vmem>>, vector<8x128xf32>,
    %c0_21 = arith.constant 0 : index
    %c0_22 = arith.constant 0 : index
    %39 = vector.load %arg12[%c0_21, %c0_22] : memref<18x128xf32, #tpu.memory_space<vmem>>, vector<18x128xf32>
    %40 = tpu.iota {dimensions = array<i32: 0>} : vector<18x18xi32>
    %41 = tpu.iota {dimensions = array<i32: 1>} : vector<18x18xi32>
    %c9_i32 = arith.constant 9 : i32
    %42 = vector.broadcast %c9_i32 : i32 to vector<18x18xi32>
    %43 = arith.cmpi sge, %40, %42 : vector<18x18xi32>
    %c9_i32_23 = arith.constant 9 : i32
    %44 = vector.broadcast %c9_i32_23 : i32 to vector<18x18xi32>
    %45 = arith.cmpi sge, %41, %44 : vector<18x18xi32>
    %46 = arith.xori %43, %45 : vector<18x18xi1>
    %cst_24 = arith.constant dense<true> : vector<18x18xi1>
    %47 = arith.xori %46, %cst_24 : vector<18x18xi1>
    %cst_25 = arith.constant 0.000000e+00 : f32
    %cst_26 = arith.constant -1.000000e+30 : f32
    %48 = vector.broadcast %cst_25 : f32 to vector<18x18xf32>
    %49 = vector.broadcast %cst_26 : f32 to vector<18x18xf32>
    %50 = arith.select %47, %48, %49 : vector<18x18xi1>, vector<18x18xf32>
    %c4 = arith.constant 4 : index
    %c0_27 = arith.constant 0 : index
    %51 = vector.load %arg3[%c4, %c0_27] : memref<19x128xf32, #tpu.memory_space<vmem>>, vector<1x128xf32>
    %c5 = arith.constant 5 : index
    %c0_28 = arith.constant 0 : index
    %52 = vector.load %arg3[%c5, %c0_28] : memref<19x128xf32, #tpu.memory_space<vmem>>, vector<1x128xf32>
    %c6 = arith.constant 6 : index
    %c0_29 = arith.constant 0 : index
    %53 = vector.load %arg3[%c6, %c0_29] : memref<19x128xf32, #tpu.memory_space<vmem>>, vector<1x128xf32>
    %c7 = arith.constant 7 : index
    %c0_30 = arith.constant 0 : index
    %54 = vector.load %arg3[%c7, %c0_30] : memref<19x128xf32, #tpu.memory_space<vmem>>, vector<1x128xf32>
    %c8 = arith.constant 8 : index
    %c0_31 = arith.constant 0 : index
    %55 = vector.load %arg3[%c8, %c0_31] : memref<19x128xf32, #tpu.memory_space<vmem>>, vector<1x128xf32>
    %c9_32 = arith.constant 9 : index
    %c0_33 = arith.constant 0 : index
    %56 = vector.load %arg3[%c9_32, %c0_33] : memref<19x128xf32, #tpu.memory_space<vmem>>, vector<1x128xf32>
    %c0_34 = arith.constant 0 : index
    %c0_35 = arith.constant 0 : index
    %c0_36 = arith.constant 0 : index
    %57 = vector.load %arg4[%c0_34, %c0_35, %c0_36] : memref<2x128x384xf32, #tpu.memory_space<vmem>>, vector<1x128x384xf32>
    %58 = vector.shape_cast %57 : vector<1x128x384xf32> to vector<128x384xf32>
    %cst_37 = arith.constant dense<0.000000e+00> : vector<18x384xf32>
    %59 = tpu.matmul %39, %58, %cst_37 {dimension_numbers = #tpu.dot_dimension_numbers<[1], [0], [0], [1], [0, 0, 1, 1], [], []>} : vector<18x128xf32>, vector<128x384xf32>, vector<18x384xf32> -> vector<18x384xf32>
    %c0_38 = arith.constant 0 : index
    %c0_39 = arith.constant 0 : index
    %c0_40 = arith.constant 0 : index
    %60 = vector.load %arg5[%c0_38, %c0_39, %c0_40] : memref<2x1x384xf32, #tpu.memory_space<vmem>>, vector<1x1x384xf32>
    %61 = vector.shape_cast %60 : vector<1x1x384xf32> to vector<1x384xf32>
    %62 = vector.broadcast %61 : vector<1x384xf32> to vector<18x384xf32>
    %63 = arith.addf %59, %62 : vector<18x384xf32>
    %64 = vector.extract_strided_slice %63 {offsets = [0, 0], sizes = [18, 32], strides = [1, 1]} : vector<18x384xf32> to vector<18x32xf32>
    %65 = vector.extract_strided_slice %63 {offsets = [0, 128], sizes = [18, 32], strides = [1, 1]} : vector<18x384xf32> to vector<18x32xf32>
    %66 = vector.extract_strided_slice %63 {offsets = [0, 256], sizes = [18, 32], strides = [1, 1]} : vector<18x384xf32> to vector<18x32xf32>
    %cst_41 = arith.constant dense<0.000000e+00> : vector<18x18xf32>
    %67 = tpu.matmul %64, %65, %cst_41 {dimension_numbers = #tpu.dot_dimension_numbers<[1], [1], [0], [0], [0, 0, 1, 0], [], []>} : vector<18x32xf32>, vector<18x32xf32>, vector<18x18xf32> -> vector<18x18xf32>
    %cst_42 = arith.constant 0.176776692 : f32
    %68 = vector.broadcast %cst_42 : f32 to vector<18x18xf32>
    %69 = arith.mulf %67, %68 : vector<18x18xf32>
    %70 = arith.addf %69, %50 : vector<18x18xf32>
    %cst_43 = arith.constant dense<0xFF800000> : vector<18xf32>
    %71 = vector.multi_reduction <maximumf>, %70, %cst_43 [1] : vector<18x18xf32> to vector<18xf32>
    %72 = vector.shape_cast %71 : vector<18xf32> to vector<18x1xf32>
    %73 = vector.broadcast %72 : vector<18x1xf32> to vector<18x18xf32>
    %74 = arith.subf %70, %73 : vector<18x18xf32>
    %75 = math.exp %74 : vector<18x18xf32>
    %cst_44 = arith.constant dense<0.000000e+00> : vector<18xf32>
    %76 = vector.multi_reduction <add>, %75, %cst_44 [1] : vector<18x18xf32> to vector<18xf32>
    %77 = vector.shape_cast %76 : vector<18xf32> to vector<18x1xf32>
    %78 = tpu.reciprocal %77 {approx = true} : vector<18x1xf32> -> vector<18x1xf32>
    %79 = vector.broadcast %78 : vector<18x1xf32> to vector<18x18xf32>
    %80 = arith.mulf %75, %79 : vector<18x18xf32>
    %cst_45 = arith.constant dense<0.000000e+00> : vector<18x32xf32>
    %81 = tpu.matmul %80, %66, %cst_45 {dimension_numbers = #tpu.dot_dimension_numbers<[1], [0], [0], [1], [0, 0, 1, 1], [], []>} : vector<18x18xf32>, vector<18x32xf32>, vector<18x32xf32> -> vector<18x32xf32>
    %82 = vector.extract_strided_slice %63 {offsets = [0, 32], sizes = [18, 32], strides = [1, 1]} : vector<18x384xf32> to vector<18x32xf32>
    %83 = vector.extract_strided_slice %63 {offsets = [0, 160], sizes = [18, 32], strides = [1, 1]} : vector<18x384xf32> to vector<18x32xf32>
    %84 = vector.extract_strided_slice %63 {offsets = [0, 288], sizes = [18, 32], strides = [1, 1]} : vector<18x384xf32> to vector<18x32xf32>
    %cst_46 = arith.constant dense<0.000000e+00> : vector<18x18xf32>
    %85 = tpu.matmul %82, %83, %cst_46 {dimension_numbers = #tpu.dot_dimension_numbers<[1], [1], [0], [0], [0, 0, 1, 0], [], []>} : vector<18x32xf32>, vector<18x32xf32>, vector<18x18xf32> -> vector<18x18xf32>
    %cst_47 = arith.constant 0.176776692 : f32
    %86 = vector.broadcast %cst_47 : f32 to vector<18x18xf32>
    %87 = arith.mulf %85, %86 : vector<18x18xf32>
    %88 = arith.addf %87, %50 : vector<18x18xf32>
    %cst_48 = arith.constant dense<0xFF800000> : vector<18xf32>
    %89 = vector.multi_reduction <maximumf>, %88, %cst_48 [1] : vector<18x18xf32> to vector<18xf32>
    %90 = vector.shape_cast %89 : vector<18xf32> to vector<18x1xf32>
    %91 = vector.broadcast %90 : vector<18x1xf32> to vector<18x18xf32>
    %92 = arith.subf %88, %91 : vector<18x18xf32>
    %93 = math.exp %92 : vector<18x18xf32>
    %cst_49 = arith.constant dense<0.000000e+00> : vector<18xf32>
    %94 = vector.multi_reduction <add>, %93, %cst_49 [1] : vector<18x18xf32> to vector<18xf32>
    %95 = vector.shape_cast %94 : vector<18xf32> to vector<18x1xf32>
    %96 = tpu.reciprocal %95 {approx = true} : vector<18x1xf32> -> vector<18x1xf32>
    %97 = vector.broadcast %96 : vector<18x1xf32> to vector<18x18xf32>
    %98 = arith.mulf %93, %97 : vector<18x18xf32>
    %cst_50 = arith.constant dense<0.000000e+00> : vector<18x32xf32>
    %99 = tpu.matmul %98, %84, %cst_50 {dimension_numbers = #tpu.dot_dimension_numbers<[1], [0], [0], [1], [0, 0, 1, 1], [], []>} : vector<18x18xf32>, vector<18x32xf32>, vector<18x32xf32> -> vector<18x32xf32>
    %100 = vector.extract_strided_slice %63 {offsets = [0, 64], sizes = [18, 32], strides = [1, 1]} : vector<18x384xf32> to vector<18x32xf32>
    %101 = vector.extract_strided_slice %63 {offsets = [0, 192], sizes = [18, 32], strides = [1, 1]} : vector<18x384xf32> to vector<18x32xf32>
    %102 = vector.extract_strided_slice %63 {offsets = [0, 320], sizes = [18, 32], strides = [1, 1]} : vector<18x384xf32> to vector<18x32xf32>
    %cst_51 = arith.constant dense<0.000000e+00> : vector<18x18xf32>
    %103 = tpu.matmul %100, %101, %cst_51 {dimension_numbers = #tpu.dot_dimension_numbers<[1], [1], [0], [0], [0, 0, 1, 0], [], []>} : vector<18x32xf32>, vector<18x32xf32>, vector<18x18xf32> -> vector<18x18xf32>
    %cst_52 = arith.constant 0.176776692 : f32
    %104 = vector.broadcast %cst_52 : f32 to vector<18x18xf32>
    %105 = arith.mulf %103, %104 : vector<18x18xf32>
    %106 = arith.addf %105, %50 : vector<18x18xf32>
    %cst_53 = arith.constant dense<0xFF800000> : vector<18xf32>
    %107 = vector.multi_reduction <maximumf>, %106, %cst_53 [1] : vector<18x18xf32> to vector<18xf32>
    %108 = vector.shape_cast %107 : vector<18xf32> to vector<18x1xf32>
    %109 = vector.broadcast %108 : vector<18x1xf32> to vector<18x18xf32>
    %110 = arith.subf %106, %109 : vector<18x18xf32>
    %111 = math.exp %110 : vector<18x18xf32>
    %cst_54 = arith.constant dense<0.000000e+00> : vector<18xf32>
    %112 = vector.multi_reduction <add>, %111, %cst_54 [1] : vector<18x18xf32> to vector<18xf32>
    %113 = vector.shape_cast %112 : vector<18xf32> to vector<18x1xf32>
    %114 = tpu.reciprocal %113 {approx = true} : vector<18x1xf32> -> vector<18x1xf32>
    %115 = vector.broadcast %114 : vector<18x1xf32> to vector<18x18xf32>
    %116 = arith.mulf %111, %115 : vector<18x18xf32>
    %cst_55 = arith.constant dense<0.000000e+00> : vector<18x32xf32>
    %117 = tpu.matmul %116, %102, %cst_55 {dimension_numbers = #tpu.dot_dimension_numbers<[1], [0], [0], [1], [0, 0, 1, 1], [], []>} : vector<18x18xf32>, vector<18x32xf32>, vector<18x32xf32> -> vector<18x32xf32>
    %118 = vector.extract_strided_slice %63 {offsets = [0, 96], sizes = [18, 32], strides = [1, 1]} : vector<18x384xf32> to vector<18x32xf32>
    %119 = vector.extract_strided_slice %63 {offsets = [0, 224], sizes = [18, 32], strides = [1, 1]} : vector<18x384xf32> to vector<18x32xf32>
    %120 = vector.extract_strided_slice %63 {offsets = [0, 352], sizes = [18, 32], strides = [1, 1]} : vector<18x384xf32> to vector<18x32xf32>
    %cst_56 = arith.constant dense<0.000000e+00> : vector<18x18xf32>
    %121 = tpu.matmul %118, %119, %cst_56 {dimension_numbers = #tpu.dot_dimension_numbers<[1], [1], [0], [0], [0, 0, 1, 0], [], []>} : vector<18x32xf32>, vector<18x32xf32>, vector<18x18xf32> -> vector<18x18xf32>
    %cst_57 = arith.constant 0.176776692 : f32
    %122 = vector.broadcast %cst_57 : f32 to vector<18x18xf32>
    %123 = arith.mulf %121, %122 : vector<18x18xf32>
    %124 = arith.addf %123, %50 : vector<18x18xf32>
    %cst_58 = arith.constant dense<0xFF800000> : vector<18xf32>
    %125 = vector.multi_reduction <maximumf>, %124, %cst_58 [1] : vector<18x18xf32> to vector<18xf32>
    %126 = vector.shape_cast %125 : vector<18xf32> to vector<18x1xf32>
    %127 = vector.broadcast %126 : vector<18x1xf32> to vector<18x18xf32>
    %128 = arith.subf %124, %127 : vector<18x18xf32>
    %129 = math.exp %128 : vector<18x18xf32>
    %cst_59 = arith.constant dense<0.000000e+00> : vector<18xf32>
    %130 = vector.multi_reduction <add>, %129, %cst_59 [1] : vector<18x18xf32> to vector<18xf32>
    %131 = vector.shape_cast %130 : vector<18xf32> to vector<18x1xf32>
    %132 = tpu.reciprocal %131 {approx = true} : vector<18x1xf32> -> vector<18x1xf32>
    %133 = vector.broadcast %132 : vector<18x1xf32> to vector<18x18xf32>
    %134 = arith.mulf %129, %133 : vector<18x18xf32>
    %cst_60 = arith.constant dense<0.000000e+00> : vector<18x32xf32>
    %135 = tpu.matmul %134, %120, %cst_60 {dimension_numbers = #tpu.dot_dimension_numbers<[1], [0], [0], [1], [0, 0, 1, 1], [], []>} : vector<18x18xf32>, vector<18x32xf32>, vector<18x32xf32> -> vector<18x32xf32>
    %136 = tpu.concatenate %81, %99, %117, %135 in 1 : vector<18x32xf32>, vector<18x32xf32>, vector<18x32xf32>, vector<18x32xf32> -> vector<18x128xf32>
    %c0_61 = arith.constant 0 : index
    %c0_62 = arith.constant 0 : index
    %c0_63 = arith.constant 0 : index
    %137 = vector.load %arg6[%c0_61, %c0_62, %c0_63] : memref<2x128x128xf32, #tpu.memory_space<vmem>>, vector<1x128x128xf32>
    %138 = vector.shape_cast %137 : vector<1x128x128xf32> to vector<128x128xf32>
    %cst_64 = arith.constant dense<0.000000e+00> : vector<18x128xf32>
    %139 = tpu.matmul %136, %138, %cst_64 {dimension_numbers = #tpu.dot_dimension_numbers<[1], [0], [0], [1], [0, 0, 1, 1], [], []>} : vector<18x128xf32>, vector<128x128xf32>, vector<18x128xf32> -> vector<18x128xf32>
    %140 = vector.broadcast %51 : vector<1x128xf32> to vector<18x128xf32>
    %141 = arith.addf %139, %140 : vector<18x128xf32>
    %142 = arith.addf %39, %141 : vector<18x128xf32>
    %cst_65 = arith.constant dense<0.000000e+00> : vector<18xf32>
    %143 = vector.multi_reduction <add>, %142, %cst_65 [1] : vector<18x128xf32> to vector<18xf32>
    %144 = vector.shape_cast %143 : vector<18xf32> to vector<18x1xf32>
    %cst_66 = arith.constant 1.280000e+02 : f32
    %145 = vector.broadcast %cst_66 : f32 to vector<18x1xf32>
    %146 = arith.divf %144, %145 : vector<18x1xf32>
    %147 = arith.mulf %142, %142 : vector<18x128xf32>
    %cst_67 = arith.constant dense<0.000000e+00> : vector<18xf32>
    %148 = vector.multi_reduction <add>, %147, %cst_67 [1] : vector<18x128xf32> to vector<18xf32>
    %149 = vector.shape_cast %148 : vector<18xf32> to vector<18x1xf32>
    %cst_68 = arith.constant 1.280000e+02 : f32
    %150 = vector.broadcast %cst_68 : f32 to vector<18x1xf32>
    %151 = arith.divf %149, %150 : vector<18x1xf32>
    %152 = arith.mulf %146, %146 : vector<18x1xf32>
    %153 = arith.subf %151, %152 : vector<18x1xf32>
    %154 = vector.broadcast %146 : vector<18x1xf32> to vector<18x128xf32>
    %155 = arith.subf %142, %154 : vector<18x128xf32>
    %cst_69 = arith.constant 9.99999974E-6 : f32
    %156 = vector.broadcast %cst_69 : f32 to vector<18x1xf32>
    %157 = arith.addf %153, %156 : vector<18x1xf32>
    %158 = math.rsqrt %157 : vector<18x1xf32>
    %159 = vector.broadcast %158 : vector<18x1xf32> to vector<18x128xf32>
    %160 = arith.mulf %155, %159 : vector<18x128xf32>
    %161 = vector.broadcast %52 : vector<1x128xf32> to vector<18x128xf32>
    %162 = arith.mulf %160, %161 : vector<18x128xf32>
    %163 = vector.broadcast %53 : vector<1x128xf32> to vector<18x128xf32>
    %164 = arith.addf %162, %163 : vector<18x128xf32>
    %c0_70 = arith.constant 0 : index
    %c0_71 = arith.constant 0 : index
    %c0_72 = arith.constant 0 : index
    %165 = vector.load %arg7[%c0_70, %c0_71, %c0_72] : memref<2x128x256xf32, #tpu.memory_space<vmem>>, vector<1x128x256xf32>
    %166 = vector.shape_cast %165 : vector<1x128x256xf32> to vector<128x256xf32>
    %cst_73 = arith.constant dense<0.000000e+00> : vector<18x256xf32>
    %167 = tpu.matmul %164, %166, %cst_73 {dimension_numbers = #tpu.dot_dimension_numbers<[1], [0], [0], [1], [0, 0, 1, 1], [], []>} : vector<18x128xf32>, vector<128x256xf32>, vector<18x256xf32> -> vector<18x256xf32>
    %c0_74 = arith.constant 0 : index
    %c0_75 = arith.constant 0 : index
    %c0_76 = arith.constant 0 : index
    %168 = vector.load %arg8[%c0_74, %c0_75, %c0_76] : memref<2x1x256xf32, #tpu.memory_space<vmem>>, vector<1x1x256xf32>
    %169 = vector.shape_cast %168 : vector<1x1x256xf32> to vector<1x256xf32>
    %170 = vector.broadcast %169 : vector<1x256xf32> to vector<18x256xf32>
    %171 = arith.addf %167, %170 : vector<18x256xf32>
    %cst_77 = arith.constant 0.000000e+00 : f32
    %172 = vector.broadcast %cst_77 : f32 to vector<18x256xf32>
    %173 = arith.maximumf %171, %172 : vector<18x256xf32>
    %c0_78 = arith.constant 0 : index
    %c0_79 = arith.constant 0 : index
    %c0_80 = arith.constant 0 : index
    %174 = vector.load %arg9[%c0_78, %c0_79, %c0_80] : memref<2x256x128xf32, #tpu.memory_space<vmem>>, vector<1x256x128xf32>
    %175 = vector.shape_cast %174 : vector<1x256x128xf32> to vector<256x128xf32>
    %cst_81 = arith.constant dense<0.000000e+00> : vector<18x128xf32>
    %176 = tpu.matmul %173, %175, %cst_81 {dimension_numbers = #tpu.dot_dimension_numbers<[1], [0], [0], [1], [0, 0, 1, 1], [], []>} : vector<18x256xf32>, vector<256x128xf32>, vector<18x128xf32> -> vector<18x128xf32>
    %177 = vector.broadcast %54 : vector<1x128xf32> to vector<18x128xf32>
    %178 = arith.addf %176, %177 : vector<18x128xf32>
    %179 = arith.addf %164, %178 : vector<18x128xf32>
    %cst_82 = arith.constant dense<0.000000e+00> : vector<18xf32>
    %180 = vector.multi_reduction <add>, %179, %cst_82 [1] : vector<18x128xf32> to vector<18xf32>
    %181 = vector.shape_cast %180 : vector<18xf32> to vector<18x1xf32>
    %cst_83 = arith.constant 1.280000e+02 : f32
    %182 = vector.broadcast %cst_83 : f32 to vector<18x1xf32>
    %183 = arith.divf %181, %182 : vector<18x1xf32>
    %184 = arith.mulf %179, %179 : vector<18x128xf32>
    %cst_84 = arith.constant dense<0.000000e+00> : vector<18xf32>
    %185 = vector.multi_reduction <add>, %184, %cst_84 [1] : vector<18x128xf32> to vector<18xf32>
    %186 = vector.shape_cast %185 : vector<18xf32> to vector<18x1xf32>
    %cst_85 = arith.constant 1.280000e+02 : f32
    %187 = vector.broadcast %cst_85 : f32 to vector<18x1xf32>
    %188 = arith.divf %186, %187 : vector<18x1xf32>
    %189 = arith.mulf %183, %183 : vector<18x1xf32>
    %190 = arith.subf %188, %189 : vector<18x1xf32>
    %191 = vector.broadcast %183 : vector<18x1xf32> to vector<18x128xf32>
    %192 = arith.subf %179, %191 : vector<18x128xf32>
    %cst_86 = arith.constant 9.99999974E-6 : f32
    %193 = vector.broadcast %cst_86 : f32 to vector<18x1xf32>
    %194 = arith.addf %190, %193 : vector<18x1xf32>
    %195 = math.rsqrt %194 : vector<18x1xf32>
    %196 = vector.broadcast %195 : vector<18x1xf32> to vector<18x128xf32>
    %197 = arith.mulf %192, %196 : vector<18x128xf32>
    %198 = vector.broadcast %55 : vector<1x128xf32> to vector<18x128xf32>
    %199 = arith.mulf %197, %198 : vector<18x128xf32>
    %200 = vector.broadcast %56 : vector<1x128xf32> to vector<18x128xf32>
    %201 = arith.addf %199, %200 : vector<18x128xf32>
    %c10_87 = arith.constant 10 : index
    %c0_88 = arith.constant 0 : index
    %202 = vector.load %arg3[%c10_87, %c0_88] : memref<19x128xf32, #tpu.memory_space<vmem>>, vector<1x128xf32>
    %c11 = arith.constant 11 : index
    %c0_89 = arith.constant 0 : index
    %203 = vector.load %arg3[%c11, %c0_89] : memref<19x128xf32, #tpu.memory_space<vmem>>, vector<1x128xf32>
    %c12 = arith.constant 12 : index
    %c0_90 = arith.constant 0 : index
    %204 = vector.load %arg3[%c12, %c0_90] : memref<19x128xf32, #tpu.memory_space<vmem>>, vector<1x128xf32>
    %c13 = arith.constant 13 : index
    %c0_91 = arith.constant 0 : index
    %205 = vector.load %arg3[%c13, %c0_91] : memref<19x128xf32, #tpu.memory_space<vmem>>, vector<1x128xf32>
    %c14 = arith.constant 14 : index
    %c0_92 = arith.constant 0 : index
    %206 = vector.load %arg3[%c14, %c0_92] : memref<19x128xf32, #tpu.memory_space<vmem>>, vector<1x128xf32>
    %c15 = arith.constant 15 : index
    %c0_93 = arith.constant 0 : index
    %207 = vector.load %arg3[%c15, %c0_93] : memref<19x128xf32, #tpu.memory_space<vmem>>, vector<1x128xf32>
    %c1_94 = arith.constant 1 : index
    %c0_95 = arith.constant 0 : index
    %c0_96 = arith.constant 0 : index
    %208 = vector.load %arg4[%c1_94, %c0_95, %c0_96] : memref<2x128x384xf32, #tpu.memory_space<vmem>>, vector<1x128x384xf32>
    %209 = vector.shape_cast %208 : vector<1x128x384xf32> to vector<128x384xf32>
    %cst_97 = arith.constant dense<0.000000e+00> : vector<18x384xf32>
    %210 = tpu.matmul %201, %209, %cst_97 {dimension_numbers = #tpu.dot_dimension_numbers<[1], [0], [0], [1], [0, 0, 1, 1], [], []>} : vector<18x128xf32>, vector<128x384xf32>, vector<18x384xf32> -> vector<18x384xf32>
    %c1_98 = arith.constant 1 : index
    %c0_99 = arith.constant 0 : index
    %c0_100 = arith.constant 0 : index
    %211 = vector.load %arg5[%c1_98, %c0_99, %c0_100] : memref<2x1x384xf32, #tpu.memory_space<vmem>>, vector<1x1x384xf32>
    %212 = vector.shape_cast %211 : vector<1x1x384xf32> to vector<1x384xf32>
    %213 = vector.broadcast %212 : vector<1x384xf32> to vector<18x384xf32>
    %214 = arith.addf %210, %213 : vector<18x384xf32>
    %215 = vector.extract_strided_slice %214 {offsets = [0, 0], sizes = [18, 32], strides = [1, 1]} : vector<18x384xf32> to vector<18x32xf32>
    %216 = vector.extract_strided_slice %214 {offsets = [0, 128], sizes = [18, 32], strides = [1, 1]} : vector<18x384xf32> to vector<18x32xf32>
    %217 = vector.extract_strided_slice %214 {offsets = [0, 256], sizes = [18, 32], strides = [1, 1]} : vector<18x384xf32> to vector<18x32xf32>
    %cst_101 = arith.constant dense<0.000000e+00> : vector<18x18xf32>
    %218 = tpu.matmul %215, %216, %cst_101 {dimension_numbers = #tpu.dot_dimension_numbers<[1], [1], [0], [0], [0, 0, 1, 0], [], []>} : vector<18x32xf32>, vector<18x32xf32>, vector<18x18xf32> -> vector<18x18xf32>
    %cst_102 = arith.constant 0.176776692 : f32
    %219 = vector.broadcast %cst_102 : f32 to vector<18x18xf32>
    %220 = arith.mulf %218, %219 : vector<18x18xf32>
    %221 = arith.addf %220, %50 : vector<18x18xf32>
    %cst_103 = arith.constant dense<0xFF800000> : vector<18xf32>
    %222 = vector.multi_reduction <maximumf>, %221, %cst_103 [1] : vector<18x18xf32> to vector<18xf32>
    %223 = vector.shape_cast %222 : vector<18xf32> to vector<18x1xf32>
    %224 = vector.broadcast %223 : vector<18x1xf32> to vector<18x18xf32>
    %225 = arith.subf %221, %224 : vector<18x18xf32>
    %226 = math.exp %225 : vector<18x18xf32>
    %cst_104 = arith.constant dense<0.000000e+00> : vector<18xf32>
    %227 = vector.multi_reduction <add>, %226, %cst_104 [1] : vector<18x18xf32> to vector<18xf32>
    %228 = vector.shape_cast %227 : vector<18xf32> to vector<18x1xf32>
    %229 = tpu.reciprocal %228 {approx = true} : vector<18x1xf32> -> vector<18x1xf32>
    %230 = vector.broadcast %229 : vector<18x1xf32> to vector<18x18xf32>
    %231 = arith.mulf %226, %230 : vector<18x18xf32>
    %cst_105 = arith.constant dense<0.000000e+00> : vector<18x32xf32>
    %232 = tpu.matmul %231, %217, %cst_105 {dimension_numbers = #tpu.dot_dimension_numbers<[1], [0], [0], [1], [0, 0, 1, 1], [], []>} : vector<18x18xf32>, vector<18x32xf32>, vector<18x32xf32> -> vector<18x32xf32>
    %233 = vector.extract_strided_slice %214 {offsets = [0, 32], sizes = [18, 32], strides = [1, 1]} : vector<18x384xf32> to vector<18x32xf32>
    %234 = vector.extract_strided_slice %214 {offsets = [0, 160], sizes = [18, 32], strides = [1, 1]} : vector<18x384xf32> to vector<18x32xf32>
    %235 = vector.extract_strided_slice %214 {offsets = [0, 288], sizes = [18, 32], strides = [1, 1]} : vector<18x384xf32> to vector<18x32xf32>
    %cst_106 = arith.constant dense<0.000000e+00> : vector<18x18xf32>
    %236 = tpu.matmul %233, %234, %cst_106 {dimension_numbers = #tpu.dot_dimension_numbers<[1], [1], [0], [0], [0, 0, 1, 0], [], []>} : vector<18x32xf32>, vector<18x32xf32>, vector<18x18xf32> -> vector<18x18xf32>
    %cst_107 = arith.constant 0.176776692 : f32
    %237 = vector.broadcast %cst_107 : f32 to vector<18x18xf32>
    %238 = arith.mulf %236, %237 : vector<18x18xf32>
    %239 = arith.addf %238, %50 : vector<18x18xf32>
    %cst_108 = arith.constant dense<0xFF800000> : vector<18xf32>
    %240 = vector.multi_reduction <maximumf>, %239, %cst_108 [1] : vector<18x18xf32> to vector<18xf32>
    %241 = vector.shape_cast %240 : vector<18xf32> to vector<18x1xf32>
    %242 = vector.broadcast %241 : vector<18x1xf32> to vector<18x18xf32>
    %243 = arith.subf %239, %242 : vector<18x18xf32>
    %244 = math.exp %243 : vector<18x18xf32>
    %cst_109 = arith.constant dense<0.000000e+00> : vector<18xf32>
    %245 = vector.multi_reduction <add>, %244, %cst_109 [1] : vector<18x18xf32> to vector<18xf32>
    %246 = vector.shape_cast %245 : vector<18xf32> to vector<18x1xf32>
    %247 = tpu.reciprocal %246 {approx = true} : vector<18x1xf32> -> vector<18x1xf32>
    %248 = vector.broadcast %247 : vector<18x1xf32> to vector<18x18xf32>
    %249 = arith.mulf %244, %248 : vector<18x18xf32>
    %cst_110 = arith.constant dense<0.000000e+00> : vector<18x32xf32>
    %250 = tpu.matmul %249, %235, %cst_110 {dimension_numbers = #tpu.dot_dimension_numbers<[1], [0], [0], [1], [0, 0, 1, 1], [], []>} : vector<18x18xf32>, vector<18x32xf32>, vector<18x32xf32> -> vector<18x32xf32>
    %251 = vector.extract_strided_slice %214 {offsets = [0, 64], sizes = [18, 32], strides = [1, 1]} : vector<18x384xf32> to vector<18x32xf32>
    %252 = vector.extract_strided_slice %214 {offsets = [0, 192], sizes = [18, 32], strides = [1, 1]} : vector<18x384xf32> to vector<18x32xf32>
    %253 = vector.extract_strided_slice %214 {offsets = [0, 320], sizes = [18, 32], strides = [1, 1]} : vector<18x384xf32> to vector<18x32xf32>
    %cst_111 = arith.constant dense<0.000000e+00> : vector<18x18xf32>
    %254 = tpu.matmul %251, %252, %cst_111 {dimension_numbers = #tpu.dot_dimension_numbers<[1], [1], [0], [0], [0, 0, 1, 0], [], []>} : vector<18x32xf32>, vector<18x32xf32>, vector<18x18xf32> -> vector<18x18xf32>
    %cst_112 = arith.constant 0.176776692 : f32
    %255 = vector.broadcast %cst_112 : f32 to vector<18x18xf32>
    %256 = arith.mulf %254, %255 : vector<18x18xf32>
    %257 = arith.addf %256, %50 : vector<18x18xf32>
    %cst_113 = arith.constant dense<0xFF800000> : vector<18xf32>
    %258 = vector.multi_reduction <maximumf>, %257, %cst_113 [1] : vector<18x18xf32> to vector<18xf32>
    %259 = vector.shape_cast %258 : vector<18xf32> to vector<18x1xf32>
    %260 = vector.broadcast %259 : vector<18x1xf32> to vector<18x18xf32>
    %261 = arith.subf %257, %260 : vector<18x18xf32>
    %262 = math.exp %261 : vector<18x18xf32>
    %cst_114 = arith.constant dense<0.000000e+00> : vector<18xf32>
    %263 = vector.multi_reduction <add>, %262, %cst_114 [1] : vector<18x18xf32> to vector<18xf32>
    %264 = vector.shape_cast %263 : vector<18xf32> to vector<18x1xf32>
    %265 = tpu.reciprocal %264 {approx = true} : vector<18x1xf32> -> vector<18x1xf32>
    %266 = vector.broadcast %265 : vector<18x1xf32> to vector<18x18xf32>
    %267 = arith.mulf %262, %266 : vector<18x18xf32>
    %cst_115 = arith.constant dense<0.000000e+00> : vector<18x32xf32>
    %268 = tpu.matmul %267, %253, %cst_115 {dimension_numbers = #tpu.dot_dimension_numbers<[1], [0], [0], [1], [0, 0, 1, 1], [], []>} : vector<18x18xf32>, vector<18x32xf32>, vector<18x32xf32> -> vector<18x32xf32>
    %269 = vector.extract_strided_slice %214 {offsets = [0, 96], sizes = [18, 32], strides = [1, 1]} : vector<18x384xf32> to vector<18x32xf32>
    %270 = vector.extract_strided_slice %214 {offsets = [0, 224], sizes = [18, 32], strides = [1, 1]} : vector<18x384xf32> to vector<18x32xf32>
    %271 = vector.extract_strided_slice %214 {offsets = [0, 352], sizes = [18, 32], strides = [1, 1]} : vector<18x384xf32> to vector<18x32xf32>
    %cst_116 = arith.constant dense<0.000000e+00> : vector<18x18xf32>
    %272 = tpu.matmul %269, %270, %cst_116 {dimension_numbers = #tpu.dot_dimension_numbers<[1], [1], [0], [0], [0, 0, 1, 0], [], []>} : vector<18x32xf32>, vector<18x32xf32>, vector<18x18xf32> -> vector<18x18xf32>
    %cst_117 = arith.constant 0.176776692 : f32
    %273 = vector.broadcast %cst_117 : f32 to vector<18x18xf32>
    %274 = arith.mulf %272, %273 : vector<18x18xf32>
    %275 = arith.addf %274, %50 : vector<18x18xf32>
    %cst_118 = arith.constant dense<0xFF800000> : vector<18xf32>
    %276 = vector.multi_reduction <maximumf>, %275, %cst_118 [1] : vector<18x18xf32> to vector<18xf32>
    %277 = vector.shape_cast %276 : vector<18xf32> to vector<18x1xf32>
    %278 = vector.broadcast %277 : vector<18x1xf32> to vector<18x18xf32>
    %279 = arith.subf %275, %278 : vector<18x18xf32>
    %280 = math.exp %279 : vector<18x18xf32>
    %cst_119 = arith.constant dense<0.000000e+00> : vector<18xf32>
    %281 = vector.multi_reduction <add>, %280, %cst_119 [1] : vector<18x18xf32> to vector<18xf32>
    %282 = vector.shape_cast %281 : vector<18xf32> to vector<18x1xf32>
    %283 = tpu.reciprocal %282 {approx = true} : vector<18x1xf32> -> vector<18x1xf32>
    %284 = vector.broadcast %283 : vector<18x1xf32> to vector<18x18xf32>
    %285 = arith.mulf %280, %284 : vector<18x18xf32>
    %cst_120 = arith.constant dense<0.000000e+00> : vector<18x32xf32>
    %286 = tpu.matmul %285, %271, %cst_120 {dimension_numbers = #tpu.dot_dimension_numbers<[1], [0], [0], [1], [0, 0, 1, 1], [], []>} : vector<18x18xf32>, vector<18x32xf32>, vector<18x32xf32> -> vector<18x32xf32>
    %287 = tpu.concatenate %232, %250, %268, %286 in 1 : vector<18x32xf32>, vector<18x32xf32>, vector<18x32xf32>, vector<18x32xf32> -> vector<18x128xf32>
    %c1_121 = arith.constant 1 : index
    %c0_122 = arith.constant 0 : index
    %c0_123 = arith.constant 0 : index
    %288 = vector.load %arg6[%c1_121, %c0_122, %c0_123] : memref<2x128x128xf32, #tpu.memory_space<vmem>>, vector<1x128x128xf32>
    %289 = vector.shape_cast %288 : vector<1x128x128xf32> to vector<128x128xf32>
    %cst_124 = arith.constant dense<0.000000e+00> : vector<18x128xf32>
    %290 = tpu.matmul %287, %289, %cst_124 {dimension_numbers = #tpu.dot_dimension_numbers<[1], [0], [0], [1], [0, 0, 1, 1], [], []>} : vector<18x128xf32>, vector<128x128xf32>, vector<18x128xf32> -> vector<18x128xf32>
    %291 = vector.broadcast %202 : vector<1x128xf32> to vector<18x128xf32>
    %292 = arith.addf %290, %291 : vector<18x128xf32>
    %293 = arith.addf %201, %292 : vector<18x128xf32>
    %cst_125 = arith.constant dense<0.000000e+00> : vector<18xf32>
    %294 = vector.multi_reduction <add>, %293, %cst_125 [1] : vector<18x128xf32> to vector<18xf32>
    %295 = vector.shape_cast %294 : vector<18xf32> to vector<18x1xf32>
    %cst_126 = arith.constant 1.280000e+02 : f32
    %296 = vector.broadcast %cst_126 : f32 to vector<18x1xf32>
    %297 = arith.divf %295, %296 : vector<18x1xf32>
    %298 = arith.mulf %293, %293 : vector<18x128xf32>
    %cst_127 = arith.constant dense<0.000000e+00> : vector<18xf32>
    %299 = vector.multi_reduction <add>, %298, %cst_127 [1] : vector<18x128xf32> to vector<18xf32>
    %300 = vector.shape_cast %299 : vector<18xf32> to vector<18x1xf32>
    %cst_128 = arith.constant 1.280000e+02 : f32
    %301 = vector.broadcast %cst_128 : f32 to vector<18x1xf32>
    %302 = arith.divf %300, %301 : vector<18x1xf32>
    %303 = arith.mulf %297, %297 : vector<18x1xf32>
    %304 = arith.subf %302, %303 : vector<18x1xf32>
    %305 = vector.broadcast %297 : vector<18x1xf32> to vector<18x128xf32>
    %306 = arith.subf %293, %305 : vector<18x128xf32>
    %cst_129 = arith.constant 9.99999974E-6 : f32
    %307 = vector.broadcast %cst_129 : f32 to vector<18x1xf32>
    %308 = arith.addf %304, %307 : vector<18x1xf32>
    %309 = math.rsqrt %308 : vector<18x1xf32>
    %310 = vector.broadcast %309 : vector<18x1xf32> to vector<18x128xf32>
    %311 = arith.mulf %306, %310 : vector<18x128xf32>
    %312 = vector.broadcast %203 : vector<1x128xf32> to vector<18x128xf32>
    %313 = arith.mulf %311, %312 : vector<18x128xf32>
    %314 = vector.broadcast %204 : vector<1x128xf32> to vector<18x128xf32>
    %315 = arith.addf %313, %314 : vector<18x128xf32>
    %c1_130 = arith.constant 1 : index
    %c0_131 = arith.constant 0 : index
    %c0_132 = arith.constant 0 : index
    %316 = vector.load %arg7[%c1_130, %c0_131, %c0_132] : memref<2x128x256xf32, #tpu.memory_space<vmem>>, vector<1x128x256xf32>
    %317 = vector.shape_cast %316 : vector<1x128x256xf32> to vector<128x256xf32>
    %cst_133 = arith.constant dense<0.000000e+00> : vector<18x256xf32>
    %318 = tpu.matmul %315, %317, %cst_133 {dimension_numbers = #tpu.dot_dimension_numbers<[1], [0], [0], [1], [0, 0, 1, 1], [], []>} : vector<18x128xf32>, vector<128x256xf32>, vector<18x256xf32> -> vector<18x256xf32>
    %c1_134 = arith.constant 1 : index
    %c0_135 = arith.constant 0 : index
    %c0_136 = arith.constant 0 : index
    %319 = vector.load %arg8[%c1_134, %c0_135, %c0_136] : memref<2x1x256xf32, #tpu.memory_space<vmem>>, vector<1x1x256xf32>
    %320 = vector.shape_cast %319 : vector<1x1x256xf32> to vector<1x256xf32>
    %321 = vector.broadcast %320 : vector<1x256xf32> to vector<18x256xf32>
    %322 = arith.addf %318, %321 : vector<18x256xf32>
    %cst_137 = arith.constant 0.000000e+00 : f32
    %323 = vector.broadcast %cst_137 : f32 to vector<18x256xf32>
    %324 = arith.maximumf %322, %323 : vector<18x256xf32>
    %c1_138 = arith.constant 1 : index
    %c0_139 = arith.constant 0 : index
    %c0_140 = arith.constant 0 : index
    %325 = vector.load %arg9[%c1_138, %c0_139, %c0_140] : memref<2x256x128xf32, #tpu.memory_space<vmem>>, vector<1x256x128xf32>
    %326 = vector.shape_cast %325 : vector<1x256x128xf32> to vector<256x128xf32>
    %cst_141 = arith.constant dense<0.000000e+00> : vector<18x128xf32>
    %327 = tpu.matmul %324, %326, %cst_141 {dimension_numbers = #tpu.dot_dimension_numbers<[1], [0], [0], [1], [0, 0, 1, 1], [], []>} : vector<18x256xf32>, vector<256x128xf32>, vector<18x128xf32> -> vector<18x128xf32>
    %328 = vector.broadcast %205 : vector<1x128xf32> to vector<18x128xf32>
    %329 = arith.addf %327, %328 : vector<18x128xf32>
    %330 = arith.addf %315, %329 : vector<18x128xf32>
    %cst_142 = arith.constant dense<0.000000e+00> : vector<18xf32>
    %331 = vector.multi_reduction <add>, %330, %cst_142 [1] : vector<18x128xf32> to vector<18xf32>
    %332 = vector.shape_cast %331 : vector<18xf32> to vector<18x1xf32>
    %cst_143 = arith.constant 1.280000e+02 : f32
    %333 = vector.broadcast %cst_143 : f32 to vector<18x1xf32>
    %334 = arith.divf %332, %333 : vector<18x1xf32>
    %335 = arith.mulf %330, %330 : vector<18x128xf32>
    %cst_144 = arith.constant dense<0.000000e+00> : vector<18xf32>
    %336 = vector.multi_reduction <add>, %335, %cst_144 [1] : vector<18x128xf32> to vector<18xf32>
    %337 = vector.shape_cast %336 : vector<18xf32> to vector<18x1xf32>
    %cst_145 = arith.constant 1.280000e+02 : f32
    %338 = vector.broadcast %cst_145 : f32 to vector<18x1xf32>
    %339 = arith.divf %337, %338 : vector<18x1xf32>
    %340 = arith.mulf %334, %334 : vector<18x1xf32>
    %341 = arith.subf %339, %340 : vector<18x1xf32>
    %342 = vector.broadcast %334 : vector<18x1xf32> to vector<18x128xf32>
    %343 = arith.subf %330, %342 : vector<18x128xf32>
    %cst_146 = arith.constant 9.99999974E-6 : f32
    %344 = vector.broadcast %cst_146 : f32 to vector<18x1xf32>
    %345 = arith.addf %341, %344 : vector<18x1xf32>
    %346 = math.rsqrt %345 : vector<18x1xf32>
    %347 = vector.broadcast %346 : vector<18x1xf32> to vector<18x128xf32>
    %348 = arith.mulf %343, %347 : vector<18x128xf32>
    %349 = vector.broadcast %206 : vector<1x128xf32> to vector<18x128xf32>
    %350 = arith.mulf %348, %349 : vector<18x128xf32>
    %351 = vector.broadcast %207 : vector<1x128xf32> to vector<18x128xf32>
    %352 = arith.addf %350, %351 : vector<18x128xf32>
    %353 = vector.extract_strided_slice %352 {offsets = [0, 0], sizes = [1, 128], strides = [1, 1]} : vector<18x128xf32> to vector<1x128xf32>
    %354 = vector.extract_strided_slice %352 {offsets = [9, 0], sizes = [1, 128], strides = [1, 1]} : vector<18x128xf32> to vector<1x128xf32>
    %355 = tpu.concatenate %353, %354 in 0 : vector<1x128xf32>, vector<1x128xf32> -> vector<2x128xf32>
    %c16 = arith.constant 16 : index
    %c0_147 = arith.constant 0 : index
    %356 = vector.load %arg3[%c16, %c0_147] : memref<19x128xf32, #tpu.memory_space<vmem>>, vector<1x128xf32>
    %c17 = arith.constant 17 : index
    %c0_148 = arith.constant 0 : index
    %357 = vector.load %arg3[%c17, %c0_148] : memref<19x128xf32, #tpu.memory_space<vmem>>, vector<1x128xf32>
    %cst_149 = arith.constant dense<0.000000e+00> : vector<2xf32>
    %358 = vector.multi_reduction <add>, %355, %cst_149 [1] : vector<2x128xf32> to vector<2xf32>
    %359 = vector.shape_cast %358 : vector<2xf32> to vector<2x1xf32>
    %cst_150 = arith.constant 1.280000e+02 : f32
    %360 = vector.broadcast %cst_150 : f32 to vector<2x1xf32>
    %361 = arith.divf %359, %360 : vector<2x1xf32>
    %362 = arith.mulf %355, %355 : vector<2x128xf32>
    %cst_151 = arith.constant dense<0.000000e+00> : vector<2xf32>
    %363 = vector.multi_reduction <add>, %362, %cst_151 [1] : vector<2x128xf32> to vector<2xf32>
    %364 = vector.shape_cast %363 : vector<2xf32> to vector<2x1xf32>
    %cst_152 = arith.constant 1.280000e+02 : f32
    %365 = vector.broadcast %cst_152 : f32 to vector<2x1xf32>
    %366 = arith.divf %364, %365 : vector<2x1xf32>
    %367 = arith.mulf %361, %361 : vector<2x1xf32>
    %368 = arith.subf %366, %367 : vector<2x1xf32>
    %369 = vector.broadcast %361 : vector<2x1xf32> to vector<2x128xf32>
    %370 = arith.subf %355, %369 : vector<2x128xf32>
    %cst_153 = arith.constant 9.99999974E-6 : f32
    %371 = vector.broadcast %cst_153 : f32 to vector<2x1xf32>
    %372 = arith.addf %368, %371 : vector<2x1xf32>
    %373 = math.rsqrt %372 : vector<2x1xf32>
    %374 = vector.broadcast %373 : vector<2x1xf32> to vector<2x128xf32>
    %375 = arith.mulf %370, %374 : vector<2x128xf32>
    %376 = vector.broadcast %356 : vector<1x128xf32> to vector<2x128xf32>
    %377 = arith.mulf %375, %376 : vector<2x128xf32>
    %378 = vector.broadcast %357 : vector<1x128xf32> to vector<2x128xf32>
    %379 = arith.addf %377, %378 : vector<2x128xf32>
    %c0_154 = arith.constant 0 : index
    %c0_155 = arith.constant 0 : index
    %380 = vector.load %arg10[%c0_154, %c0_155] : memref<128x32xf32, #tpu.memory_space<vmem>>, vector<128x32xf32>
    %cst_156 = arith.constant dense<0.000000e+00> : vector<2x32xf32>
    %381 = tpu.matmul %379, %380, %cst_156 {dimension_numbers = #tpu.dot_dimension_numbers<[1], [0], [0], [1], [0, 0, 1, 1], [], []>} : vector<2x128xf32>, vector<128x32xf32>, vector<2x32xf32> -> vector<2x32xf32>
    %c18 = arith.constant 18 : index
    %c0_157 = arith.constant 0 : index
    %382 = vector.load %arg3[%c18, %c0_157] : memref<19x128xf32, #tpu.memory_space<vmem>>, vector<1x128xf32>
    %383 = vector.extract_strided_slice %382 {offsets = [0, 0], sizes = [1, 32], strides = [1, 1]} : vector<1x128xf32> to vector<1x32xf32>
    %384 = vector.broadcast %383 : vector<1x32xf32> to vector<2x32xf32>
    %385 = arith.addf %381, %384 : vector<2x32xf32>
    %c0_158 = arith.constant 0 : index
    %c0_159 = arith.constant 0 : index
    %386 = vector.load %arg11[%c0_158, %c0_159] : memref<2x32xf32, #tpu.memory_space<vmem>>, vector<2x32xf32>
    tpu.vector_store %arg11[%c0_158, %c0_159], %385 {strides = array<i32>} : memref<2x32xf32, #tpu.memory_space<vmem>>, vector<2x32xf32>,
    return
  }
}

</mosaic_0001>

<bundles_post_ra>
// kernel: transformer_forward.1
= control target key start
LH: loop header
LB: loop body
LE: loop exit
PB: predicated region body
PF: predicated region fallthrough
CT: control target
= control target key end

     0   :  { %16 = vsyncpa [#allocation4], 0  ;;  %s3724_s0 = inlined_call_operand.vmem [shape: f32[16,16], index: 0, kind: input, shape index: {}]   ;;  %s3725_s1 = inlined_call_operand.vmem [shape: f32[16,128], index: 1, kind: input, shape index: {}]   ;;  %s3726_s2 = inlined_call_operand.vmem [shape: f32[16,128], index: 2, kind: input, shape index: {}]   ;;  %s3727_s3 = inlined_call_operand.vmem [shape: f32[19,128], index: 3, kind: input, shape index: {}]   ;;  %s3728_s4 = inlined_call_operand.hbm [shape: f32[2,128,384], index: 4, kind: input, shape index: {}]   ;;  %s3729_s5 = inlined_call_operand.vmem [shape: f32[2,1,384], index: 5, kind: input, shape index: {}]   ;;  %s3730_s6 = inlined_call_operand.hbm [shape: f32[2,128,128], index: 6, kind: input, shape index: {}]   ;;  %s3731_s7 = inlined_call_operand.hbm [shape: f32[2,128,256], index: 7, kind: input, shape index: {}]   ;;  %s3732_s8 = inlined_call_operand.vmem [shape: f32[2,1,256], index: 8, kind: input, shape index: {}]   ;;  %s3733_s9 = inlined_call_operand.hbm [shape: f32[2,256,128], index: 9, kind: input, shape index: {}]   ;;  %s3734_s10 = inlined_call_operand.vmem [shape: f32[128,32], index: 10, kind: input, shape index: {}]   ;;  %s3735_s11 = inlined_call_operand.hbm [shape: f32[2,32], index: 11, kind: output, shape index: {}]  }
   0x1   :  { %17 = vsyncpa [#allocation7], 0 }
   0x2   :  { %18 = vsyncpa [#allocation10], 0  ;;  %s47_s19 = sshll.u32 %s3730_s6, 4  ;;  %s48_s19 = int_to_ptr.hbm [resolvable:$true] %s47_s19 }
   0x3   :  { %19 = vsyncpa [#allocation5], 0  ;;  %s2889_s20 = smov [#allocation6]   ;;  %s32_s24 = sshll.u32 %s3728_s4, 4  ;;  %s33_s24 = int_to_ptr.hbm [resolvable:$true] %s32_s24 }
   0x4   :  { %s49_s21 = sshll.u32 %s2889_s20, 4  ;;  %s2890_s25 = smov 128   ;;  %s50_s21 = int_to_ptr.vmem [resolvable:$true] %s49_s21 }
   0x5   :  { %s2891_s26 = smov 8   ;;  %s2892_s27 = smov [#allocation3]  }
   0x6   :  { %55 = dma.hbm_to_vmem [thread:$0]  %s48_s19, 4096, %s50_s21, [#allocation7], %s2890_s25, %s2890_s25, %s2891_s26  }
   0x7   :  { %s34_s28 = sshll.u32 %s2892_s27, 4  ;;  %s2893_s29 = smov 384   ;;  %s35_s28 = int_to_ptr.vmem [resolvable:$true] %s34_s28 }
   0x8   :  { %s2894_s30 = smov 24   ;;  %s60_s13 = sshll.u32 %s3731_s7, 4  ;;  %s61_s13 = int_to_ptr.hbm [resolvable:$true] %s60_s13 }
   0x9   :  { %40 = dma.hbm_to_vmem [thread:$0]  %s33_s24, 12288, %s35_s28, [#allocation4], %s2893_s29, %s2893_s29, %s2894_s30  }
   0xa   :  { %s2895_s14 = smov [#allocation8]   ;;  %s75_s17 = sshll.u32 %s3733_s9, 4  ;;  %s76_s17 = int_to_ptr.hbm [resolvable:$true] %s75_s17 }
   0xb   :  { %s62_s15 = sshll.u32 %s2895_s14, 4  ;;  %s2896_s18 = smov 256   ;;  %s63_s15 = int_to_ptr.vmem [resolvable:$true] %s62_s15 }
   0xc   :  { %s2897_s19 = smov 16   ;;  %s2898_s20 = smov [#allocation9]  }
   0xd   :  { %68 = dma.hbm_to_vmem [thread:$0]  %s61_s13, 8192, %s63_s15, [#allocation7], %s2896_s18, %s2896_s18, %s2897_s19  }
   0xe   :  { %s77_s21 = sshll.u32 %s2898_s20, 4  ;;  %s78_s21 = int_to_ptr.vmem [resolvable:$true] %s77_s21 }
   0xf   :  { %83 = dma.hbm_to_vmem [thread:$0]  %s76_s17, 8192, %s78_s21, [#allocation10], %s2890_s25, %s2890_s25, %s2891_s26  }
  0x10   :  { %2881 = dma.done.wait [#allocation4], 12288  }
  0x11   :  { %2882 = vsyncadd [#allocation4], 4294955008 }
  0x12   :  { %2883 = dma.done.wait [#allocation7], 12288  }
  0x13   :  { %2884 = vsyncadd [#allocation7], 4294955008 }
  0x14   :  { %2885 = dma.done.wait [#allocation10], 8192  }
  0x15   :  { %2886 = vsyncadd [#allocation10], 4294959104  ;;  %v105_v0 = vld [vmem:[%s3725_s1 + $0x8] sm:$0xff]  ;;  %v104_v1 = vld [vmem:[%s3725_s1] sm:$0xff]  ;;  %vm108_vm0 = vcmask 130048   ;;  %v2899_v11 = vmov 128.0  }
  0x16   :  { %129 = vmatpush.msra.mxu0 %v105_v0  ;;  %v102_v2 = vld [vmem:[%s3724_s0] sm:$0xff]  ;;  %v103_v3 = vld [vmem:[%s3724_s0 + $0x8] sm:$0xff]  ;;  %2635 = vrcp.f32 %v2899_v11  ;;  %v281_v15 = vld [vmem:[#allocation3 + $0x178] sm:$0xff]  ;;  %s2900_s18 = smov 96   ;;  %s2901_s19 = smov 32   ;;  %vm368_vm8 = vcmask 261120  }
  0x17   :  { %v2617_v4 = vld [vmem:[%s3727_s3] ss:$0 sm:$0xff]  ;;  %v280_v14 = vld [vmem:[#allocation3 + $0x170] sm:$0xff]  ;;  %342 = vmatpush.msra.mxu3 %v281_v15  ;;  %v277_v18 = vld [vmem:[#allocation3 + $0x158] sm:$0xff]  ;;  %s2902_s20 = smov 64   ;;  %vm463_vm9 = vcmask 1041408  }
  0x18   :  { %130 = vmatpush.msra.mxu0 %v104_v1  ;;  %v279_v13 = vld [vmem:[#allocation3 + $0x168] sm:$0xff]  ;;  %316 = vmatpush.msra.mxu2 %v280_v14  ;;  %v276_v17 = vld [vmem:[#allocation3 + $0x150] sm:$0xff]  ;;  %v278_v19 = vld [vmem:[#allocation3 + $0x160] sm:$0xff]  ;;  %vm2903_vm11 = vmmov 1   ;;  %vm419_vm14 = vcmask 146432   ;;  %s2905_s0 = smov [#allocation11]  }
  0x19   :  { %2486 = vmatmul.msk.f32.vlgmr.msra.gmra.mxu0 %vm108_vm0, %v102_v2  ;;  %290 = vmatpush.msra.mxu1 %v279_v13  ;;  %v273_v20 = vld [vmem:[#allocation3 + $0x138] sm:$0xff]  ;;  %v274_v21 = vld [vmem:[#allocation3 + $0x140] sm:$0xff]  ;;  %v275_v22 = vld [vmem:[#allocation3 + $0x148] sm:$0xff]  ;;  %s2472_s1 = sshll.u32 %s2905_s0, 4  ;;  %s2474_s12 = sshll.u32 %s3735_s11, 4  ;;  %s2473_s1 = int_to_ptr.vmem [resolvable:$true] %s2472_s1  ;;  %s2475_s12 = int_to_ptr.hbm [resolvable:$true] %s2474_s12 }
  0x1a   :  { %317 = vmatpush.msra.mxu2 %v277_v18  ;;  %343 = vmatpush.msra.mxu3 %v278_v19  ;;  %v270_v24 = vld [vmem:[#allocation3 + $0x120] sm:$0xff]  ;;  %v271_v25 = vld [vmem:[#allocation3 + $0x128] sm:$0xff]  ;;  %v272_v26 = vld [vmem:[#allocation3 + $0x130] sm:$0xff] }
  0x1b   :  { %291 = vmatpush.msra.mxu1 %v276_v17  ;;  %v267_v27 = vld [vmem:[#allocation3 + $0x108] sm:$0xff]  ;;  %v268_v28 = vld [vmem:[#allocation3 + $0x110] sm:$0xff]  ;;  %v269_v29 = vld [vmem:[#allocation3 + $0x118] sm:$0xff] }
  0x1c   :  { %v2636_v12 = vpop.eup %2635  ;;  %318 = vmatpush.msra.mxu2 %v274_v21  ;;  %344 = vmatpush.msra.mxu3 %v275_v22  ;;  %v264_v31 = vld [vmem:[#allocation3 + $0xf0] sm:$0xff]  ;;  %v265_v32 = vld [vmem:[#allocation3 + $0xf8] sm:$0xff]  ;;  %v266_v33 = vld [vmem:[#allocation3 + $0x100] sm:$0xff] }
  0x1d   :  { %v145_v16 = vmul.f32 128.0, %v2636_v12  ;;  %292 = vmatpush.msra.mxu1 %v273_v20  ;;  %v261_v34 = vld [vmem:[#allocation3 + $0xd8] sm:$0xff]  ;;  %v262_v35 = vld [vmem:[#allocation3 + $0xe0] sm:$0xff]  ;;  %v263_v36 = vld [vmem:[#allocation3 + $0xe8] sm:$0xff]  ;;  %vm149_vm1 = vweird.f32 %v2636_v12 }
  0x1e   :  { %319 = vmatpush.msra.mxu2 %v271_v25  ;;  %345 = vmatpush.msra.mxu3 %v272_v26  ;;  %v258_v38 = vld [vmem:[#allocation3 + $0xc0] sm:$0xff]  ;;  %v259_v39 = vld [vmem:[#allocation3 + $0xc8] sm:$0xff]  ;;  %v260_v40 = vld [vmem:[#allocation3 + $0xd0] sm:$0xff] }
  0x1f   :  { %v146_v23 = vsub.f32 1.0, %v145_v16  ;;  %293 = vmatpush.msra.mxu1 %v270_v24  ;;  %v255_v42 = vld [vmem:[#allocation3 + $0xa8] sm:$0xff]  ;;  %v256_v43 = vld [vmem:[#allocation3 + $0xb0] sm:$0xff]  ;;  %v257_v44 = vld [vmem:[#allocation3 + $0xb8] sm:$0xff] }
  0x20   :  { %320 = vmatpush.msra.mxu2 %v268_v28  ;;  %346 = vmatpush.msra.mxu3 %v269_v29  ;;  %v252_v46 = vld [vmem:[#allocation3 + $0x90] sm:$0xff]  ;;  %v253_v47 = vld [vmem:[#allocation3 + $0x98] sm:$0xff]  ;;  %v254_v48 = vld [vmem:[#allocation3 + $0xa0] sm:$0xff] }
  0x21   :  { %2487 = vmatmul.msk.f32.gmra.mxu0 %vm108_vm0, %v103_v3  ;;  %v147_v30 = vmul.f32 %v2636_v12, %v146_v23  ;;  %294 = vmatpush.msra.mxu1 %v267_v27  ;;  %v249_v50 = vld [vmem:[#allocation3 + $0x78] sm:$0xff]  ;;  %v250_v51 = vld [vmem:[#allocation3 + $0x80] sm:$0xff]  ;;  %v251_v52 = vld [vmem:[#allocation3 + $0x88] sm:$0xff] }
  0x22   :  { %321 = vmatpush.msra.mxu2 %v265_v32  ;;  %347 = vmatpush.msra.mxu3 %v266_v33  ;;  %v246_v53 = vld [vmem:[#allocation3 + $0x60] sm:$0xff]  ;;  %v247_v54 = vld [vmem:[#allocation3 + $0x68] sm:$0xff]  ;;  %v248_v55 = vld [vmem:[#allocation3 + $0x70] sm:$0xff] }
  0x23   :  { %295 = vmatpush.msra.mxu1 %v264_v31  ;;  %v148_v37 = vadd.f32 %v2636_v12, %v147_v30  ;;  %v201_v58 = vld [vmem:[%s3727_s3 + $0x3] sm:$0x1]  ;;  %v244_v62 = vld [vmem:[#allocation3 + $0x50] sm:$0xff]  ;;  %v245_v63 = vld [vmem:[#allocation3 + $0x58] sm:$0xff] }
  0x24   :  { %322 = vmatpush.msra.mxu2 %v262_v35  ;;  %348 = vmatpush.msra.mxu3 %v263_v36  ;;  %v243_v61 = vld [vmem:[#allocation3 + $0x48] sm:$0xff]  ;;  %202 = vst [vmem:[#allocation2] sm:$0x1] %v201_v58  ;;  %v240_v1 = vld [vmem:[#allocation3 + $0x30] sm:$0xff]  ;;  %v241_v2 = vld [vmem:[#allocation3 + $0x38] sm:$0xff] }
  0x25   :  { %296 = vmatpush.msra.mxu1 %v261_v34  ;;  %v3003_v45 = vsel %vm149_vm1, %v2636_v12, %v148_v37  ;;  %204 = vst [vmem:[#allocation2 + $0x9] sm:$0x1] %v201_v58  ;;  %v242_v3 = vld [vmem:[#allocation3 + $0x40] sm:$0xff]  ;;  %v235_v12 = vld [vmem:[#allocation3 + $0x8] sm:$0xff]  ;;  %v236_v13 = vld [vmem:[#allocation3 + $0x10] sm:$0xff] }
  0x26   :  { %323 = vmatpush.msra.mxu2 %v259_v39  ;;  %349 = vmatpush.msra.mxu3 %v260_v40  ;;  %v234_v11 = vld [vmem:[#allocation3] sm:$0xff]  ;;  %v2618_v28 = vld [vmem:[%s3727_s3 + $0x1] ss:$0 sm:$0xff]  ;;  %v2619_v31 = vld [vmem:[%s3727_s3 + $0x2] ss:$0 sm:$0xff] }
  0x27   :  { %297 = vmatpush.msra.mxu1 %v258_v38  ;;  %v197_v35 = vld [vmem:[%s3726_s2] sm:$0xff] }
  0x28   :  { %324 = vmatpush.msra.mxu2 %v256_v43  ;;  %350 = vmatpush.msra.mxu3 %v257_v44  ;;  %v198_v43 = vld [vmem:[%s3726_s2 + $0x8] sm:$0xff] }
  0x29   :  { %298 = vmatpush.msra.mxu1 %v255_v42 }
  0x2a   :  { %325 = vmatpush.msra.mxu2 %v253_v47  ;;  %351 = vmatpush.msra.mxu3 %v254_v48 }
  0x2b   :  { %299 = vmatpush.msra.mxu1 %v252_v46 }
  0x2c   :  { %326 = vmatpush.msra.mxu2 %v250_v51  ;;  %352 = vmatpush.msra.mxu3 %v251_v52 }
  0x2d   :  { %300 = vmatpush.msra.mxu1 %v249_v50 }
  0x2e   :  { %327 = vmatpush.msra.mxu2 %v247_v54  ;;  %353 = vmatpush.msra.mxu3 %v248_v55 }
  0x2f   :  { %301 = vmatpush.msra.mxu1 %v246_v53 }
  0x30   :  { %328 = vmatpush.msra.mxu2 %v244_v62  ;;  %354 = vmatpush.msra.mxu3 %v245_v63 }
  0x31   :  { %302 = vmatpush.msra.mxu1 %v243_v61 }
  0x32   :  { %329 = vmatpush.msra.mxu2 %v241_v2  ;;  %355 = vmatpush.msra.mxu3 %v242_v3 }
  0x33   :  { %303 = vmatpush.msra.mxu1 %v240_v1 }
  0x96   :  { %v132_v5 = vpop.f32.mrf.mxu0 }
  0x97   :  { %v2993_v6 = vadd.f32 %v2617_v4, %v132_v5 }
  0x99   :  { %140 = vadd.xlane.f32.xlu0 %v2993_v6  ;;  %v153_v9 = vmul.f32 %v2993_v6, %v2993_v6 }
  0x9e   :  { %v135_v7 = vpop.f32.mrf.mxu0 }
  0x9f   :  { %v2996_v8 = vadd.f32 %v2617_v4, %v135_v7  ;;  %v237_v7 = vld [vmem:[#allocation3 + $0x18] sm:$0xff] }
  0xa0   :  { %304 = vmatpush.msra.mxu1 %v237_v7 }
  0xa1   :  { %142 = vadd.xlane.f32.xlu1 %v2996_v8  ;;  %155 = vadd.xlane.f32.xlu0 %v153_v9  ;;  %v154_v10 = vmul.f32 %v2996_v8, %v2996_v8  ;;  %v238_v9 = vld [vmem:[#allocation3 + $0x20] sm:$0xff] }
  0xa2   :  { %330 = vmatpush.msra.mxu2 %v238_v9  ;;  %305 = vmatpush.msra.mxu1 %v234_v11 }
  0xa4   :  { %331 = vmatpush.msra.mxu2 %v235_v12 }
  0xa9   :  { %157 = vadd.xlane.f32.xlu1 %v154_v10  ;;  %v239_v10 = vld [vmem:[#allocation3 + $0x28] sm:$0xff] }
  0xaa   :  { %356 = vmatpush.msra.mxu3 %v239_v10 }
  0xac   :  { %357 = vmatpush.msra.mxu3 %v236_v13 }
 0x10c   :  { %v141_v41 = vpop.xlane.xlu0 %140 }
 0x10d   :  { %v3006_v49 = vmul.f32 %v3003_v45, %v141_v41 }
 0x10f   :  { %v161_v59 = vmul.f32 %v3006_v49, %v3006_v49  ;;  %v165_v27 = vsub.f32 %v2993_v6, %v3006_v49  ;;  %v282_v49 = vld [vmem:[%s3729_s5] sm:$0x7] }
 0x110   :  { %v284_v50 = vperm.slane %v282_v49, 0  ;;  %v285_v53 = vperm.slane %v282_v49, 1 }
 0x114   :  { %v143_v56 = vpop.xlane.xlu1 %142  ;;  %v156_v57 = vpop.xlane.xlu0 %155 }
 0x115   :  { %v159_v60 = vmul.f32 %v156_v57, %v3003_v45  ;;  %v152_v4 = vmul.f32 %v3003_v45, %v143_v56 }
 0x117   :  { %v163_v0 = vsub.f32 %v159_v60, %v161_v59  ;;  %v162_v15 = vmul.f32 %v152_v4, %v152_v4  ;;  %v166_v38 = vsub.f32 %v2996_v8, %v152_v4  ;;  %v286_v59 = vperm.slane %v282_v49, 2 }
 0x119   :  { %v167_v5 = vadd.f32 1e-05, %v163_v0 }
 0x11b   :  { %2637 = vrsqrt.f32 %v167_v5  ;;  %vm175_vm3 = vweird.f32 %v167_v5 }
 0x11c   :  { %v158_v14 = vpop.xlane.xlu1 %157 }
 0x11d   :  { %v160_v16 = vmul.f32 %v158_v14, %v3003_v45 }
 0x11f   :  { %v164_v17 = vsub.f32 %v160_v16, %v162_v15 }
 0x121   :  { %v2638_v18 = vpop.eup %2637  ;;  %v168_v19 = vadd.f32 1e-05, %v164_v17 }
 0x122   :  { %v170_v20 = vmul.f32 %v2638_v18, %v167_v5  ;;  %vm176_vm2 = vweird.f32 %v2638_v18 }
 0x123   :  { %2639 = vrsqrt.f32 %v168_v19  ;;  %vm177_vm4 = vmor %vm175_vm3, %vm176_vm2  ;;  %vm185_vm6 = vweird.f32 %v168_v19  ;;  %vm426_vm3 = vcmask 140288  }
 0x124   :  { %v171_v21 = vmul.f32 %v2638_v18, %v170_v20 }
 0x126   :  { %v172_v22 = vmul.f32 0.5, %v171_v21 }
 0x128   :  { %v173_v23 = vsub.f32 1.5, %v172_v22  ;;  %v209_v22 = vlaneseq }
 0x129   :  { %v2640_v24 = vpop.eup %2639 }
 0x12a   :  { %v174_v25 = vmul.f32 %v2638_v18, %v173_v23  ;;  %v180_v26 = vmul.f32 %v2640_v24, %v168_v19  ;;  %vm186_vm5 = vweird.f32 %v2640_v24 }
 0x12b   :  { %vm187_vm7 = vmor %vm185_vm6, %vm186_vm5  ;;  %vm940_vm5 = vcmask 785408  }
 0x12c   :  { %v178_v29 = vsel %vm177_vm4, %v2638_v18, %v174_v25  ;;  %v181_v30 = vmul.f32 %v2640_v24, %v180_v26  ;;  %v210_v26 = vshrl.u32 %v209_v22, 7  ;;  %vm936_vm4 = vcmask 523264  }
 0x12d   :  { %v189_v32 = vmul.f32 %v178_v29, %v165_v27 }
 0x12e   :  { %v182_v33 = vmul.f32 0.5, %v181_v30  ;;  %v211_v27 = vadd.s32 8, %v210_v26 }
 0x12f   :  { %v192_v34 = vmul.f32 %v2618_v28, %v189_v32 }
 0x130   :  { %v183_v36 = vsub.f32 1.5, %v182_v33  ;;  %vm216_vm13 = vcmp.ge.s32.totalorder %v211_v27, 9 }
 0x131   :  { %v195_v6 = vadd.f32 %v2619_v31, %v192_v34 }
 0x132   :  { %v184_v37 = vmul.f32 %v2640_v24, %v183_v36 }
 0x133   :  { %v199_v39 = vadd.f32 %v197_v35, %v195_v6 }
 0x134   :  { %v188_v40 = vsel %vm187_vm7, %v2640_v24, %v184_v37  ;;  %v214_v24 = vand.u32 127, %v209_v22 }
 0x135   :  { %203 = vst [vmem:[#allocation2 + $0x1] sm:$0xff] %v199_v39  ;;  %v190_v41 = vmul.f32 %v188_v40, %v166_v38 }
 0x136   :  { %vm218_vm10 = vcmp.ge.s32.totalorder %v214_v24, 9 }
 0x137   :  { %v193_v42 = vmul.f32 %v2618_v28, %v190_v41  ;;  %vm222_vm12 = vmxor %vm218_vm10, %vm2903_vm11 }
 0x138   :  { %vm220_vm15 = vmxor %vm216_vm13, %vm218_vm10 }
 0x139   :  { %v196_v44 = vadd.f32 %v2619_v31, %v193_v42  ;;  %v2904_v31 = vmov -1e+30   ;;  %vm223_vm0 = vmxor %vm220_vm15, %vm2903_vm11 }
 0x13a   :  { %v3103_v32 = vsel %vm222_vm12, 0.0, %v2904_v31  ;;  %v3111_v38 = vsel %vm223_vm0, 0.0, %v2904_v31  ;;  %vm221_vm1 = vmxor %vm2903_vm11, %vm218_vm10 }
 0x13b   :  { %v200_v46 = vadd.f32 %v198_v43, %v196_v44  ;;  %vm224_vm2 = vmxor %vm221_vm1, %vm2903_vm11 }
 0x13c   :  { %v3031_v47 = vld [vmem:[#allocation2] sm:$0xff] }
 0x13d   :  { %205 = vst [vmem:[#allocation2 + $0xa] sm:$0xff] %v200_v46  ;;  %306 = vmatmul.f32.vlgmr.msra.gmra.mxu1 %v3031_v47  ;;  %332 = vmatmul.f32.vlgmr.msra.gmra.mxu2 %v3031_v47 }
 0x13e   :  { %358 = vmatmul.f32.vlgmr.msra.gmra.mxu3 %v3031_v47 }
 0x144   :  { %v3036_v8 = vld [vmem:[#allocation2 + $0x8] sm:$0xff]  ;;  %v3041_v48 = vld [vmem:[#allocation2 + $0x10] sm:$0x3] }
 0x145   :  { %309 = vmatmul.f32.gmra.mxu1 %v3036_v8  ;;  %335 = vmatmul.f32.gmra.mxu2 %v3036_v8 }
 0x146   :  { %361 = vmatmul.f32.gmra.mxu3 %v3036_v8 }
 0x14d   :  { %312 = vmatmul.f32.gmra.mxu1 %v3041_v48  ;;  %338 = vmatmul.f32.gmra.mxu2 %v3041_v48 }
 0x14e   :  { %364 = vmatmul.f32.gmra.mxu3 %v3041_v48 }
 0x1ba   :  { %v307_v51 = vpop.f32.mrf.mxu1 }
 0x1bb   :  { %v308_v52 = vadd.f32 %v307_v51, %v284_v50 }
 0x1bd   :  { %493 = vrot.lane.b32.xlu1 %v308_v52, %s2900_s18 }
 0x1c0   :  { %v333_v54 = vpop.f32.mrf.mxu2 }
 0x1c1   :  { %v334_v55 = vadd.f32 %v333_v54, %v285_v53  ;;  %v359_v56 = vpop.f32.mrf.mxu3 }
 0x1c2   :  { %v310_v57 = vpop.f32.mrf.mxu1  ;;  %v360_v63 = vadd.f32 %v359_v56, %v286_v59 }
 0x1c3   :  { %v311_v58 = vadd.f32 %v310_v57, %v284_v50  ;;  %499 = vrot.lane.b32.xlu0 %v334_v55, %s2900_s18 }
 0x1c5   :  { %495 = vrot.lane.b32.xlu2 %v311_v58, %s2900_s18 }
 0x1c8   :  { %v336_v60 = vpop.f32.mrf.mxu2 }
 0x1c9   :  { %v337_v61 = vadd.f32 %v336_v60, %v285_v53  ;;  %v362_v62 = vpop.f32.mrf.mxu3 }
 0x1ca   :  { %v363_v0 = vadd.f32 %v362_v62, %v286_v59  ;;  %v313_v1 = vpop.f32.mrf.mxu1 }
 0x1cb   :  { %v314_v2 = vadd.f32 %v313_v1, %v284_v50  ;;  %771 = vrot.lane.b32.xlu1 %v337_v61, %s2901_s19  ;;  %v3119_v50 = vsel %vm224_vm2, 0.0, %v2904_v31 }
 0x1cc   :  { %v3053_v3 = vpack.i.bf16 %v360_v63, %v363_v0 }
 0x1cd   :  { %497 = vrot.lane.b32.xlu0 %v314_v2, %s2900_s18  ;;  %501 = vrot.lane.b32.xlu2 %v337_v61, %s2900_s18 }
 0x1d0   :  { %v339_v4 = vpop.f32.mrf.mxu2 }
 0x1d1   :  { %v340_v5 = vadd.f32 %v339_v4, %v285_v53  ;;  %v365_v7 = vpop.f32.mrf.mxu3 }
 0x1d2   :  { %v3062_v9 = vadd.f32 %v365_v7, %v286_v59 }
 0x1d3   :  { %2488 = vmatpush.xpose.msk.msrb.mxu0 %vm368_vm8, %v340_v5  ;;  %629 = vrot.lane.b32.xlu1 %v308_v52, %s2902_s20 }
 0x1d5   :  { %635 = vrot.lane.b32.xlu0 %v334_v55, %s2902_s20  ;;  %503 = vrot.lane.b32.xlu2 %v340_v5, %s2900_s18 }
 0x1d7   :  { %2489 = vmatpush.xpose.msk.msrb.mxu0 %vm368_vm8, %v337_v61 }
 0x1db   :  { %2490 = vmatpush.xpose.msk.msrb.mxu0 %vm368_vm8, %v334_v55  ;;  %765 = vrot.lane.b32.xlu1 %v311_v58, %s2901_s19 }
 0x1dd   :  { %637 = vrot.lane.b32.xlu2 %v337_v61, %s2902_s20  ;;  %763 = vrot.lane.b32.xlu0 %v308_v52, %s2901_s19 }
 0x1de   :  { %2491 = vmatmul.msk.f32.vlgmr.msrb.gmra.mxu0 %vm368_vm8, %v308_v52 }
 0x1df   :  { %2494 = vmatpush.msk.msra.mxu0 %vm463_vm9, %v3062_v9 }
 0x1e1   :  { %481 = vmatpush.msra.mxu0 %v363_v0 }
 0x1e3   :  { %482 = vmatpush.msra.mxu0 %v360_v63  ;;  %2588 = vrot.lane.b32.xlu1 %v3053_v3, %s2900_s18 }
 0x1e5   :  { %639 = vrot.lane.b32.xlu2 %v340_v5, %s2902_s20  ;;  %633 = vrot.lane.b32.xlu0 %v314_v2, %s2902_s20 }
 0x1e6   :  { %2492 = vmatmul.msk.f32.gmra.mxu0 %vm368_vm8, %v311_v58 }
 0x1ed   :  { %773 = vrot.lane.b32.xlu2 %v340_v5, %s2901_s19  ;;  %856 = vrot.lane.b32.xlu0 %v3062_v9, %s2901_s19 }
 0x1ee   :  { %2493 = vmatmul.msk.f32.gmra.mxu0 %vm368_vm8, %v314_v2 }
 0x1f5   :  { %769 = vrot.lane.b32.xlu2 %v334_v55, %s2901_s19 }
 0x1fd   :  { %631 = vrot.lane.b32.xlu2 %v311_v58, %s2902_s20 }
 0x205   :  { %767 = vrot.lane.b32.xlu2 %v314_v2, %s2901_s19 }
 0x20d   :  { %588 = vrot.lane.b32.xlu2 %v3062_v9, %s2900_s18 }
 0x21f   :  { %v496_v10 = vpop.permute.xlu2 %495 }
 0x227   :  { %v502_v11 = vpop.permute.xlu2 %501 }
 0x22f   :  { %v504_v12 = vpop.permute.xlu2 %503  ;;  %v494_v15 = vpop.permute.xlu1 %493 }
 0x230   :  { %2498 = vmatpush.xpose.msk.msrb.mxu1 %vm368_vm8, %v504_v12 }
 0x234   :  { %2499 = vmatpush.xpose.msk.msrb.mxu1 %vm368_vm8, %v502_v11 }
 0x235   :  { %v500_v13 = vpop.permute.xlu0 %499 }
 0x237   :  { %v638_v14 = vpop.permute.xlu2 %637 }
 0x238   :  { %2500 = vmatpush.xpose.msk.msrb.mxu1 %vm368_vm8, %v500_v13 }
 0x23b   :  { %2501 = vmatmul.msk.f32.vlgmr.msrb.gmra.mxu1 %vm368_vm8, %v494_v15 }
 0x23d   :  { %v772_v18 = vpop.permute.xlu1 %771 }
 0x23f   :  { %v498_v16 = vpop.permute.xlu0 %497  ;;  %v640_v17 = vpop.permute.xlu2 %639 }
 0x240   :  { %2508 = vmatpush.xpose.msk.msrb.mxu3 %vm368_vm8, %v640_v17 }
 0x243   :  { %2502 = vmatmul.msk.f32.gmra.mxu1 %vm368_vm8, %v496_v10 }
 0x244   :  { %2509 = vmatpush.xpose.msk.msrb.mxu3 %vm368_vm8, %v638_v14 }
 0x245   :  { %v630_v21 = vpop.permute.xlu1 %629 }
 0x247   :  { %v636_v19 = vpop.permute.xlu0 %635  ;;  %v774_v20 = vpop.permute.xlu2 %773 }
 0x248   :  { %2510 = vmatpush.xpose.msk.msrb.mxu3 %vm368_vm8, %v636_v19  ;;  %2518 = vmatpush.xpose.msk.msra.mxu1 %vm368_vm8, %v774_v20 }
 0x24b   :  { %2503 = vmatmul.msk.f32.gmra.mxu1 %vm368_vm8, %v498_v16  ;;  %2511 = vmatmul.msk.f32.vlgmr.msrb.gmra.mxu3 %vm368_vm8, %v630_v21 }
 0x24c   :  { %2519 = vmatpush.xpose.msk.msra.mxu1 %vm368_vm8, %v772_v18 }
 0x24d   :  { %v766_v29 = vpop.permute.xlu1 %765 }
 0x24f   :  { %v770_v23 = vpop.permute.xlu2 %769  ;;  %v764_v25 = vpop.permute.xlu0 %763 }
 0x250   :  { %2520 = vmatpush.xpose.msk.msra.mxu1 %vm368_vm8, %v770_v23 }
 0x253   :  { %2521 = vmatmul.msk.f32.vlgmr.msra.gmra.mxu1 %vm368_vm8, %v764_v25 }
 0x255   :  { %v2589_v40 = vpop.permute.xlu1 %2588 }
 0x256   :  { %v2590_v44 = vunpack.i.l.bf16 %v2589_v40  ;;  %v2591_v46 = vunpack.i.h.bf16 %v2589_v40 }
 0x257   :  { %v632_v28 = vpop.permute.xlu2 %631  ;;  %v634_v35 = vpop.permute.xlu0 %633 }
 0x258   :  { %2512 = vmatmul.msk.f32.gmra.mxu3 %vm368_vm8, %v632_v28 }
 0x25b   :  { %v404_v30 = vpop.f32.mrf.mxu0  ;;  %2522 = vmatmul.msk.f32.gmra.mxu1 %vm368_vm8, %v766_v29 }
 0x25c   :  { %v413_v33 = vmul.f32 0.17677669, %v404_v30 }
 0x25e   :  { %v416_v34 = vadd.f32 %v413_v33, %v3103_v32 }
 0x25f   :  { %v768_v36 = vpop.permute.xlu2 %767  ;;  %v857_v51 = vpop.permute.xlu0 %856 }
 0x260   :  { %2513 = vmatmul.msk.f32.gmra.mxu3 %vm368_vm8, %v634_v35  ;;  %v420_v6 = vsel %vm419_vm14, %v416_v34, -inf }
 0x261   :  { %421 = vmax.xlane.f32.xlu0 %v420_v6 }
 0x263   :  { %v407_v37 = vpop.f32.mrf.mxu0  ;;  %2523 = vmatmul.msk.f32.gmra.mxu1 %vm368_vm8, %v768_v36 }
 0x264   :  { %v414_v39 = vmul.f32 0.17677669, %v407_v37 }
 0x266   :  { %v417_v41 = vadd.f32 %v414_v39, %v3111_v38 }
 0x267   :  { %v589_v42 = vpop.permute.xlu2 %588 }
 0x268   :  { %2504 = vmatpush.msk.msrb.mxu2 %vm463_vm9, %v589_v42  ;;  %v423_v43 = vsel %vm419_vm14, %v417_v41, -inf }
 0x269   :  { %424 = vmax.xlane.f32.xlu1 %v423_v43 }
 0x26a   :  { %617 = vmatpush.msrb.mxu2 %v2590_v44 }
 0x26b   :  { %v410_v49 = vpop.f32.mrf.mxu0 }
 0x26c   :  { %v415_v52 = vmul.f32 0.17677669, %v410_v49  ;;  %618 = vmatpush.msrb.mxu2 %v2591_v46 }
 0x26e   :  { %2524 = vmatpush.msk.msra.mxu2 %vm463_vm9, %v857_v51  ;;  %v418_v53 = vadd.f32 %v415_v52, %v3119_v50 }
 0x270   :  { %v427_v54 = vsel %vm426_vm3, %v418_v53, -inf }
 0x271   :  { %428 = vmax.xlane.f32.xlu2 %v427_v54 }
 0x2b8   :  { %v534_v55 = vpop.f32.mrf.mxu1 }
 0x2b9   :  { %v543_v56 = vmul.f32 0.17677669, %v534_v55 }
 0x2bb   :  { %v3125_v57 = vadd.f32 %v543_v56, %v3103_v32 }
 0x2bd   :  { %v549_v58 = vsel %vm419_vm14, %v3125_v57, -inf }
 0x2be   :  { %550 = vmax.xlane.f32.xlu1 %v549_v58 }
 0x2c0   :  { %v537_v59 = vpop.f32.mrf.mxu1 }
 0x2c1   :  { %v544_v60 = vmul.f32 0.17677669, %v537_v59 }
 0x2c3   :  { %v3130_v61 = vadd.f32 %v544_v60, %v3111_v38 }
 0x2c5   :  { %v552_v62 = vsel %vm419_vm14, %v3130_v61, -inf }
 0x2c6   :  { %553 = vmax.xlane.f32.xlu2 %v552_v62 }
 0x2c8   :  { %v540_v0 = vpop.f32.mrf.mxu1 }
 0x2c9   :  { %v545_v18 = vmul.f32 0.17677669, %v540_v0 }
 0x2cb   :  { %v3149_v27 = vadd.f32 %v545_v18, %v3119_v50 }
 0x2cd   :  { %v555_v33 = vsel %vm426_vm3, %v3149_v27, -inf }
 0x2ce   :  { %v670_v63 = vpop.f32.mrf.mxu3 }
 0x2cf   :  { %v679_v1 = vmul.f32 0.17677669, %v670_v63 }
 0x2d0   :  { %v804_v11 = vpop.f32.mrf.mxu1 }
 0x2d1   :  { %v3135_v2 = vadd.f32 %v679_v1, %v3103_v32  ;;  %v813_v19 = vmul.f32 0.17677669, %v804_v11 }
 0x2d3   :  { %v685_v4 = vsel %vm419_vm14, %v3135_v2, -inf  ;;  %v3152_v28 = vadd.f32 %v813_v19, %v3103_v32 }
 0x2d4   :  { %686 = vmax.xlane.f32.xlu0 %v685_v4  ;;  %v422_v5 = vpop.xlane.xlu0 %421 }
 0x2d5   :  { %v430_v7 = vsub.f32 %v416_v34, %v422_v5  ;;  %v819_v34 = vsel %vm419_vm14, %v3152_v28, -inf }
 0x2d7   :  { %v433_v10 = vmul.f32 1.442695, %v430_v7 }
 0x2d8   :  { %v807_v22 = vpop.f32.mrf.mxu1 }
 0x2d9   :  { %2641 = vpow2.f32 %v433_v10  ;;  %v814_v42 = vmul.f32 0.17677669, %v807_v22 }
 0x2db   :  { %v673_v12 = vpop.f32.mrf.mxu3  ;;  %v3175_v44 = vadd.f32 %v814_v42, %v3111_v38 }
 0x2dc   :  { %v680_v13 = vmul.f32 0.17677669, %v673_v12  ;;  %v425_v14 = vpop.xlane.xlu1 %424 }
 0x2dd   :  { %v431_v17 = vsub.f32 %v417_v41, %v425_v14  ;;  %v822_v49 = vsel %vm419_vm14, %v3175_v44, -inf }
 0x2de   :  { %v3140_v15 = vadd.f32 %v680_v13, %v3111_v38 }
 0x2df   :  { %v3142_v16 = vpop.eup %2641  ;;  %v435_v23 = vmul.f32 1.442695, %v431_v17 }
 0x2e0   :  { %v439_v20 = vsel %vm419_vm14, %v3142_v16, 0.0  ;;  %v688_v21 = vsel %vm419_vm14, %v3140_v15, -inf  ;;  %v810_v6 = vpop.f32.mrf.mxu1 }
 0x2e1   :  { %440 = vadd.xlane.f32.xlu0 %v439_v20  ;;  %689 = vmax.xlane.f32.xlu1 %v688_v21  ;;  %2643 = vpow2.f32 %v435_v23  ;;  %v815_v39 = vmul.f32 0.17677669, %v810_v6 }
 0x2e3   :  { %v676_v24 = vpop.f32.mrf.mxu3  ;;  %v3172_v43 = vadd.f32 %v815_v39, %v3119_v50 }
 0x2e4   :  { %v681_v25 = vmul.f32 0.17677669, %v676_v24  ;;  %v429_v26 = vpop.xlane.xlu2 %428 }
 0x2e5   :  { %v432_v29 = vsub.f32 %v418_v53, %v429_v26  ;;  %v825_v46 = vsel %vm426_vm3, %v3172_v43, -inf }
 0x2e6   :  { %v3155_v30 = vadd.f32 %v681_v25, %v3119_v50 }
 0x2e7   :  { %v437_v31 = vmul.f32 1.442695, %v432_v29  ;;  %v3163_v36 = vpop.eup %2643 }
 0x2e8   :  { %v691_v35 = vsel %vm426_vm3, %v3155_v30, -inf  ;;  %v442_v40 = vsel %vm419_vm14, %v3163_v36, 0.0 }
 0x2e9   :  { %2645 = vpow2.f32 %v437_v31  ;;  %556 = vmax.xlane.f32.xlu0 %v555_v33  ;;  %820 = vmax.xlane.f32.xlu1 %v819_v34 }
 0x2ea   :  { %692 = vmax.xlane.f32.xlu2 %v691_v35 }
 0x2ef   :  { %v3165_v37 = vpop.eup %2645 }
 0x2f0   :  { %v445_v41 = vsel %vm426_vm3, %v3165_v37, 0.0 }
 0x2f1   :  { %443 = vadd.xlane.f32.xlu0 %v442_v40 }
 0x2f2   :  { %446 = vadd.xlane.f32.xlu2 %v445_v41 }
 0x2f9   :  { %826 = vmax.xlane.f32.xlu0 %v825_v46 }
 0x2fa   :  { %823 = vmax.xlane.f32.xlu2 %v822_v49 }
 0x312   :  { %722 = vrot.lane.b32.xlu2 %v3062_v9, %s2902_s20 }
 0x331   :  { %v551_v51 = vpop.xlane.xlu1 %550 }
 0x332   :  { %v558_v52 = vsub.f32 %v3125_v57, %v551_v51 }
 0x334   :  { %v561_v53 = vmul.f32 1.442695, %v558_v52 }
 0x336   :  { %2647 = vpow2.f32 %v561_v53 }
 0x339   :  { %v554_v56 = vpop.xlane.xlu2 %553 }
 0x33a   :  { %v559_v60 = vsub.f32 %v3130_v61, %v554_v56 }
 0x33c   :  { %v3184_v54 = vpop.eup %2647  ;;  %v563_v9 = vmul.f32 1.442695, %v559_v60 }
 0x33d   :  { %v567_v55 = vsel %vm419_vm14, %v3184_v54, 0.0 }
 0x33e   :  { %568 = vadd.xlane.f32.xlu1 %v567_v55 }
 0x347   :  { %v687_v58 = vpop.xlane.xlu0 %686 }
 0x348   :  { %v694_v59 = vsub.f32 %v3135_v2, %v687_v58 }
 0x34a   :  { %v697_v62 = vmul.f32 1.442695, %v694_v59 }
 0x34c   :  { %2649 = vpow2.f32 %v697_v62 }
 0x34d   :  { %2651 = vpow2.f32 %v563_v9 }
 0x352   :  { %v3190_v63 = vpop.eup %2649 }
 0x353   :  { %v703_v57 = vsel %vm419_vm14, %v3190_v63, 0.0  ;;  %v3195_v7 = vpop.eup %2651 }
 0x354   :  { %v441_v0 = vpop.xlane.xlu0 %440  ;;  %704 = vadd.xlane.f32.xlu0 %v703_v57  ;;  %v690_v1 = vpop.xlane.xlu1 %689  ;;  %v570_v2 = vsel %vm419_vm14, %v3195_v7, 0.0 }
 0x355   :  { %2653 = vrcp.f32 %v441_v0  ;;  %v695_v4 = vsub.f32 %v3140_v15, %v690_v1 }
 0x357   :  { %v699_v5 = vmul.f32 1.442695, %v695_v4 }
 0x359   :  { %2655 = vpow2.f32 %v699_v5 }
 0x35b   :  { %v2654_v61 = vpop.eup %2653 }
 0x35c   :  { %v451_v10 = vmul.f32 %v2654_v61, %v3142_v16  ;;  %v557_v11 = vpop.xlane.xlu0 %556  ;;  %v821_v12 = vpop.xlane.xlu1 %820  ;;  %571 = vadd.xlane.f32.xlu0 %v570_v2 }
 0x35d   :  { %v560_v13 = vsub.f32 %v3149_v27, %v557_v11  ;;  %v828_v14 = vsub.f32 %v3152_v28, %v821_v12  ;;  %v693_v17 = vpop.xlane.xlu2 %692 }
 0x35e   :  { %2495 = vmatmul.msk.f32.vlgmr.msra.gmra.mxu0 %vm419_vm14, %v451_v10  ;;  %v696_v39 = vsub.f32 %v3155_v30, %v693_v17 }
 0x35f   :  { %v3203_v15 = vpop.eup %2655  ;;  %v565_v18 = vmul.f32 1.442695, %v560_v13  ;;  %v831_v19 = vmul.f32 1.442695, %v828_v14 }
 0x360   :  { %v706_v20 = vsel %vm419_vm14, %v3203_v15, 0.0  ;;  %v701_v40 = vmul.f32 1.442695, %v696_v39  ;;  %v956_v39 = vld [vmem:[#allocation6 + $0x60] sm:$0xff] }
 0x361   :  { %2657 = vpow2.f32 %v565_v18  ;;  %707 = vadd.xlane.f32.xlu2 %v706_v20 }
 0x362   :  { %2659 = vpow2.f32 %v831_v19 }
 0x364   :  { %v444_v16 = vpop.xlane.xlu0 %443 }
 0x365   :  { %2661 = vrcp.f32 %v444_v16  ;;  %v447_v21 = vpop.xlane.xlu2 %446 }
 0x366   :  { %2663 = vrcp.f32 %v447_v21 }
 0x367   :  { %v2658_v22 = vpop.eup %2657 }
 0x368   :  { %v2660_v23 = vpop.eup %2659  ;;  %v573_v24 = vsel %vm426_vm3, %v2658_v22, 0.0 }
 0x369   :  { %v837_v25 = vsel %vm419_vm14, %v2660_v23, 0.0  ;;  %574 = vadd.xlane.f32.xlu0 %v573_v24 }
 0x36a   :  { %838 = vadd.xlane.f32.xlu1 %v837_v25 }
 0x36b   :  { %v2662_v26 = vpop.eup %2661 }
 0x36c   :  { %v452_v27 = vmul.f32 %v2662_v26, %v3163_v36  ;;  %v2664_v29 = vpop.eup %2663  ;;  %v827_v35 = vpop.xlane.xlu0 %826 }
 0x36d   :  { %v824_v28 = vpop.xlane.xlu2 %823  ;;  %v453_v33 = vmul.f32 %v2664_v29, %v3165_v37  ;;  %v830_v6 = vsub.f32 %v3172_v43, %v827_v35  ;;  %v959_v35 = vld [vmem:[#allocation6 + $0x78] sm:$0xff] }
 0x36e   :  { %2496 = vmatmul.msk.f32.gmra.mxu0 %vm419_vm14, %v452_v27  ;;  %v829_v34 = vsub.f32 %v3175_v44, %v824_v28  ;;  %961 = vmatpush.msra.mxu3 %v959_v35  ;;  %v1087_v35 = vld [vmem:[#allocation8 + $0xa8] sm:$0xff] }
 0x36f   :  { %v835_v37 = vmul.f32 1.442695, %v830_v6  ;;  %v957_v6 = vld [vmem:[#allocation6 + $0x68] sm:$0xff] }
 0x370   :  { %v833_v36 = vmul.f32 1.442695, %v829_v34 }
 0x372   :  { %2665 = vpow2.f32 %v833_v36  ;;  %v958_v36 = vld [vmem:[#allocation6 + $0x70] sm:$0xff] }
 0x373   :  { %2667 = vpow2.f32 %v835_v37  ;;  %962 = vmatpush.msra.mxu3 %v958_v36  ;;  %v955_v37 = vld [vmem:[#allocation6 + $0x58] sm:$0xff]  ;;  %v1084_v36 = vld [vmem:[#allocation8 + $0x90] sm:$0xff] }
 0x374   :  { %2669 = vpow2.f32 %v701_v40  ;;  %v954_v40 = vld [vmem:[#allocation6 + $0x50] sm:$0xff] }
 0x375   :  { %v723_v31 = vpop.permute.xlu2 %722  ;;  %963 = vmatpush.msra.mxu3 %v957_v6  ;;  %v1085_v6 = vld [vmem:[#allocation8 + $0x98] sm:$0xff] }
 0x376   :  { %2514 = vmatpush.msk.msrb.mxu0 %vm463_vm9, %v723_v31 }
 0x377   :  { %2497 = vmatmul.msk.f32.gmra.mxu0 %vm419_vm14, %v453_v33  ;;  %964 = vmatpush.msra.mxu3 %v956_v39  ;;  %v1082_v39 = vld [vmem:[#allocation8 + $0x80] sm:$0xff] }
 0x378   :  { %v2666_v41 = vpop.eup %2665 }
 0x379   :  { %v840_v42 = vsel %vm419_vm14, %v2666_v41, 0.0  ;;  %v2668_v46 = vpop.eup %2667  ;;  %965 = vmatpush.msra.mxu3 %v955_v37  ;;  %v1083_v37 = vld [vmem:[#allocation8 + $0x88] sm:$0xff] }
 0x37a   :  { %v2670_v49 = vpop.eup %2669 }
 0x37b   :  { %v709_v44 = vsel %vm426_vm3, %v2670_v49, 0.0  ;;  %966 = vmatpush.msra.mxu3 %v954_v40  ;;  %v1080_v40 = vld [vmem:[#allocation8 + $0x70] sm:$0xff] }
 0x37d   :  { %2593 = vrot.lane.b32.xlu0 %v3053_v3, %s2901_s19 }
 0x383   :  { %2598 = vrot.lane.b32.xlu1 %v3053_v3, %s2902_s20  ;;  %v843_v3 = vsel %vm426_vm3, %v2668_v46, 0.0 }
 0x3a7   :  { %841 = vadd.xlane.f32.xlu0 %v840_v42  ;;  %v952_v42 = vld [vmem:[#allocation6 + $0x40] sm:$0xff] }
 0x3ad   :  { %844 = vadd.xlane.f32.xlu1 %v843_v3  ;;  %v949_v3 = vld [vmem:[#allocation6 + $0x28] sm:$0xff] }
 0x3af   :  { %710 = vadd.xlane.f32.xlu0 %v709_v44  ;;  %v948_v44 = vld [vmem:[#allocation6 + $0x20] sm:$0xff] }
 0x3b1   :  { %v569_v43 = vpop.xlane.xlu1 %568 }
 0x3b2   :  { %2671 = vrcp.f32 %v569_v43  ;;  %v947_v43 = vld [vmem:[#allocation6 + $0x18] sm:$0xff] }
 0x3b8   :  { %v2672_v30 = vpop.eup %2671 }
 0x3b9   :  { %v579_v51 = vmul.f32 %v2672_v30, %v3184_v54  ;;  %v946_v30 = vld [vmem:[#allocation6 + $0x10] sm:$0xff] }
 0x3bb   :  { %2505 = vmatmul.msk.f32.vlgmr.msrb.gmra.mxu2 %vm419_vm14, %v579_v51  ;;  %v945_v51 = vld [vmem:[#allocation6 + $0x8] sm:$0xff] }
 0x3c7   :  { %v705_v52 = vpop.xlane.xlu0 %704 }
 0x3cf   :  { %v572_v53 = vpop.xlane.xlu0 %571 }
 0x3d0   :  { %2673 = vrcp.f32 %v572_v53 }
 0x3d4   :  { %v708_v4 = vpop.xlane.xlu2 %707 }
 0x3d6   :  { %v2674_v55 = vpop.eup %2673 }
 0x3d7   :  { %v580_v56 = vmul.f32 %v2674_v55, %v3195_v7 }
 0x3d9   :  { %2506 = vmatmul.msk.f32.gmra.mxu2 %vm419_vm14, %v580_v56 }
 0x3dc   :  { %v575_v58 = vpop.xlane.xlu0 %574 }
 0x3dd   :  { %2675 = vrcp.f32 %v575_v58  ;;  %v839_v62 = vpop.xlane.xlu1 %838 }
 0x3de   :  { %2677 = vrcp.f32 %v839_v62 }
 0x3df   :  { %2679 = vrcp.f32 %v705_v52  ;;  %v944_v52 = vld [vmem:[#allocation6] sm:$0xff] }
 0x3e0   :  { %2681 = vrcp.f32 %v708_v4 }
 0x3e3   :  { %v2676_v59 = vpop.eup %2675 }
 0x3e4   :  { %v581_v60 = vmul.f32 %v2676_v59, %v2658_v22  ;;  %v2678_v54 = vpop.eup %2677 }
 0x3e5   :  { %v849_v1 = vmul.f32 %v2678_v54, %v2660_v23  ;;  %v2680_v7 = vpop.eup %2679  ;;  %v484_v23 = vpop.f32.mrf.mxu0 }
 0x3e6   :  { %2507 = vmatmul.msk.f32.gmra.mxu2 %vm419_vm14, %v581_v60  ;;  %v715_v10 = vmul.f32 %v2680_v7, %v3190_v63  ;;  %v2682_v11 = vpop.eup %2681 }
 0x3e7   :  { %v716_v12 = vmul.f32 %v2682_v11, %v3203_v15  ;;  %v2620_v11 = vld [vmem:[%s3727_s3 + $0x4] ss:$0 sm:$0xff] }
 0x3ed   :  { %v487_v24 = vpop.f32.mrf.mxu0 }
 0x3ef   :  { %v2594_v9 = vpop.permute.xlu0 %2593 }
 0x3f0   :  { %v2595_v57 = vunpack.i.l.bf16 %v2594_v9  ;;  %v2596_v0 = vunpack.i.h.bf16 %v2594_v9 }
 0x3f2   :  { %885 = vmatpush.msra.mxu2 %v2595_v57 }
 0x3f4   :  { %886 = vmatpush.msra.mxu2 %v2596_v0 }
 0x3f5   :  { %v2599_v5 = vpop.permute.xlu1 %2598  ;;  %2525 = vmatmul.msk.f32.vlgmr.msra.gmra.mxu2 %vm419_vm14, %v849_v1  ;;  %v3239_v25 = vpop.f32.mrf.mxu0 }
 0x3f6   :  { %v2600_v61 = vunpack.i.l.bf16 %v2599_v5  ;;  %v2601_v2 = vunpack.i.h.bf16 %v2599_v5 }
 0x3f8   :  { %751 = vmatpush.msrb.mxu0 %v2600_v61 }
 0x3fa   :  { %752 = vmatpush.msrb.mxu0 %v2601_v2 }
 0x3fb   :  { %2515 = vmatmul.msk.f32.vlgmr.msrb.gmra.mxu0 %vm419_vm14, %v715_v10 }
 0x403   :  { %2516 = vmatmul.msk.f32.gmra.mxu0 %vm419_vm14, %v716_v12 }
 0x41a   :  { %v842_v13 = vpop.xlane.xlu0 %841 }
 0x41b   :  { %2683 = vrcp.f32 %v842_v13 }
 0x420   :  { %v845_v14 = vpop.xlane.xlu1 %844 }
 0x421   :  { %v2684_v17 = vpop.eup %2683  ;;  %2685 = vrcp.f32 %v845_v14 }
 0x422   :  { %v711_v18 = vpop.xlane.xlu0 %710  ;;  %v850_v19 = vmul.f32 %v2684_v17, %v2666_v41  ;;  %v953_v41 = vld [vmem:[#allocation6 + $0x48] sm:$0xff] }
 0x423   :  { %2687 = vrcp.f32 %v711_v18  ;;  %967 = vmatpush.msra.mxu3 %v953_v41  ;;  %v1081_v41 = vld [vmem:[#allocation8 + $0x78] sm:$0xff] }
 0x424   :  { %2526 = vmatmul.msk.f32.gmra.mxu2 %vm419_vm14, %v850_v19 }
 0x425   :  { %968 = vmatpush.msra.mxu3 %v952_v42  ;;  %v1078_v42 = vld [vmem:[#allocation8 + $0x60] sm:$0xff] }
 0x427   :  { %v2686_v20 = vpop.eup %2685 }
 0x428   :  { %v851_v21 = vmul.f32 %v2686_v20, %v2668_v46  ;;  %v951_v46 = vld [vmem:[#allocation6 + $0x38] sm:$0xff] }
 0x429   :  { %v2688_v63 = vpop.eup %2687  ;;  %969 = vmatpush.msra.mxu3 %v951_v46  ;;  %v1079_v46 = vld [vmem:[#allocation8 + $0x68] sm:$0xff] }
 0x42a   :  { %v717_v16 = vmul.f32 %v2688_v63, %v2670_v49  ;;  %v950_v49 = vld [vmem:[#allocation6 + $0x30] sm:$0xff] }
 0x42b   :  { %970 = vmatpush.msra.mxu3 %v950_v49  ;;  %v1076_v49 = vld [vmem:[#allocation8 + $0x50] sm:$0xff] }
 0x42c   :  { %2517 = vmatmul.msk.f32.gmra.mxu0 %vm419_vm14, %v717_v16  ;;  %2527 = vmatmul.msk.f32.gmra.mxu2 %vm419_vm14, %v851_v21 }
 0x42d   :  { %971 = vmatpush.msra.mxu3 %v949_v3  ;;  %v1077_v3 = vld [vmem:[#allocation8 + $0x58] sm:$0xff] }
 0x42f   :  { %972 = vmatpush.msra.mxu3 %v948_v44  ;;  %v1074_v44 = vld [vmem:[#allocation8 + $0x40] sm:$0xff] }
 0x431   :  { %973 = vmatpush.msra.mxu3 %v947_v43  ;;  %v1075_v43 = vld [vmem:[#allocation8 + $0x48] sm:$0xff] }
 0x433   :  { %974 = vmatpush.msra.mxu3 %v946_v30  ;;  %v1072_v30 = vld [vmem:[#allocation8 + $0x30] sm:$0xff] }
 0x435   :  { %975 = vmatpush.msra.mxu3 %v945_v51  ;;  %v1073_v51 = vld [vmem:[#allocation8 + $0x38] sm:$0xff] }
 0x437   :  { %976 = vmatpush.msra.mxu3 %v944_v52  ;;  %v1070_v52 = vld [vmem:[#allocation8 + $0x20] sm:$0xff] }
 0x43e   :  { %v620_v15 = vpop.f32.mrf.mxu2 }
 0x43f   :  { %900 = vrot.lane.b32.xlu0 %v620_v15, %s2901_s19 }
 0x45c   :  { %v623_v22 = vpop.f32.mrf.mxu2 }
 0x45d   :  { %902 = vrot.lane.b32.xlu1 %v623_v22, %s2901_s19 }
 0x469   :  { %v626_v27 = vpop.f32.mrf.mxu2 }
 0x478   :  { %v754_v26 = vpop.f32.mrf.mxu0  ;;  %v888_v29 = vpop.f32.mrf.mxu2 }
 0x479   :  { %912 = vrot.lane.b32.xlu2 %v754_v26, %s2902_s20  ;;  %v1095_v26 = vld [vmem:[#allocation8 + $0xe8] sm:$0xff] }
 0x480   :  { %v757_v28 = vpop.f32.mrf.mxu0 }
 0x481   :  { %904 = vrot.lane.b32.xlu2 %v626_v27, %s2901_s19  ;;  %914 = vrot.lane.b32.xlu0 %v757_v28, %s2902_s20  ;;  %v1093_v27 = vld [vmem:[#allocation8 + $0xd8] sm:$0xff]  ;;  %v1090_v28 = vld [vmem:[#allocation8 + $0xc0] sm:$0xff] }
 0x489   :  { %924 = vrot.lane.b32.xlu0 %v888_v29, %s2900_s18  ;;  %v1091_v29 = vld [vmem:[#allocation8 + $0xc8] sm:$0xff] }
 0x4a7   :  { %v891_v31 = vpop.f32.mrf.mxu2 }
 0x4a8   :  { %926 = vrot.lane.b32.xlu0 %v891_v31, %s2900_s18  ;;  %v1088_v31 = vld [vmem:[#allocation8 + $0xb0] sm:$0xff] }
 0x4a9   :  { %v760_v33 = vpop.f32.mrf.mxu0 }
 0x4af   :  { %v894_v34 = vpop.f32.mrf.mxu2 }
 0x4b0   :  { %928 = vrot.lane.b32.xlu1 %v894_v34, %s2900_s18  ;;  %916 = vrot.lane.b32.xlu0 %v760_v33, %s2902_s20  ;;  %v1089_v33 = vld [vmem:[#allocation8 + $0xb8] sm:$0xff]  ;;  %v1086_v34 = vld [vmem:[#allocation8 + $0xa0] sm:$0xff] }
 0x4b1   :  { %v901_v53 = vpop.permute.xlu0 %900 }
 0x4b2   :  { %v933_v58 = vsel %vm368_vm8, %v484_v23, %v901_v53  ;;  %v1096_v23 = vld [vmem:[#allocation8 + $0xf0] sm:$0xff]  ;;  %v1071_v53 = vld [vmem:[#allocation8 + $0x28] sm:$0xff] }
 0x4b3   :  { %1104 = vmatpush.msra.mxu0 %v1096_v23 }
 0x4cf   :  { %v903_v9 = vpop.permute.xlu1 %902 }
 0x4d0   :  { %v934_v54 = vsel %vm368_vm8, %v487_v24, %v903_v9  ;;  %v1097_v24 = vld [vmem:[#allocation8 + $0xf8] sm:$0xff] }
 0x4d1   :  { %1130 = vmatpush.msrb.mxu1 %v1097_v24 }
 0x4d3   :  { %v913_v56 = vpop.permute.xlu2 %912  ;;  %1131 = vmatpush.msrb.mxu1 %v1095_v26  ;;  %v1177_v26 = vld [vmem:[#allocation9 + $0x78] sm:$0xff] }
 0x4d4   :  { %v937_v59 = vsel %vm936_vm4, %v933_v58, %v913_v56  ;;  %v1069_v56 = vld [vmem:[#allocation8 + $0x18] sm:$0xff]  ;;  %v1066_v58 = vld [vmem:[#allocation8] sm:$0xff]  ;;  %1195 = vmatpush.msrb.mxu2 %v1177_v26  ;;  %v1163_v26 = vld [vmem:[#allocation9 + $0x8] sm:$0xff] }
 0x4d5   :  { %1132 = vmatpush.msrb.mxu1 %v1093_v27  ;;  %v1176_v27 = vld [vmem:[#allocation9 + $0x70] sm:$0xff] }
 0x4d6   :  { %1196 = vmatpush.msrb.mxu2 %v1176_v27 }
 0x4d7   :  { %1133 = vmatpush.msrb.mxu1 %v1091_v29  ;;  %v1192_v29 = vld [vmem:[#allocation9 + $0xf0] sm:$0xff] }
 0x4d9   :  { %1134 = vmatpush.msrb.mxu1 %v1089_v33 }
 0x4db   :  { %v905_v4 = vpop.permute.xlu2 %904  ;;  %1135 = vmatpush.msrb.mxu1 %v1087_v35  ;;  %v1191_v35 = vld [vmem:[#allocation9 + $0xe8] sm:$0xff] }
 0x4dc   :  { %v935_v5 = vsel %vm368_vm8, %v3239_v25, %v905_v4  ;;  %v1094_v25 = vld [vmem:[#allocation8 + $0xe0] sm:$0xff] }
 0x4dd   :  { %1105 = vmatpush.msra.mxu0 %v1094_v25  ;;  %1136 = vmatpush.msrb.mxu1 %v1085_v6 }
 0x4df   :  { %1137 = vmatpush.msrb.mxu1 %v1083_v37  ;;  %v1190_v37 = vld [vmem:[#allocation9 + $0xe0] sm:$0xff] }
 0x4e1   :  { %1138 = vmatpush.msrb.mxu1 %v1081_v41 }
 0x4e3   :  { %1139 = vmatpush.msrb.mxu1 %v1079_v46  ;;  %v1189_v46 = vld [vmem:[#allocation9 + $0xd8] sm:$0xff] }
 0x4e5   :  { %1140 = vmatpush.msrb.mxu1 %v1077_v3  ;;  %v1172_v3 = vld [vmem:[#allocation9 + $0x50] sm:$0xff] }
 0x4e7   :  { %1141 = vmatpush.msrb.mxu1 %v1075_v43 }
 0x4e9   :  { %1142 = vmatpush.msrb.mxu1 %v1073_v51  ;;  %v1187_v51 = vld [vmem:[#allocation9 + $0xc8] sm:$0xff] }
 0x4eb   :  { %1143 = vmatpush.msrb.mxu1 %v1071_v53  ;;  %v1170_v53 = vld [vmem:[#allocation9 + $0x40] sm:$0xff] }
 0x4ed   :  { %1144 = vmatpush.msrb.mxu1 %v1069_v56 }
 0x4f3   :  { %v915_v55 = vpop.permute.xlu0 %914 }
 0x4f4   :  { %v938_v57 = vsel %vm936_vm4, %v934_v54, %v915_v55  ;;  %v1068_v55 = vld [vmem:[#allocation8 + $0x10] sm:$0xff] }
 0x4fb   :  { %v925_v60 = vpop.permute.xlu0 %924 }
 0x4fc   :  { %v941_v62 = vsel %vm940_vm5, %v937_v59, %v925_v60  ;;  %v1067_v59 = vld [vmem:[#allocation8 + $0x8] sm:$0xff] }
 0x4fd   :  { %977 = vmatmul.f32.vlgmr.msra.gmra.mxu3 %v941_v62  ;;  %1145 = vmatpush.msrb.mxu1 %v1067_v59 }
 0x51a   :  { %v927_v0 = vpop.permute.xlu0 %926 }
 0x51b   :  { %v942_v1 = vsel %vm940_vm5, %v938_v57, %v927_v0 }
 0x51c   :  { %980 = vmatmul.f32.gmra.mxu3 %v942_v1 }
 0x522   :  { %v929_v7 = vpop.permute.xlu1 %928  ;;  %v917_v61 = vpop.permute.xlu0 %916 }
 0x523   :  { %v939_v2 = vsel %vm936_vm4, %v935_v5, %v917_v61 }
 0x524   :  { %v943_v10 = vsel %vm940_vm5, %v939_v2, %v929_v7 }
 0x525   :  { %983 = vmatmul.f32.gmra.mxu3 %v943_v10 }
 0x580   :  { %v978_v12 = vpop.f32.mrf.mxu3 }
 0x581   :  { %v979_v13 = vadd.f32 %v2620_v11, %v978_v12  ;;  %v3287_v12 = vld [vmem:[%s3727_s3 + $0x5] ss:$0 sm:$0xff] }
 0x583   :  { %v3262_v14 = vadd.f32 %v979_v13, %v3031_v47 }
 0x585   :  { %990 = vadd.xlane.f32.xlu2 %v3262_v14  ;;  %v1000_v17 = vmul.f32 %v3262_v14, %v3262_v14 }
 0x587   :  { %1003 = vadd.xlane.f32.xlu0 %v1000_v17 }
 0x59f   :  { %v981_v18 = vpop.f32.mrf.mxu3 }
 0x5a0   :  { %v982_v19 = vadd.f32 %v2620_v11, %v981_v18  ;;  %v3292_v18 = vld [vmem:[%s3727_s3 + $0x6] ss:$0 sm:$0xff] }
 0x5a2   :  { %v3268_v20 = vadd.f32 %v982_v19, %v3036_v8 }
 0x5a4   :  { %992 = vadd.xlane.f32.xlu1 %v3268_v20  ;;  %v1001_v63 = vmul.f32 %v3268_v20, %v3268_v20 }
 0x5a6   :  { %1005 = vadd.xlane.f32.xlu2 %v1001_v63 }
 0x5a8   :  { %v984_v16 = vpop.f32.mrf.mxu3 }
 0x5a9   :  { %v985_v47 = vadd.f32 %v2620_v11, %v984_v16 }
 0x5ab   :  { %v3274_v21 = vadd.f32 %v985_v47, %v3041_v48  ;;  %v1092_v48 = vld [vmem:[#allocation8 + $0xd0] sm:$0xff] }
 0x5ac   :  { %1106 = vmatpush.msra.mxu0 %v1092_v48  ;;  %v1193_v48 = vld [vmem:[#allocation9 + $0xf8] sm:$0xff] }
 0x5ad   :  { %v994_v15 = vsel %vm463_vm9, %v3274_v21, 0.0  ;;  %v1002_v22 = vmul.f32 %v3274_v21, %v3274_v21  ;;  %1221 = vmatpush.msrb.mxu3 %v1193_v48  ;;  %v1178_v48 = vld [vmem:[#allocation9 + $0x80] sm:$0xff] }
 0x5ae   :  { %995 = vadd.xlane.f32.xlu0 %v994_v15  ;;  %1107 = vmatpush.msra.mxu0 %v1090_v28 }
 0x5af   :  { %v1007_v8 = vsel %vm463_vm9, %v1002_v22, 0.0  ;;  %1222 = vmatpush.msrb.mxu3 %v1192_v29 }
 0x5b0   :  { %1008 = vadd.xlane.f32.xlu1 %v1007_v8  ;;  %1108 = vmatpush.msra.mxu0 %v1088_v31 }
 0x5b1   :  { %1223 = vmatpush.msrb.mxu3 %v1191_v35 }
 0x5b2   :  { %1109 = vmatpush.msra.mxu0 %v1086_v34  ;;  %v1175_v34 = vld [vmem:[#allocation9 + $0x68] sm:$0xff] }
 0x5b3   :  { %1197 = vmatpush.msrb.mxu2 %v1175_v34  ;;  %1224 = vmatpush.msrb.mxu3 %v1190_v37 }
 0x5b4   :  { %1110 = vmatpush.msra.mxu0 %v1084_v36 }
 0x5b5   :  { %1225 = vmatpush.msrb.mxu3 %v1189_v46 }
 0x5b6   :  { %1111 = vmatpush.msra.mxu0 %v1082_v39  ;;  %v1174_v39 = vld [vmem:[#allocation9 + $0x60] sm:$0xff] }
 0x5b7   :  { %1198 = vmatpush.msrb.mxu2 %v1174_v39 }
 0x5b8   :  { %1112 = vmatpush.msra.mxu0 %v1080_v40 }
 0x5ba   :  { %1113 = vmatpush.msra.mxu0 %v1078_v42  ;;  %v1173_v42 = vld [vmem:[#allocation9 + $0x58] sm:$0xff] }
 0x5bb   :  { %1199 = vmatpush.msrb.mxu2 %v1173_v42 }
 0x5bc   :  { %1114 = vmatpush.msra.mxu0 %v1076_v49 }
 0x5bd   :  { %1200 = vmatpush.msrb.mxu2 %v1172_v3 }
 0x5be   :  { %1115 = vmatpush.msra.mxu0 %v1074_v44  ;;  %v1188_v44 = vld [vmem:[#allocation9 + $0xd0] sm:$0xff] }
 0x5bf   :  { %1226 = vmatpush.msrb.mxu3 %v1188_v44 }
 0x5c0   :  { %1116 = vmatpush.msra.mxu0 %v1072_v30  ;;  %v1171_v30 = vld [vmem:[#allocation9 + $0x48] sm:$0xff] }
 0x5c1   :  { %1201 = vmatpush.msrb.mxu2 %v1171_v30  ;;  %1227 = vmatpush.msrb.mxu3 %v1187_v51  ;;  %v2623_v30 = vld [vmem:[%s3727_s3 + $0x7] ss:$0 sm:$0xff] }
 0x5c2   :  { %1117 = vmatpush.msra.mxu0 %v1070_v52 }
 0x5c3   :  { %1202 = vmatpush.msrb.mxu2 %v1170_v53 }
 0x5c4   :  { %1118 = vmatpush.msra.mxu0 %v1068_v55  ;;  %v1186_v55 = vld [vmem:[#allocation9 + $0xc0] sm:$0xff] }
 0x5c5   :  { %1228 = vmatpush.msrb.mxu3 %v1186_v55 }
 0x5c6   :  { %1119 = vmatpush.msra.mxu0 %v1066_v58 }
 0x5f8   :  { %v991_v60 = vpop.xlane.xlu2 %990 }
 0x5f9   :  { %v997_v62 = vmul.f32 %v991_v60, %v3003_v45  ;;  %v1169_v60 = vld [vmem:[#allocation9 + $0x38] sm:$0xff] }
 0x5fa   :  { %v1004_v9 = vpop.xlane.xlu0 %1003  ;;  %1203 = vmatpush.msrb.mxu2 %v1169_v60 }
 0x5fb   :  { %v1013_v54 = vmul.f32 %v997_v62, %v997_v62  ;;  %v1010_v57 = vmul.f32 %v1004_v9, %v3003_v45  ;;  %v1019_v11 = vsub.f32 %v3262_v14, %v997_v62  ;;  %v1185_v62 = vld [vmem:[#allocation9 + $0xb8] sm:$0xff] }
 0x5fc   :  { %1229 = vmatpush.msrb.mxu3 %v1185_v62 }
 0x5fd   :  { %v1016_v0 = vsub.f32 %v1010_v57, %v1013_v54 }
 0x5ff   :  { %v1022_v1 = vadd.f32 1e-05, %v1016_v0  ;;  %v1168_v0 = vld [vmem:[#allocation9 + $0x30] sm:$0xff] }
 0x600   :  { %1204 = vmatpush.msrb.mxu2 %v1168_v0 }
 0x601   :  { %2689 = vrsqrt.f32 %v1022_v1  ;;  %vm1031_vm7 = vweird.f32 %v1022_v1 }
 0x607   :  { %v2690_v4 = vpop.eup %2689 }
 0x608   :  { %v1026_v5 = vmul.f32 %v2690_v4, %v1022_v1  ;;  %vm1032_vm6 = vweird.f32 %v2690_v4  ;;  %v1184_v1 = vld [vmem:[#allocation9 + $0xb0] sm:$0xff] }
 0x609   :  { %vm1033_vm10 = vmor %vm1031_vm7, %vm1032_vm6  ;;  %1230 = vmatpush.msrb.mxu3 %v1184_v1 }
 0x60a   :  { %v1027_v7 = vmul.f32 %v2690_v4, %v1026_v5 }
 0x60c   :  { %v1028_v61 = vmul.f32 0.5, %v1027_v7  ;;  %v1167_v7 = vld [vmem:[#allocation9 + $0x28] sm:$0xff] }
 0x60d   :  { %1205 = vmatpush.msrb.mxu2 %v1167_v7 }
 0x60e   :  { %v1029_v2 = vsub.f32 1.5, %v1028_v61  ;;  %v1183_v61 = vld [vmem:[#allocation9 + $0xa8] sm:$0xff] }
 0x60f   :  { %1231 = vmatpush.msrb.mxu3 %v1183_v61 }
 0x610   :  { %v1030_v10 = vmul.f32 %v2690_v4, %v1029_v2 }
 0x612   :  { %v1034_v13 = vsel %vm1033_vm10, %v2690_v4, %v1030_v10  ;;  %v1166_v10 = vld [vmem:[#allocation9 + $0x20] sm:$0xff] }
 0x613   :  { %v1055_v17 = vmul.f32 %v1034_v13, %v1019_v11  ;;  %v1182_v11 = vld [vmem:[#allocation9 + $0xa0] sm:$0xff]  ;;  %1206 = vmatpush.msrb.mxu2 %v1166_v10  ;;  %v1379_v10 = vld [vmem:[#allocation3 + $0x2f0] sm:$0xff] }
 0x614   :  { %1232 = vmatpush.msrb.mxu3 %v1182_v11  ;;  %v1380_v11 = vld [vmem:[#allocation3 + $0x2f8] sm:$0xff]  ;;  %1416 = vmatpush.msra.mxu1 %v1379_v10 }
 0x615   :  { %v1059_v19 = vmul.f32 %v3287_v12, %v1055_v17  ;;  %v1165_v17 = vld [vmem:[#allocation9 + $0x18] sm:$0xff] }
 0x616   :  { %1207 = vmatpush.msrb.mxu2 %v1165_v17  ;;  %v1376_v17 = vld [vmem:[#allocation3 + $0x2d8] sm:$0xff] }
 0x617   :  { %v993_v63 = vpop.xlane.xlu1 %992  ;;  %v3296_v16 = vadd.f32 %v3292_v18, %v1059_v19  ;;  %v1181_v19 = vld [vmem:[#allocation9 + $0x98] sm:$0xff]  ;;  %1417 = vmatpush.msra.mxu1 %v1376_v17 }
 0x618   :  { %v3299_v14 = vmul.f32 %v993_v63, %v3003_v45  ;;  %1233 = vmatpush.msrb.mxu3 %v1181_v19  ;;  %v1377_v19 = vld [vmem:[#allocation3 + $0x2e0] sm:$0xff] }
 0x619   :  { %1120 = vmatmul.f32.vlgmr.msra.gmra.mxu0 %v3296_v16  ;;  %1146 = vmatmul.f32.vlgmr.msrb.gmra.mxu1 %v3296_v16  ;;  %v1006_v47 = vpop.xlane.xlu2 %1005 }
 0x61a   :  { %v1014_v15 = vmul.f32 %v3299_v14, %v3299_v14  ;;  %v1011_v22 = vmul.f32 %v1006_v47, %v3003_v45  ;;  %v1020_v59 = vsub.f32 %v3268_v20, %v3299_v14 }
 0x61c   :  { %v1017_v8 = vsub.f32 %v1011_v22, %v1014_v15 }
 0x61e   :  { %v1023_v23 = vadd.f32 1e-05, %v1017_v8 }
 0x620   :  { %2691 = vrsqrt.f32 %v1023_v23  ;;  %vm1041_vm12 = vweird.f32 %v1023_v23 }
 0x621   :  { %v996_v24 = vpop.xlane.xlu0 %995 }
 0x622   :  { %v3307_v25 = vmul.f32 %v996_v24, %v3003_v45  ;;  %v1180_v24 = vld [vmem:[#allocation9 + $0x90] sm:$0xff] }
 0x623   :  { %v1009_v28 = vpop.xlane.xlu1 %1008  ;;  %1234 = vmatpush.msrb.mxu3 %v1180_v24  ;;  %v1367_v24 = vld [vmem:[#allocation3 + $0x290] sm:$0xff] }
 0x624   :  { %v1015_v31 = vmul.f32 %v3307_v25, %v3307_v25  ;;  %v1012_v33 = vmul.f32 %v1009_v28, %v3003_v45  ;;  %v1021_v14 = vsub.f32 %v3274_v21, %v3307_v25  ;;  %v1179_v21 = vld [vmem:[#allocation9 + $0x88] sm:$0xff]  ;;  %v1162_v25 = vld [vmem:[#allocation9] sm:$0xff] }
 0x625   :  { %1235 = vmatpush.msrb.mxu3 %v1179_v21  ;;  %v1363_v21 = vld [vmem:[#allocation3 + $0x270] sm:$0xff] }
 0x626   :  { %v2692_v36 = vpop.eup %2691  ;;  %v1018_v6 = vsub.f32 %v1012_v33, %v1015_v31 }
 0x627   :  { %v1036_v40 = vmul.f32 %v2692_v36, %v1023_v23  ;;  %vm1042_vm11 = vweird.f32 %v2692_v36  ;;  %v1164_v23 = vld [vmem:[#allocation9 + $0x10] sm:$0xff]  ;;  %1236 = vmatpush.msrb.mxu3 %v1178_v48  ;;  %v1365_v48 = vld [vmem:[#allocation3 + $0x280] sm:$0xff] }
 0x628   :  { %v1024_v41 = vadd.f32 1e-05, %v1018_v6  ;;  %vm1043_vm13 = vmor %vm1041_vm12, %vm1042_vm11  ;;  %1208 = vmatpush.msrb.mxu2 %v1164_v23  ;;  %v1366_v23 = vld [vmem:[#allocation3 + $0x288] sm:$0xff] }
 0x629   :  { %v1037_v49 = vmul.f32 %v2692_v36, %v1036_v40 }
 0x62a   :  { %2693 = vrsqrt.f32 %v1024_v41  ;;  %vm1051_vm0 = vweird.f32 %v1024_v41  ;;  %1209 = vmatpush.msrb.mxu2 %v1163_v26  ;;  %v1368_v26 = vld [vmem:[#allocation3 + $0x298] sm:$0xff] }
 0x62b   :  { %v1038_v43 = vmul.f32 0.5, %v1037_v49 }
 0x62c   :  { %1210 = vmatpush.msrb.mxu2 %v1162_v25  ;;  %v1364_v25 = vld [vmem:[#allocation3 + $0x278] sm:$0xff] }
 0x62d   :  { %v1039_v52 = vsub.f32 1.5, %v1038_v43 }
 0x62e   :  { %1442 = vmatpush.msra.mxu2 %v1380_v11 }
 0x62f   :  { %v1040_v56 = vmul.f32 %v2692_v36, %v1039_v52 }
 0x630   :  { %v2694_v58 = vpop.eup %2693  ;;  %1443 = vmatpush.msra.mxu2 %v1377_v19  ;;  %v2624_v19 = vld [vmem:[%s3727_s3 + $0x8] ss:$0 sm:$0xff] }
 0x631   :  { %v1046_v9 = vmul.f32 %v2694_v58, %v1024_v41  ;;  %v1044_v54 = vsel %vm1043_vm13, %v2692_v36, %v1040_v56  ;;  %vm1052_vm15 = vweird.f32 %v2694_v58 }
 0x632   :  { %v1056_v57 = vmul.f32 %v1044_v54, %v1020_v59  ;;  %vm1053_vm1 = vmor %vm1051_vm0, %vm1052_vm15 }
 0x633   :  { %v1047_v4 = vmul.f32 %v2694_v58, %v1046_v9 }
 0x634   :  { %v1060_v5 = vmul.f32 %v3287_v12, %v1056_v57 }
 0x635   :  { %v1048_v2 = vmul.f32 0.5, %v1047_v4 }
 0x636   :  { %v3316_v20 = vadd.f32 %v3292_v18, %v1060_v5 }
 0x637   :  { %v1049_v13 = vsub.f32 1.5, %v1048_v2 }
 0x638   :  { %1123 = vmatmul.f32.gmra.mxu0 %v3316_v20  ;;  %1149 = vmatmul.f32.gmra.mxu1 %v3316_v20 }
 0x639   :  { %v1050_v63 = vmul.f32 %v2694_v58, %v1049_v13  ;;  %v1375_v13 = vld [vmem:[#allocation3 + $0x2d0] sm:$0xff] }
 0x63b   :  { %v1054_v47 = vsel %vm1053_vm1, %v2694_v58, %v1050_v63  ;;  %v1372_v63 = vld [vmem:[#allocation3 + $0x2b8] sm:$0xff] }
 0x63c   :  { %v1057_v15 = vmul.f32 %v1054_v47, %v1021_v14  ;;  %v1373_v14 = vld [vmem:[#allocation3 + $0x2c0] sm:$0xff]  ;;  %v1374_v47 = vld [vmem:[#allocation3 + $0x2c8] sm:$0xff] }
 0x63d   :  { %1418 = vmatpush.msra.mxu1 %v1373_v14  ;;  %1444 = vmatpush.msra.mxu2 %v1374_v47  ;;  %v2625_v47 = vld [vmem:[%s3727_s3 + $0x9] ss:$0 sm:$0xff] }
 0x63e   :  { %v1061_v22 = vmul.f32 %v3287_v12, %v1057_v15  ;;  %v1098_v12 = vld [vmem:[%s3732_s8] sm:$0x3]  ;;  %v1369_v15 = vld [vmem:[#allocation3 + $0x2a0] sm:$0xff] }
 0x63f   :  { %v1101_v27 = vperm.slane %v1098_v12, 1 }
 0x640   :  { %v3324_v8 = vadd.f32 %v3292_v18, %v1061_v22  ;;  %v1100_v18 = vperm.slane %v1098_v12, 0  ;;  %v1370_v22 = vld [vmem:[#allocation3 + $0x2a8] sm:$0xff]  ;;  %v1360_v12 = vld [vmem:[#allocation3 + $0x258] sm:$0xff] }
 0x641   :  { %1419 = vmatpush.msra.mxu1 %v1370_v22 }
 0x642   :  { %1126 = vmatmul.f32.gmra.mxu0 %v3324_v8  ;;  %1152 = vmatmul.f32.gmra.mxu1 %v3324_v8 }
 0x643   :  { %1420 = vmatpush.msra.mxu1 %v1367_v24 }
 0x645   :  { %1421 = vmatpush.msra.mxu1 %v1364_v25 }
 0x696   :  { %v1121_v28 = vpop.f32.mrf.mxu0  ;;  %v1147_v29 = vpop.f32.mrf.mxu1 }
 0x697   :  { %v1122_v31 = vadd.f32 %v1121_v28, %v1100_v18  ;;  %v1148_v33 = vadd.f32 %v1147_v29, %v1101_v27  ;;  %v1357_v28 = vld [vmem:[#allocation3 + $0x240] sm:$0xff]  ;;  %v1358_v29 = vld [vmem:[#allocation3 + $0x248] sm:$0xff] }
 0x699   :  { %v1156_v34 = vmax.f32 %v1122_v31, 0.0  ;;  %v1157_v35 = vmax.f32 %v1148_v33, 0.0  ;;  %v1359_v31 = vld [vmem:[#allocation3 + $0x250] sm:$0xff]  ;;  %v1354_v33 = vld [vmem:[#allocation3 + $0x228] sm:$0xff] }
 0x69b   :  { %1211 = vmatmul.f32.vlgmr.msrb.gmra.mxu2 %v1156_v34  ;;  %1237 = vmatmul.f32.vlgmr.msrb.gmra.mxu3 %v1157_v35  ;;  %v1355_v34 = vld [vmem:[#allocation3 + $0x230] sm:$0xff]  ;;  %v1356_v35 = vld [vmem:[#allocation3 + $0x238] sm:$0xff] }
 0x6b5   :  { %v1124_v36 = vpop.f32.mrf.mxu0  ;;  %v1150_v6 = vpop.f32.mrf.mxu1 }
 0x6b6   :  { %v1125_v39 = vadd.f32 %v1124_v36, %v1100_v18  ;;  %v1151_v37 = vadd.f32 %v1150_v6, %v1101_v27  ;;  %v1351_v36 = vld [vmem:[#allocation3 + $0x210] sm:$0xff]  ;;  %v1352_v6 = vld [vmem:[#allocation3 + $0x218] sm:$0xff] }
 0x6b8   :  { %v1158_v40 = vmax.f32 %v1125_v39, 0.0  ;;  %v1159_v41 = vmax.f32 %v1151_v37, 0.0  ;;  %v1353_v39 = vld [vmem:[#allocation3 + $0x220] sm:$0xff]  ;;  %v1348_v37 = vld [vmem:[#allocation3 + $0x1f8] sm:$0xff] }
 0x6ba   :  { %1214 = vmatmul.f32.gmra.mxu2 %v1158_v40  ;;  %1240 = vmatmul.f32.gmra.mxu3 %v1159_v41  ;;  %v1349_v40 = vld [vmem:[#allocation3 + $0x200] sm:$0xff]  ;;  %v1350_v41 = vld [vmem:[#allocation3 + $0x208] sm:$0xff] }
 0x6bf   :  { %v1127_v42 = vpop.f32.mrf.mxu0  ;;  %v1153_v46 = vpop.f32.mrf.mxu1 }
 0x6c0   :  { %v1128_v49 = vadd.f32 %v1127_v42, %v1100_v18  ;;  %v1154_v3 = vadd.f32 %v1153_v46, %v1101_v27  ;;  %v1361_v18 = vld [vmem:[#allocation3 + $0x260] sm:$0xff]  ;;  %v1362_v27 = vld [vmem:[#allocation3 + $0x268] sm:$0xff] }
 0x6c1   :  { %1422 = vmatpush.msra.mxu1 %v1361_v18  ;;  %v1345_v42 = vld [vmem:[#allocation3 + $0x1e0] sm:$0xff]  ;;  %v1346_v46 = vld [vmem:[#allocation3 + $0x1e8] sm:$0xff] }
 0x6c2   :  { %v1160_v44 = vmax.f32 %v1128_v49, 0.0  ;;  %v1161_v43 = vmax.f32 %v1154_v3, 0.0  ;;  %v1347_v49 = vld [vmem:[#allocation3 + $0x1f0] sm:$0xff]  ;;  %v1342_v3 = vld [vmem:[#allocation3 + $0x1c8] sm:$0xff] }
 0x6c3   :  { %1423 = vmatpush.msra.mxu1 %v1358_v29 }
 0x6c4   :  { %1217 = vmatmul.f32.gmra.mxu2 %v1160_v44  ;;  %1243 = vmatmul.f32.gmra.mxu3 %v1161_v43  ;;  %v1343_v44 = vld [vmem:[#allocation3 + $0x1d0] sm:$0xff]  ;;  %v1344_v43 = vld [vmem:[#allocation3 + $0x1d8] sm:$0xff] }
 0x6c5   :  { %1424 = vmatpush.msra.mxu1 %v1355_v34 }
 0x6c7   :  { %1425 = vmatpush.msra.mxu1 %v1352_v6 }
 0x6c9   :  { %1426 = vmatpush.msra.mxu1 %v1349_v40 }
 0x6cb   :  { %1427 = vmatpush.msra.mxu1 %v1346_v46 }
 0x6cd   :  { %1428 = vmatpush.msra.mxu1 %v1343_v44 }
 0x71e   :  { %v1212_v51 = vpop.f32.mrf.mxu2  ;;  %v1238_v53 = vpop.f32.mrf.mxu3 }
 0x71f   :  { %v1213_v52 = vadd.f32 %v2623_v30, %v1212_v51  ;;  %v1340_v51 = vld [vmem:[#allocation3 + $0x1b8] sm:$0xff] }
 0x720   :  { %1429 = vmatpush.msra.mxu1 %v1340_v51 }
 0x721   :  { %v1239_v55 = vadd.f32 %v1238_v53, %v1213_v52  ;;  %v1341_v52 = vld [vmem:[#allocation3 + $0x1c0] sm:$0xff]  ;;  %v1336_v53 = vld [vmem:[#allocation3 + $0x198] sm:$0xff] }
 0x723   :  { %v3335_v56 = vadd.f32 %v1239_v55, %v3296_v16  ;;  %v1337_v55 = vld [vmem:[#allocation3 + $0x1a0] sm:$0xff] }
 0x724   :  { %1430 = vmatpush.msra.mxu1 %v1337_v55 }
 0x725   :  { %1250 = vadd.xlane.f32.xlu2 %v3335_v56  ;;  %v1260_v58 = vmul.f32 %v3335_v56, %v3335_v56 }
 0x727   :  { %1263 = vadd.xlane.f32.xlu0 %v1260_v58  ;;  %v1338_v58 = vld [vmem:[#allocation3 + $0x1a8] sm:$0xff] }
 0x73d   :  { %v1215_v59 = vpop.f32.mrf.mxu2  ;;  %v1241_v62 = vpop.f32.mrf.mxu3 }
 0x73e   :  { %v1216_v60 = vadd.f32 %v2623_v30, %v1215_v59  ;;  %v1333_v59 = vld [vmem:[#allocation3 + $0x180] sm:$0xff] }
 0x740   :  { %v1242_v9 = vadd.f32 %v1241_v62, %v1216_v60  ;;  %v1334_v60 = vld [vmem:[#allocation3 + $0x188] sm:$0xff]  ;;  %v1335_v62 = vld [vmem:[#allocation3 + $0x190] sm:$0xff] }
 0x741   :  { %1431 = vmatpush.msra.mxu1 %v1334_v60 }
 0x742   :  { %v3341_v54 = vadd.f32 %v1242_v9, %v3316_v20  ;;  %v1378_v20 = vld [vmem:[#allocation3 + $0x2e8] sm:$0xff] }
 0x743   :  { %1390 = vmatpush.msrb.mxu0 %v1378_v20 }
 0x744   :  { %1252 = vadd.xlane.f32.xlu1 %v3341_v54  ;;  %v1261_v57 = vmul.f32 %v3341_v54, %v3341_v54 }
 0x745   :  { %1391 = vmatpush.msrb.mxu0 %v1375_v13 }
 0x746   :  { %1265 = vadd.xlane.f32.xlu2 %v1261_v57 }
 0x747   :  { %v1218_v16 = vpop.f32.mrf.mxu2  ;;  %v1244_v1 = vpop.f32.mrf.mxu3  ;;  %1392 = vmatpush.msrb.mxu0 %v1372_v63 }
 0x748   :  { %v1219_v0 = vadd.f32 %v2623_v30, %v1218_v16  ;;  %v1339_v30 = vld [vmem:[#allocation3 + $0x1b0] sm:$0xff] }
 0x749   :  { %1393 = vmatpush.msrb.mxu0 %v1369_v15 }
 0x74a   :  { %v1245_v4 = vadd.f32 %v1244_v1, %v1219_v0 }
 0x74b   :  { %1394 = vmatpush.msrb.mxu0 %v1366_v23 }
 0x74c   :  { %v3347_v5 = vadd.f32 %v1245_v4, %v3324_v8  ;;  %v1371_v8 = vld [vmem:[#allocation3 + $0x2b0] sm:$0xff] }
 0x74d   :  { %1445 = vmatpush.msra.mxu2 %v1371_v8  ;;  %1395 = vmatpush.msrb.mxu0 %v1363_v21 }
 0x74e   :  { %v1254_v7 = vsel %vm463_vm9, %v3347_v5, 0.0  ;;  %v1262_v61 = vmul.f32 %v3347_v5, %v3347_v5 }
 0x74f   :  { %1255 = vadd.xlane.f32.xlu0 %v1254_v7  ;;  %1446 = vmatpush.msra.mxu2 %v1368_v26 }
 0x750   :  { %v1267_v2 = vsel %vm463_vm9, %v1262_v61, 0.0  ;;  %1396 = vmatpush.msrb.mxu0 %v1360_v12 }
 0x751   :  { %1268 = vadd.xlane.f32.xlu1 %v1267_v2  ;;  %1447 = vmatpush.msra.mxu2 %v1365_v48 }
 0x752   :  { %1397 = vmatpush.msrb.mxu0 %v1357_v28 }
 0x753   :  { %1448 = vmatpush.msra.mxu2 %v1362_v27 }
 0x754   :  { %1398 = vmatpush.msrb.mxu0 %v1354_v33 }
 0x755   :  { %1449 = vmatpush.msra.mxu2 %v1359_v31 }
 0x756   :  { %1399 = vmatpush.msrb.mxu0 %v1351_v36 }
 0x757   :  { %1450 = vmatpush.msra.mxu2 %v1356_v35 }
 0x758   :  { %1400 = vmatpush.msrb.mxu0 %v1348_v37 }
 0x759   :  { %1451 = vmatpush.msra.mxu2 %v1353_v39 }
 0x75a   :  { %1401 = vmatpush.msrb.mxu0 %v1345_v42 }
 0x75b   :  { %1452 = vmatpush.msra.mxu2 %v1350_v41 }
 0x75c   :  { %1402 = vmatpush.msrb.mxu0 %v1342_v3 }
 0x75d   :  { %1453 = vmatpush.msra.mxu2 %v1347_v49 }
 0x75e   :  { %1403 = vmatpush.msrb.mxu0 %v1339_v30 }
 0x75f   :  { %1454 = vmatpush.msra.mxu2 %v1344_v43 }
 0x760   :  { %1404 = vmatpush.msrb.mxu0 %v1336_v53 }
 0x761   :  { %1455 = vmatpush.msra.mxu2 %v1341_v52 }
 0x762   :  { %1405 = vmatpush.msrb.mxu0 %v1333_v59  ;;  %v2528_v59 = vld [vmem:[%s3729_s5 + $0x3] sm:$0x7] }
 0x763   :  { %1456 = vmatpush.msra.mxu2 %v1338_v58  ;;  %v1385_v60 = vperm.slane %v2528_v59, 1 }
 0x765   :  { %1457 = vmatpush.msra.mxu2 %v1335_v62 }
 0x798   :  { %v1251_v9 = vpop.xlane.xlu2 %1250 }
 0x799   :  { %v1257_v57 = vmul.f32 %v1251_v9, %v3003_v45 }
 0x79a   :  { %v1264_v16 = vpop.xlane.xlu0 %1263 }
 0x79b   :  { %v1273_v0 = vmul.f32 %v1257_v57, %v1257_v57  ;;  %v1270_v1 = vmul.f32 %v1264_v16, %v3003_v45  ;;  %v1279_v17 = vsub.f32 %v3335_v56, %v1257_v57 }
 0x79d   :  { %v1276_v4 = vsub.f32 %v1270_v1, %v1273_v0  ;;  %v1386_v1 = vperm.slane %v2528_v59, 2 }
 0x79f   :  { %v1282_v7 = vadd.f32 1e-05, %v1276_v4 }
 0x7a1   :  { %2695 = vrsqrt.f32 %v1282_v7  ;;  %vm1291_vm6 = vweird.f32 %v1282_v7 }
 0x7a7   :  { %v2696_v61 = vpop.eup %2695 }
 0x7a8   :  { %v1286_v2 = vmul.f32 %v2696_v61, %v1282_v7  ;;  %vm1292_vm2 = vweird.f32 %v2696_v61  ;;  %v1384_v7 = vperm.slane %v2528_v59, 0 }
 0x7a9   :  { %vm1293_vm7 = vmor %vm1291_vm6, %vm1292_vm2 }
 0x7aa   :  { %v1287_v20 = vmul.f32 %v2696_v61, %v1286_v2 }
 0x7ac   :  { %v1288_v10 = vmul.f32 0.5, %v1287_v20 }
 0x7ae   :  { %v1289_v11 = vsub.f32 1.5, %v1288_v10 }
 0x7b0   :  { %v1290_v13 = vmul.f32 %v2696_v61, %v1289_v11 }
 0x7b2   :  { %v1294_v63 = vsel %vm1293_vm7, %v2696_v61, %v1290_v13 }
 0x7b3   :  { %v1315_v14 = vmul.f32 %v1294_v63, %v1279_v17 }
 0x7b5   :  { %v1319_v15 = vmul.f32 %v2624_v19, %v1315_v14 }
 0x7b7   :  { %v1253_v22 = vpop.xlane.xlu1 %1252  ;;  %v3363_v8 = vadd.f32 %v2625_v47, %v1319_v15 }
 0x7b8   :  { %v1258_v23 = vmul.f32 %v1253_v22, %v3003_v45 }
 0x7b9   :  { %1406 = vmatmul.f32.vlgmr.msrb.gmra.mxu0 %v3363_v8  ;;  %1432 = vmatmul.f32.vlgmr.msra.gmra.mxu1 %v3363_v8  ;;  %v1266_v56 = vpop.xlane.xlu2 %1265 }
 0x7ba   :  { %v1274_v24 = vmul.f32 %v1258_v23, %v1258_v23  ;;  %1458 = vmatmul.f32.vlgmr.msra.gmra.mxu2 %v3363_v8  ;;  %v1271_v26 = vmul.f32 %v1266_v56, %v3003_v45  ;;  %v1280_v37 = vsub.f32 %v3341_v54, %v1258_v23 }
 0x7bc   :  { %v1277_v21 = vsub.f32 %v1271_v26, %v1274_v24 }
 0x7be   :  { %v1283_v25 = vadd.f32 1e-05, %v1277_v21 }
 0x7c0   :  { %2697 = vrsqrt.f32 %v1283_v25  ;;  %vm1301_vm11 = vweird.f32 %v1283_v25 }
 0x7c2   :  { %v1256_v48 = vpop.xlane.xlu0 %1255 }
 0x7c3   :  { %v1259_v12 = vmul.f32 %v1256_v48, %v3003_v45 }
 0x7c4   :  { %v1269_v18 = vpop.xlane.xlu1 %1268 }
 0x7c5   :  { %v1275_v27 = vmul.f32 %v1259_v12, %v1259_v12  ;;  %v1272_v28 = vmul.f32 %v1269_v18, %v3003_v45  ;;  %v1281_v54 = vsub.f32 %v3347_v5, %v1259_v12 }
 0x7c6   :  { %v2698_v29 = vpop.eup %2697 }
 0x7c7   :  { %v1296_v31 = vmul.f32 %v2698_v29, %v1283_v25  ;;  %v1278_v33 = vsub.f32 %v1272_v28, %v1275_v27  ;;  %vm1302_vm10 = vweird.f32 %v2698_v29 }
 0x7c8   :  { %vm1303_vm12 = vmor %vm1301_vm11, %vm1302_vm10 }
 0x7c9   :  { %v1297_v34 = vmul.f32 %v2698_v29, %v1296_v31  ;;  %v1284_v35 = vadd.f32 1e-05, %v1278_v33 }
 0x7cb   :  { %v1298_v36 = vmul.f32 0.5, %v1297_v34  ;;  %2699 = vrsqrt.f32 %v1284_v35  ;;  %vm1311_vm15 = vweird.f32 %v1284_v35 }
 0x7cd   :  { %v1299_v6 = vsub.f32 1.5, %v1298_v36 }
 0x7cf   :  { %v1300_v39 = vmul.f32 %v2698_v29, %v1299_v6 }
 0x7d1   :  { %v2700_v40 = vpop.eup %2699  ;;  %v1304_v41 = vsel %vm1303_vm12, %v2698_v29, %v1300_v39 }
 0x7d2   :  { %v1306_v42 = vmul.f32 %v2700_v40, %v1284_v35  ;;  %v1316_v46 = vmul.f32 %v1304_v41, %v1280_v37  ;;  %vm1312_vm13 = vweird.f32 %v2700_v40 }
 0x7d3   :  { %vm1313_vm0 = vmor %vm1311_vm15, %vm1312_vm13 }
 0x7d4   :  { %v1307_v49 = vmul.f32 %v2700_v40, %v1306_v42  ;;  %v1320_v3 = vmul.f32 %v2624_v19, %v1316_v46 }
 0x7d6   :  { %v1308_v44 = vmul.f32 0.5, %v1307_v49  ;;  %v3373_v43 = vadd.f32 %v2625_v47, %v1320_v3 }
 0x7d8   :  { %v1309_v30 = vsub.f32 1.5, %v1308_v44  ;;  %1409 = vmatmul.f32.gmra.mxu0 %v3373_v43  ;;  %1435 = vmatmul.f32.gmra.mxu1 %v3373_v43 }
 0x7d9   :  { %1461 = vmatmul.f32.gmra.mxu2 %v3373_v43 }
 0x7da   :  { %v1310_v51 = vmul.f32 %v2700_v40, %v1309_v30 }
 0x7dc   :  { %v1314_v52 = vsel %vm1313_vm0, %v2700_v40, %v1310_v51 }
 0x7dd   :  { %v1317_v53 = vmul.f32 %v1314_v52, %v1281_v54 }
 0x7df   :  { %v1321_v55 = vmul.f32 %v2624_v19, %v1317_v53 }
 0x7e1   :  { %v3379_v58 = vadd.f32 %v2625_v47, %v1321_v55 }
 0x7e3   :  { %1412 = vmatmul.f32.gmra.mxu0 %v3379_v58  ;;  %1438 = vmatmul.f32.gmra.mxu1 %v3379_v58 }
 0x7e4   :  { %1464 = vmatmul.f32.gmra.mxu2 %v3379_v58 }
 0x836   :  { %v1433_v62 = vpop.f32.mrf.mxu1  ;;  %v1407_v5 = vpop.f32.mrf.mxu0 }
 0x837   :  { %v1434_v9 = vadd.f32 %v1433_v62, %v1385_v60  ;;  %v1408_v14 = vadd.f32 %v1407_v5, %v1384_v7 }
 0x839   :  { %1595 = vrot.lane.b32.xlu1 %v1434_v9, %s2900_s18 }
 0x83d   :  { %v1459_v57 = vpop.f32.mrf.mxu2 }
 0x83e   :  { %v1460_v2 = vadd.f32 %v1459_v57, %v1386_v1 }
 0x855   :  { %v1436_v16 = vpop.f32.mrf.mxu1  ;;  %v1410_v4 = vpop.f32.mrf.mxu0 }
 0x856   :  { %v1437_v0 = vadd.f32 %v1436_v16, %v1385_v60  ;;  %v1411_v10 = vadd.f32 %v1410_v4, %v1384_v7 }
 0x858   :  { %1597 = vrot.lane.b32.xlu0 %v1437_v0, %s2900_s18 }
 0x85c   :  { %v1462_v61 = vpop.f32.mrf.mxu2 }
 0x85d   :  { %v1463_v20 = vadd.f32 %v1462_v61, %v1386_v1 }
 0x85f   :  { %v3389_v11 = vpack.i.bf16 %v1460_v2, %v1463_v20 }
 0x860   :  { %v1439_v13 = vpop.f32.mrf.mxu1  ;;  %1591 = vrot.lane.b32.xlu0 %v1411_v10, %s2900_s18  ;;  %v1413_v47 = vpop.f32.mrf.mxu0 }
 0x861   :  { %v1440_v17 = vadd.f32 %v1439_v13, %v1385_v60  ;;  %v3404_v15 = vadd.f32 %v1413_v47, %v1384_v7 }
 0x863   :  { %1869 = vrot.lane.b32.xlu1 %v1440_v17, %s2901_s19  ;;  %1599 = vrot.lane.b32.xlu2 %v1440_v17, %s2900_s18 }
 0x864   :  { %2529 = vmatpush.xpose.msk.msra.mxu3 %vm368_vm8, %v1440_v17 }
 0x867   :  { %v1465_v19 = vpop.f32.mrf.mxu2 }
 0x868   :  { %v3395_v63 = vadd.f32 %v1465_v19, %v1386_v1  ;;  %2530 = vmatpush.xpose.msk.msra.mxu3 %vm368_vm8, %v1437_v0  ;;  %1731 = vrot.lane.b32.xlu0 %v1434_v9, %s2902_s20 }
 0x86a   :  { %2535 = vmatpush.msk.msra.mxu0 %vm463_vm9, %v3395_v63 }
 0x86b   :  { %1589 = vrot.lane.b32.xlu2 %v1408_v14, %s2900_s18  ;;  %1867 = vrot.lane.b32.xlu1 %v1437_v0, %s2901_s19 }
 0x86c   :  { %1577 = vmatpush.msra.mxu0 %v1463_v20  ;;  %2531 = vmatpush.xpose.msk.msra.mxu3 %vm368_vm8, %v1434_v9 }
 0x86e   :  { %1578 = vmatpush.msra.mxu0 %v1460_v2 }
 0x86f   :  { %2532 = vmatmul.msk.f32.vlgmr.msra.gmra.mxu3 %vm368_vm8, %v1408_v14 }
 0x870   :  { %1593 = vrot.lane.b32.xlu0 %v3404_v15, %s2900_s18 }
 0x873   :  { %1735 = vrot.lane.b32.xlu2 %v1440_v17, %s2902_s20  ;;  %1725 = vrot.lane.b32.xlu1 %v1408_v14, %s2902_s20 }
 0x877   :  { %2533 = vmatmul.msk.f32.gmra.mxu3 %vm368_vm8, %v1411_v10 }
 0x878   :  { %1859 = vrot.lane.b32.xlu0 %v1408_v14, %s2901_s19 }
 0x87b   :  { %1733 = vrot.lane.b32.xlu2 %v1437_v0, %s2902_s20  ;;  %1861 = vrot.lane.b32.xlu1 %v1411_v10, %s2901_s19 }
 0x87f   :  { %2534 = vmatmul.msk.f32.gmra.mxu3 %vm368_vm8, %v3404_v15 }
 0x880   :  { %1684 = vrot.lane.b32.xlu0 %v3395_v63, %s2900_s18 }
 0x883   :  { %1865 = vrot.lane.b32.xlu2 %v1434_v9, %s2901_s19 }
 0x88b   :  { %1727 = vrot.lane.b32.xlu2 %v1411_v10, %s2902_s20 }
 0x8ab   :  { %v1596_v24 = vpop.permute.xlu1 %1595 }
 0x8bd   :  { %v1600_v22 = vpop.permute.xlu2 %1599 }
 0x8be   :  { %2539 = vmatpush.xpose.msk.msrb.mxu1 %vm368_vm8, %v1600_v22 }
 0x8c5   :  { %v1590_v23 = vpop.permute.xlu2 %1589 }
 0x8ca   :  { %v1598_v56 = vpop.permute.xlu0 %1597 }
 0x8cb   :  { %2540 = vmatpush.xpose.msk.msrb.mxu1 %vm368_vm8, %v1598_v56 }
 0x8cd   :  { %v1736_v26 = vpop.permute.xlu2 %1735 }
 0x8ce   :  { %2549 = vmatpush.xpose.msk.msrb.mxu3 %vm368_vm8, %v1736_v26 }
 0x8cf   :  { %2541 = vmatpush.xpose.msk.msrb.mxu1 %vm368_vm8, %v1596_v24 }
 0x8d2   :  { %2542 = vmatmul.msk.f32.vlgmr.msrb.gmra.mxu1 %vm368_vm8, %v1590_v23  ;;  %v1592_v21 = vpop.permute.xlu0 %1591 }
 0x8d5   :  { %v1870_v25 = vpop.permute.xlu1 %1869  ;;  %v1734_v48 = vpop.permute.xlu2 %1733 }
 0x8d6   :  { %2550 = vmatpush.xpose.msk.msrb.mxu3 %vm368_vm8, %v1734_v48  ;;  %2559 = vmatpush.xpose.msk.msra.mxu1 %vm368_vm8, %v1870_v25 }
 0x8da   :  { %2543 = vmatmul.msk.f32.gmra.mxu1 %vm368_vm8, %v1592_v21  ;;  %v1732_v12 = vpop.permute.xlu0 %1731 }
 0x8db   :  { %2551 = vmatpush.xpose.msk.msrb.mxu3 %vm368_vm8, %v1732_v12 }
 0x8dd   :  { %v1868_v18 = vpop.permute.xlu1 %1867  ;;  %v1866_v27 = vpop.permute.xlu2 %1865 }
 0x8de   :  { %2560 = vmatpush.xpose.msk.msra.mxu1 %vm368_vm8, %v1868_v18 }
 0x8e2   :  { %2561 = vmatpush.xpose.msk.msra.mxu1 %vm368_vm8, %v1866_v27  ;;  %v1594_v28 = vpop.permute.xlu0 %1593 }
 0x8e3   :  { %2544 = vmatmul.msk.f32.gmra.mxu1 %vm368_vm8, %v1594_v28 }
 0x8e5   :  { %v1726_v29 = vpop.permute.xlu1 %1725  ;;  %v1728_v33 = vpop.permute.xlu2 %1727 }
 0x8e6   :  { %2552 = vmatmul.msk.f32.vlgmr.msrb.gmra.mxu3 %vm368_vm8, %v1726_v29 }
 0x8ea   :  { %v1860_v31 = vpop.permute.xlu0 %1859 }
 0x8eb   :  { %2562 = vmatmul.msk.f32.vlgmr.msra.gmra.mxu1 %vm368_vm8, %v1860_v31 }
 0x8ed   :  { %v1862_v34 = vpop.permute.xlu1 %1861 }
 0x8ee   :  { %2553 = vmatmul.msk.f32.gmra.mxu3 %vm368_vm8, %v1728_v33 }
 0x8f2   :  { %v1503_v35 = vpop.f32.mrf.mxu3  ;;  %v1685_v36 = vpop.permute.xlu0 %1684 }
 0x8f3   :  { %v1512_v6 = vmul.f32 0.17677669, %v1503_v35  ;;  %2545 = vmatpush.msk.msrb.mxu2 %vm463_vm9, %v1685_v36  ;;  %2563 = vmatmul.msk.f32.gmra.mxu1 %vm368_vm8, %v1862_v34 }
 0x8f5   :  { %v1515_v39 = vadd.f32 %v1512_v6, %v3103_v32 }
 0x8f7   :  { %v1518_v37 = vsel %vm419_vm14, %v1515_v39, -inf }
 0x8f8   :  { %1519 = vmax.xlane.f32.xlu2 %v1518_v37 }
 0x8fa   :  { %v1506_v40 = vpop.f32.mrf.mxu3 }
 0x8fb   :  { %v1513_v41 = vmul.f32 0.17677669, %v1506_v40 }
 0x8fd   :  { %v1516_v42 = vadd.f32 %v1513_v41, %v3111_v38 }
 0x8ff   :  { %v1521_v46 = vsel %vm419_vm14, %v1516_v42, -inf }
 0x900   :  { %1522 = vmax.xlane.f32.xlu0 %v1521_v46 }
 0x902   :  { %v1509_v49 = vpop.f32.mrf.mxu3 }
 0x903   :  { %v1514_v3 = vmul.f32 0.17677669, %v1509_v49 }
 0x905   :  { %v1517_v44 = vadd.f32 %v1514_v3, %v3119_v50 }
 0x907   :  { %v1524_v30 = vsel %vm426_vm3, %v1517_v44, -inf }
 0x908   :  { %1525 = vmax.xlane.f32.xlu1 %v1524_v30 }
 0x94f   :  { %v1630_v51 = vpop.f32.mrf.mxu1 }
 0x950   :  { %v1639_v54 = vmul.f32 0.17677669, %v1630_v51 }
 0x952   :  { %v1642_v52 = vadd.f32 %v1639_v54, %v3103_v32 }
 0x954   :  { %v1645_v53 = vsel %vm419_vm14, %v1642_v52, -inf }
 0x955   :  { %1646 = vmax.xlane.f32.xlu0 %v1645_v53 }
 0x957   :  { %v1633_v55 = vpop.f32.mrf.mxu1 }
 0x958   :  { %v1640_v59 = vmul.f32 0.17677669, %v1633_v55 }
 0x95a   :  { %v3447_v60 = vadd.f32 %v1640_v59, %v3111_v38 }
 0x95c   :  { %v1648_v62 = vsel %vm419_vm14, %v3447_v60, -inf }
 0x95d   :  { %1649 = vmax.xlane.f32.xlu1 %v1648_v62 }
 0x960   :  { %v1636_v9 = vpop.f32.mrf.mxu1 }
 0x961   :  { %v1641_v4 = vmul.f32 0.17677669, %v1636_v9 }
 0x963   :  { %v1644_v13 = vadd.f32 %v1641_v4, %v3119_v50 }
 0x965   :  { %v1651_v56 = vsel %vm426_vm3, %v1644_v13, -inf }
 0x968   :  { %v1900_v20 = vpop.f32.mrf.mxu1 }
 0x969   :  { %v1766_v5 = vpop.f32.mrf.mxu3  ;;  %v1909_v22 = vmul.f32 0.17677669, %v1900_v20 }
 0x96a   :  { %v1775_v57 = vmul.f32 0.17677669, %v1766_v5 }
 0x96b   :  { %v1520_v16 = vpop.xlane.xlu2 %1519  ;;  %v1912_v21 = vadd.f32 %v1909_v22, %v3103_v32 }
 0x96c   :  { %v1527_v0 = vsub.f32 %v1515_v39, %v1520_v16  ;;  %v1778_v1 = vadd.f32 %v1775_v57, %v3103_v32 }
 0x96d   :  { %v1915_v27 = vsel %vm419_vm14, %v1912_v21, -inf }
 0x96e   :  { %v1530_v7 = vmul.f32 1.442695, %v1527_v0  ;;  %v1781_v61 = vsel %vm419_vm14, %v1778_v1, -inf }
 0x96f   :  { %1782 = vmax.xlane.f32.xlu2 %v1781_v61 }
 0x970   :  { %2701 = vpow2.f32 %v1530_v7  ;;  %v1903_v48 = vpop.f32.mrf.mxu1 }
 0x971   :  { %v1769_v2 = vpop.f32.mrf.mxu3  ;;  %v1910_v28 = vmul.f32 0.17677669, %v1903_v48 }
 0x972   :  { %v1776_v10 = vmul.f32 0.17677669, %v1769_v2 }
 0x973   :  { %v1523_v17 = vpop.xlane.xlu0 %1522  ;;  %v3468_v33 = vadd.f32 %v1910_v28, %v3111_v38 }
 0x974   :  { %v1528_v19 = vsub.f32 %v1516_v42, %v1523_v17  ;;  %v3455_v14 = vadd.f32 %v1776_v10, %v3111_v38 }
 0x975   :  { %v1918_v32 = vsel %vm419_vm14, %v3468_v33, -inf }
 0x976   :  { %v2702_v47 = vpop.eup %2701  ;;  %v1532_v23 = vmul.f32 1.442695, %v1528_v19  ;;  %v1784_v24 = vsel %vm419_vm14, %v3455_v14, -inf }
 0x977   :  { %1652 = vmax.xlane.f32.xlu2 %v1651_v56  ;;  %1785 = vmax.xlane.f32.xlu0 %v1784_v24  ;;  %v1536_v26 = vsel %vm419_vm14, %v2702_v47, 0.0 }
 0x978   :  { %2703 = vpow2.f32 %v1532_v23  ;;  %1537 = vadd.xlane.f32.xlu1 %v1536_v26 }
 0x97b   :  { %v1526_v25 = vpop.xlane.xlu1 %1525 }
 0x97c   :  { %v1529_v18 = vsub.f32 %v1517_v44, %v1526_v25 }
 0x97e   :  { %v3462_v12 = vpop.eup %2703  ;;  %v1534_v31 = vmul.f32 1.442695, %v1529_v18 }
 0x97f   :  { %1916 = vmax.xlane.f32.xlu0 %v1915_v27  ;;  %v1539_v29 = vsel %vm419_vm14, %v3462_v12, 0.0 }
 0x980   :  { %1540 = vadd.xlane.f32.xlu1 %v1539_v29  ;;  %2705 = vpow2.f32 %v1534_v31 }
 0x986   :  { %v2706_v34 = vpop.eup %2705 }
 0x987   :  { %v1542_v35 = vsel %vm426_vm3, %v2706_v34, 0.0 }
 0x988   :  { %1919 = vmax.xlane.f32.xlu1 %v1918_v32 }
 0x98f   :  { %2603 = vrot.lane.b32.xlu2 %v3389_v11, %s2900_s18 }
 0x990   :  { %1543 = vadd.xlane.f32.xlu1 %v1542_v35 }
 0x993   :  { %2608 = vrot.lane.b32.xlu0 %v3389_v11, %s2901_s19 }
 0x9c8   :  { %v1647_v36 = vpop.xlane.xlu0 %1646 }
 0x9c9   :  { %v1654_v6 = vsub.f32 %v1642_v52, %v1647_v36 }
 0x9cb   :  { %v1657_v39 = vmul.f32 1.442695, %v1654_v6 }
 0x9cd   :  { %2707 = vpow2.f32 %v1657_v39 }
 0x9d0   :  { %v1650_v41 = vpop.xlane.xlu1 %1649 }
 0x9d1   :  { %v1655_v49 = vsub.f32 %v3447_v60, %v1650_v41 }
 0x9d3   :  { %v3477_v38 = vpop.eup %2707  ;;  %v1659_v3 = vmul.f32 1.442695, %v1655_v49 }
 0x9d4   :  { %v1663_v37 = vsel %vm419_vm14, %v3477_v38, 0.0 }
 0x9d5   :  { %1664 = vadd.xlane.f32.xlu2 %v1663_v37 }
 0x9e2   :  { %v1783_v40 = vpop.xlane.xlu2 %1782 }
 0x9e3   :  { %v1790_v42 = vsub.f32 %v1778_v1, %v1783_v40 }
 0x9e5   :  { %v1793_v46 = vmul.f32 1.442695, %v1790_v42 }
 0x9e7   :  { %2709 = vpow2.f32 %v1793_v46 }
 0x9ea   :  { %v1653_v44 = vpop.xlane.xlu2 %1652  ;;  %v1786_v30 = vpop.xlane.xlu0 %1785 }
 0x9eb   :  { %v1656_v51 = vsub.f32 %v1644_v13, %v1653_v44  ;;  %v1538_v54 = vpop.xlane.xlu1 %1537  ;;  %v1791_v56 = vsub.f32 %v3455_v14, %v1786_v30 }
 0x9ec   :  { %2711 = vrcp.f32 %v1538_v54 }
 0x9ed   :  { %v3482_v52 = vpop.eup %2709  ;;  %v1661_v53 = vmul.f32 1.442695, %v1656_v51  ;;  %2713 = vpow2.f32 %v1659_v3  ;;  %v1795_v24 = vmul.f32 1.442695, %v1791_v56 }
 0x9ee   :  { %v1799_v55 = vsel %vm419_vm14, %v3482_v52, 0.0 }
 0x9ef   :  { %2715 = vpow2.f32 %v1661_v53  ;;  %1800 = vadd.xlane.f32.xlu1 %v1799_v55 }
 0x9f2   :  { %v2712_v59 = vpop.eup %2711  ;;  %v2604_v62 = vpop.permute.xlu2 %2603 }
 0x9f3   :  { %v1917_v9 = vpop.xlane.xlu0 %1916  ;;  %v1548_v60 = vmul.f32 %v2712_v59, %v2702_v47  ;;  %v2605_v5 = vunpack.i.l.bf16 %v2604_v62  ;;  %v1541_v16 = vpop.xlane.xlu1 %1540  ;;  %v2606_v4 = vunpack.i.h.bf16 %v2604_v62 }
 0x9f4   :  { %v1924_v57 = vsub.f32 %v1912_v21, %v1917_v9  ;;  %v2714_v0 = vpop.eup %2713  ;;  %2717 = vrcp.f32 %v1541_v16 }
 0x9f5   :  { %v2716_v1 = vpop.eup %2715  ;;  %2536 = vmatmul.msk.f32.vlgmr.msra.gmra.mxu0 %vm419_vm14, %v1548_v60  ;;  %1713 = vmatpush.msrb.mxu2 %v2605_v5  ;;  %v1666_v2 = vsel %vm419_vm14, %v2714_v0, 0.0 }
 0x9f6   :  { %v1927_v7 = vmul.f32 1.442695, %v1924_v57  ;;  %v1669_v61 = vsel %vm426_vm3, %v2716_v1, 0.0 }
 0x9f7   :  { %1714 = vmatpush.msrb.mxu2 %v2606_v4  ;;  %1670 = vadd.xlane.f32.xlu0 %v1669_v61  ;;  %v2054_v4 = vld [vmem:[#allocation6 + $0xf8] sm:$0xff]  ;;  %v2052_v61 = vld [vmem:[#allocation6 + $0xe8] sm:$0xff] }
 0x9f8   :  { %2719 = vpow2.f32 %v1927_v7  ;;  %1667 = vadd.xlane.f32.xlu1 %v1666_v2  ;;  %v2053_v7 = vld [vmem:[#allocation6 + $0xf0] sm:$0xff]  ;;  %2056 = vmatpush.msra.mxu3 %v2054_v4  ;;  %v2051_v2 = vld [vmem:[#allocation6 + $0xe0] sm:$0xff] }
 0x9f9   :  { %v2192_v4 = vld [vmem:[#allocation8 + $0x1f0] sm:$0xff] }
 0x9fa   :  { %v2718_v20 = vpop.eup %2717  ;;  %2057 = vmatpush.msra.mxu3 %v2053_v7  ;;  %v2193_v7 = vld [vmem:[#allocation8 + $0x1f8] sm:$0xff] }
 0x9fb   :  { %v1920_v10 = vpop.xlane.xlu1 %1919  ;;  %v1549_v13 = vmul.f32 %v2718_v20, %v3462_v12  ;;  %2227 = vmatpush.msrb.mxu1 %v2193_v7 }
 0x9fc   :  { %2058 = vmatpush.msra.mxu3 %v2052_v61  ;;  %v2190_v61 = vld [vmem:[#allocation8 + $0x1e0] sm:$0xff] }
 0x9fd   :  { %2537 = vmatmul.msk.f32.gmra.mxu0 %vm419_vm14, %v1549_v13  ;;  %v2049_v13 = vld [vmem:[#allocation6 + $0xd0] sm:$0xff] }
 0x9fe   :  { %v3490_v17 = vpop.eup %2719  ;;  %2059 = vmatpush.msra.mxu3 %v2051_v2  ;;  %v2191_v2 = vld [vmem:[#allocation8 + $0x1e8] sm:$0xff] }
 0x9ff   :  { %v1933_v19 = vsel %vm419_vm14, %v3490_v17, 0.0  ;;  %2228 = vmatpush.msrb.mxu1 %v2191_v2  ;;  %v2275_v2 = vld [vmem:[#allocation9 + $0x178] sm:$0xff] }
 0xa00   :  { %1934 = vadd.xlane.f32.xlu2 %v1933_v19  ;;  %v2048_v19 = vld [vmem:[#allocation6 + $0xc8] sm:$0xff] }
 0xa03   :  { %v1544_v47 = vpop.xlane.xlu1 %1543 }
 0xa04   :  { %2721 = vrcp.f32 %v1544_v47 }
 0xa05   :  { %2723 = vpow2.f32 %v1795_v24  ;;  %v2609_v27 = vpop.permute.xlu0 %2608  ;;  %v2045_v24 = vld [vmem:[#allocation6 + $0xb0] sm:$0xff] }
 0xa06   :  { %v2610_v49 = vunpack.i.l.bf16 %v2609_v27  ;;  %v2611_v3 = vunpack.i.h.bf16 %v2609_v27 }
 0xa0a   :  { %v2722_v22 = vpop.eup %2721 }
 0xa0b   :  { %2613 = vrot.lane.b32.xlu0 %v3389_v11, %s2902_s20  ;;  %v1550_v23 = vmul.f32 %v2722_v22, %v2706_v34  ;;  %v1925_v11 = vsub.f32 %v3468_v33, %v1920_v10  ;;  %v2724_v21 = vpop.eup %2723  ;;  %v2050_v10 = vld [vmem:[#allocation6 + $0xd8] sm:$0xff]  ;;  %v2047_v22 = vld [vmem:[#allocation6 + $0xc0] sm:$0xff] }
 0xa0c   :  { %v1802_v25 = vsel %vm419_vm14, %v2724_v21, 0.0  ;;  %2060 = vmatpush.msra.mxu3 %v2050_v10  ;;  %v2186_v10 = vld [vmem:[#allocation8 + $0x1c0] sm:$0xff] }
 0xa0d   :  { %2538 = vmatmul.msk.f32.gmra.mxu0 %vm419_vm14, %v1550_v23  ;;  %v1929_v26 = vmul.f32 1.442695, %v1925_v11  ;;  %v2046_v23 = vld [vmem:[#allocation6 + $0xb8] sm:$0xff] }
 0xa0e   :  { %2061 = vmatpush.msra.mxu3 %v2049_v13  ;;  %v2187_v13 = vld [vmem:[#allocation8 + $0x1c8] sm:$0xff] }
 0xa0f   :  { %2725 = vpow2.f32 %v1929_v26  ;;  %v2044_v26 = vld [vmem:[#allocation6 + $0xa8] sm:$0xff] }
 0xa10   :  { %2062 = vmatpush.msra.mxu3 %v2048_v19  ;;  %v2184_v19 = vld [vmem:[#allocation8 + $0x1b0] sm:$0xff] }
 0xa11   :  { %1952 = vrot.lane.b32.xlu1 %v3395_v63, %s2901_s19 }
 0xa12   :  { %2063 = vmatpush.msra.mxu3 %v2047_v22  ;;  %v2182_v22 = vld [vmem:[#allocation8 + $0x1a0] sm:$0xff] }
 0xa14   :  { %2064 = vmatpush.msra.mxu3 %v2046_v23  ;;  %v2183_v23 = vld [vmem:[#allocation8 + $0x1a8] sm:$0xff] }
 0xa15   :  { %v2726_v48 = vpop.eup %2725 }
 0xa16   :  { %2065 = vmatpush.msra.mxu3 %v2045_v24  ;;  %v2181_v24 = vld [vmem:[#allocation8 + $0x198] sm:$0xff] }
 0xa18   :  { %1818 = vrot.lane.b32.xlu2 %v3395_v63, %s2902_s20  ;;  %v1936_v63 = vsel %vm419_vm14, %v2726_v48, 0.0  ;;  %2066 = vmatpush.msra.mxu3 %v2044_v26  ;;  %v2178_v26 = vld [vmem:[#allocation8 + $0x180] sm:$0xff] }
 0xa20   :  { %1729 = vrot.lane.b32.xlu2 %v3404_v15, %s2902_s20 }
 0xa28   :  { %1863 = vrot.lane.b32.xlu2 %v3404_v15, %s2901_s19 }
 0xa35   :  { %1803 = vadd.xlane.f32.xlu0 %v1802_v25  ;;  %v2043_v25 = vld [vmem:[#allocation6 + $0xa0] sm:$0xff] }
 0xa36   :  { %2067 = vmatpush.msra.mxu3 %v2043_v25 }
 0xa3b   :  { %1937 = vadd.xlane.f32.xlu1 %v1936_v63  ;;  %v2041_v63 = vld [vmem:[#allocation6 + $0x90] sm:$0xff] }
 0xa48   :  { %v1665_v12 = vpop.xlane.xlu2 %1664 }
 0xa49   :  { %2727 = vrcp.f32 %v1665_v12  ;;  %v2040_v12 = vld [vmem:[#allocation6 + $0x88] sm:$0xff] }
 0xa4f   :  { %v2728_v14 = vpop.eup %2727 }
 0xa50   :  { %v1675_v18 = vmul.f32 %v2728_v14, %v3477_v38  ;;  %v2039_v14 = vld [vmem:[#allocation6 + $0x80] sm:$0xff] }
 0xa52   :  { %2546 = vmatmul.msk.f32.vlgmr.msrb.gmra.mxu2 %vm419_vm14, %v1675_v18 }
 0xa62   :  { %v1801_v15 = vpop.xlane.xlu1 %1800 }
 0xa6a   :  { %v1671_v29 = vpop.xlane.xlu0 %1670 }
 0xa6b   :  { %v1668_v28 = vpop.xlane.xlu1 %1667 }
 0xa6c   :  { %2729 = vrcp.f32 %v1668_v28 }
 0xa6d   :  { %2731 = vrcp.f32 %v1671_v29 }
 0xa6e   :  { %2733 = vrcp.f32 %v1801_v15 }
 0xa72   :  { %v2730_v31 = vpop.eup %2729  ;;  %v1580_v9 = vpop.f32.mrf.mxu0 }
 0xa73   :  { %v1935_v33 = vpop.xlane.xlu2 %1934  ;;  %v1676_v32 = vmul.f32 %v2730_v31, %v2714_v0  ;;  %v2732_v34 = vpop.eup %2731 }
 0xa74   :  { %v1677_v36 = vmul.f32 %v2732_v34, %v2716_v1  ;;  %v2734_v39 = vpop.eup %2733  ;;  %2735 = vrcp.f32 %v1935_v33 }
 0xa75   :  { %2547 = vmatmul.msk.f32.gmra.mxu2 %vm419_vm14, %v1676_v32  ;;  %v1811_v40 = vmul.f32 %v2734_v39, %v3482_v52 }
 0xa7a   :  { %v2736_v46 = vpop.eup %2735  ;;  %v3525_v60 = vpop.f32.mrf.mxu0 }
 0xa7b   :  { %v1819_v35 = vpop.permute.xlu2 %1818  ;;  %v1945_v44 = vmul.f32 %v2736_v46, %v3490_v17 }
 0xa7c   :  { %2555 = vmatpush.msk.msrb.mxu0 %vm463_vm9, %v1819_v35 }
 0xa7d   :  { %2548 = vmatmul.msk.f32.gmra.mxu2 %vm419_vm14, %v1677_v36  ;;  %v2614_v6 = vpop.permute.xlu0 %2613 }
 0xa7e   :  { %v2615_v38 = vunpack.i.l.bf16 %v2614_v6  ;;  %v2616_v37 = vunpack.i.h.bf16 %v2614_v6 }
 0xa80   :  { %1847 = vmatpush.msrb.mxu0 %v2615_v38 }
 0xa82   :  { %1848 = vmatpush.msrb.mxu0 %v2616_v37 }
 0xa83   :  { %v1730_v41 = vpop.permute.xlu2 %1729  ;;  %v1953_v42 = vpop.permute.xlu1 %1952  ;;  %2556 = vmatmul.msk.f32.vlgmr.msrb.gmra.mxu0 %vm419_vm14, %v1811_v40 }
 0xa84   :  { %2554 = vmatmul.msk.f32.gmra.mxu3 %vm368_vm8, %v1730_v41  ;;  %2565 = vmatpush.msk.msra.mxu2 %vm463_vm9, %v1953_v42 }
 0xa85   :  { %2201 = vmatpush.msra.mxu0 %v2192_v4 }
 0xa86   :  { %1981 = vmatpush.msra.mxu2 %v2610_v49 }
 0xa87   :  { %2202 = vmatpush.msra.mxu0 %v2190_v61 }
 0xa88   :  { %1982 = vmatpush.msra.mxu2 %v2611_v3 }
 0xa89   :  { %2566 = vmatmul.msk.f32.vlgmr.msra.gmra.mxu2 %vm419_vm14, %v1945_v44 }
 0xa8a   :  { %v3527_v5 = vpop.f32.mrf.mxu0  ;;  %2293 = vmatpush.msrb.mxu2 %v2275_v2 }
 0xa8b   :  { %v1864_v30 = vpop.permute.xlu2 %1863 }
 0xa8c   :  { %2564 = vmatmul.msk.f32.gmra.mxu1 %vm368_vm8, %v1864_v30 }
 0xaa8   :  { %v1804_v51 = vpop.xlane.xlu0 %1803 }
 0xaa9   :  { %2737 = vrcp.f32 %v1804_v51 }
 0xaae   :  { %v1938_v54 = vpop.xlane.xlu1 %1937 }
 0xaaf   :  { %v2738_v52 = vpop.eup %2737  ;;  %2739 = vrcp.f32 %v1938_v54 }
 0xab0   :  { %v1812_v53 = vmul.f32 %v2738_v52, %v2724_v21  ;;  %v3554_v52 = vld [vmem:[%s3727_s3 + $0xa] ss:$0 sm:$0xff] }
 0xab2   :  { %2557 = vmatmul.msk.f32.gmra.mxu0 %vm419_vm14, %v1812_v53 }
 0xab5   :  { %v2740_v55 = vpop.eup %2739 }
 0xab6   :  { %v1946_v59 = vmul.f32 %v2740_v55, %v2726_v48  ;;  %v2042_v48 = vld [vmem:[#allocation6 + $0x98] sm:$0xff] }
 0xab7   :  { %2068 = vmatpush.msra.mxu3 %v2042_v48  ;;  %v2176_v48 = vld [vmem:[#allocation8 + $0x170] sm:$0xff] }
 0xab8   :  { %2567 = vmatmul.msk.f32.gmra.mxu2 %vm419_vm14, %v1946_v59 }
 0xab9   :  { %2069 = vmatpush.msra.mxu3 %v2041_v63  ;;  %v2177_v63 = vld [vmem:[#allocation8 + $0x178] sm:$0xff] }
 0xabb   :  { %2070 = vmatpush.msra.mxu3 %v2040_v12  ;;  %v2174_v12 = vld [vmem:[#allocation8 + $0x160] sm:$0xff] }
 0xabd   :  { %2071 = vmatpush.msra.mxu3 %v2039_v14  ;;  %v2175_v14 = vld [vmem:[#allocation8 + $0x168] sm:$0xff] }
 0xad5   :  { %v1716_v62 = vpop.f32.mrf.mxu2 }
 0xad6   :  { %1996 = vrot.lane.b32.xlu1 %v1716_v62, %s2901_s19 }
 0xaf8   :  { %v1719_v57 = vpop.f32.mrf.mxu2 }
 0xb00   :  { %v1850_v16 = vpop.f32.mrf.mxu0  ;;  %v3530_v0 = vpop.f32.mrf.mxu2 }
 0xb01   :  { %2008 = vrot.lane.b32.xlu2 %v1850_v16, %s2902_s20 }
 0xb07   :  { %v1772_v18 = vpop.f32.mrf.mxu3 }
 0xb08   :  { %v1777_v15 = vmul.f32 0.17677669, %v1772_v18  ;;  %v2172_v18 = vld [vmem:[#allocation8 + $0x150] sm:$0xff] }
 0xb09   :  { %v1906_v17 = vpop.f32.mrf.mxu1 }
 0xb0a   :  { %v1911_v47 = vmul.f32 0.17677669, %v1906_v17  ;;  %v1780_v27 = vadd.f32 %v1777_v15, %v3119_v50  ;;  %v2173_v15 = vld [vmem:[#allocation8 + $0x158] sm:$0xff] }
 0xb0c   :  { %v1984_v1 = vpop.f32.mrf.mxu2  ;;  %v1914_v56 = vadd.f32 %v1911_v47, %v3119_v50  ;;  %v1787_v28 = vsel %vm426_vm3, %v1780_v27, -inf  ;;  %v2185_v47 = vld [vmem:[#allocation8 + $0x1b8] sm:$0xff] }
 0xb0d   :  { %2020 = vrot.lane.b32.xlu2 %v1984_v1, %s2900_s18 }
 0xb0e   :  { %v1921_v21 = vsel %vm426_vm3, %v1914_v56, -inf }
 0xb15   :  { %1998 = vrot.lane.b32.xlu2 %v1719_v57, %s2901_s19 }
 0xb2f   :  { %v1853_v20 = vpop.f32.mrf.mxu0 }
 0xb30   :  { %2010 = vrot.lane.b32.xlu1 %v1853_v20, %s2902_s20  ;;  %v2189_v20 = vld [vmem:[#allocation8 + $0x1d8] sm:$0xff] }
 0xb31   :  { %2229 = vmatpush.msrb.mxu1 %v2189_v20  ;;  %v2273_v20 = vld [vmem:[#allocation9 + $0x168] sm:$0xff] }
 0xb33   :  { %2230 = vmatpush.msrb.mxu1 %v2187_v13 }
 0xb35   :  { %2231 = vmatpush.msrb.mxu1 %v2185_v47 }
 0xb37   :  { %2232 = vmatpush.msrb.mxu1 %v2183_v23 }
 0xb39   :  { %2233 = vmatpush.msrb.mxu1 %v2181_v24  ;;  %v2269_v24 = vld [vmem:[#allocation9 + $0x148] sm:$0xff] }
 0xb3b   :  { %v1987_v11 = vpop.f32.mrf.mxu2 }
 0xb3c   :  { %2022 = vrot.lane.b32.xlu0 %v1987_v11, %s2900_s18 }
 0xb3e   :  { %1922 = vmax.xlane.f32.xlu2 %v1921_v21  ;;  %v2179_v21 = vld [vmem:[#allocation8 + $0x188] sm:$0xff] }
 0xb3f   :  { %2234 = vmatpush.msrb.mxu1 %v2179_v21 }
 0xb41   :  { %2235 = vmatpush.msrb.mxu1 %v2177_v63 }
 0xb43   :  { %2236 = vmatpush.msrb.mxu1 %v2175_v14 }
 0xb45   :  { %2237 = vmatpush.msrb.mxu1 %v2173_v15 }
 0xb48   :  { %v1997_v31 = vpop.permute.xlu1 %1996 }
 0xb49   :  { %v2029_v33 = vsel %vm368_vm8, %v1580_v9, %v1997_v31  ;;  %v2169_v31 = vld [vmem:[#allocation8 + $0x138] sm:$0xff] }
 0xb5a   :  { %1788 = vmax.xlane.f32.xlu1 %v1787_v28  ;;  %v2171_v28 = vld [vmem:[#allocation8 + $0x148] sm:$0xff] }
 0xb5b   :  { %v2009_v29 = vpop.permute.xlu2 %2008  ;;  %2238 = vmatpush.msrb.mxu1 %v2171_v28  ;;  %v2264_v28 = vld [vmem:[#allocation9 + $0x120] sm:$0xff] }
 0xb5c   :  { %v2032_v32 = vsel %vm936_vm4, %v2029_v33, %v2009_v29  ;;  %v2168_v29 = vld [vmem:[#allocation8 + $0x130] sm:$0xff]  ;;  %v2166_v33 = vld [vmem:[#allocation8 + $0x120] sm:$0xff] }
 0xb5d   :  { %2239 = vmatpush.msrb.mxu1 %v2169_v31  ;;  %v2262_v31 = vld [vmem:[#allocation9 + $0x110] sm:$0xff] }
 0xb67   :  { %v2021_v34 = vpop.permute.xlu2 %2020 }
 0xb68   :  { %v2035_v35 = vsel %vm940_vm5, %v2032_v32, %v2021_v34  ;;  %v2167_v32 = vld [vmem:[#allocation8 + $0x128] sm:$0xff]  ;;  %v2165_v34 = vld [vmem:[#allocation8 + $0x118] sm:$0xff] }
 0xb69   :  { %2072 = vmatmul.f32.vlgmr.msra.gmra.mxu3 %v2035_v35  ;;  %2240 = vmatpush.msrb.mxu1 %v2167_v32  ;;  %v2164_v35 = vld [vmem:[#allocation8 + $0x110] sm:$0xff]  ;;  %v2260_v32 = vld [vmem:[#allocation9 + $0x100] sm:$0xff] }
 0xb6b   :  { %2241 = vmatpush.msrb.mxu1 %v2165_v34  ;;  %v2291_v34 = vld [vmem:[#allocation9 + $0x1f8] sm:$0xff] }
 0xb6c   :  { %2318 = vmatpush.msrb.mxu3 %v2291_v34 }
 0xb6f   :  { %v1999_v36 = vpop.permute.xlu2 %1998 }
 0xb70   :  { %v2030_v39 = vsel %vm368_vm8, %v3525_v60, %v1999_v36  ;;  %v2163_v36 = vld [vmem:[#allocation8 + $0x108] sm:$0xff] }
 0xb71   :  { %2242 = vmatpush.msrb.mxu1 %v2163_v36  ;;  %v2289_v36 = vld [vmem:[#allocation9 + $0x1e8] sm:$0xff] }
 0xba2   :  { %v2011_v6 = vpop.permute.xlu1 %2010 }
 0xba3   :  { %v2033_v50 = vsel %vm936_vm4, %v2030_v39, %v2011_v6  ;;  %v2162_v6 = vld [vmem:[#allocation8 + $0x100] sm:$0xff] }
 0xbae   :  { %v2023_v38 = vpop.permute.xlu0 %2022 }
 0xbaf   :  { %v2036_v37 = vsel %vm940_vm5, %v2033_v50, %v2023_v38 }
 0xbb0   :  { %2075 = vmatmul.f32.gmra.mxu3 %v2036_v37 }
 0xbb1   :  { %v1923_v40 = vpop.xlane.xlu2 %1922 }
 0xbb2   :  { %v1926_v41 = vsub.f32 %v1914_v56, %v1923_v40  ;;  %v2180_v56 = vld [vmem:[#allocation8 + $0x190] sm:$0xff] }
 0xbb4   :  { %v1931_v42 = vmul.f32 1.442695, %v1926_v41 }
 0xbb6   :  { %2741 = vpow2.f32 %v1931_v42 }
 0xbbc   :  { %v2742_v46 = vpop.eup %2741 }
 0xbbd   :  { %v1939_v49 = vsel %vm426_vm3, %v2742_v46, 0.0 }
 0xbbe   :  { %1940 = vadd.xlane.f32.xlu0 %v1939_v49 }
 0xbcd   :  { %v1789_v3 = vpop.xlane.xlu1 %1788 }
 0xbce   :  { %v1792_v44 = vsub.f32 %v1780_v27, %v1789_v3  ;;  %v2170_v27 = vld [vmem:[#allocation8 + $0x140] sm:$0xff] }
 0xbd0   :  { %v1797_v30 = vmul.f32 1.442695, %v1792_v44 }
 0xbd2   :  { %2743 = vpow2.f32 %v1797_v30  ;;  %2000 = vrot.lane.b32.xlu0 %v3530_v0, %s2901_s19 }
 0xbd8   :  { %v2744_v51 = vpop.eup %2743 }
 0xbd9   :  { %v1805_v54 = vsel %vm426_vm3, %v2744_v51, 0.0 }
 0xbda   :  { %1806 = vadd.xlane.f32.xlu2 %v1805_v54 }
 0xbec   :  { %v2073_v53 = vpop.f32.mrf.mxu3 }
 0xbed   :  { %v2074_v55 = vadd.f32 %v3554_v52, %v2073_v53  ;;  %v3578_v53 = vld [vmem:[%s3727_s3 + $0xb] ss:$0 sm:$0xff] }
 0xbef   :  { %v3558_v59 = vadd.f32 %v2074_v55, %v3363_v8 }
 0xbf1   :  { %2085 = vadd.xlane.f32.xlu1 %v3558_v59  ;;  %v2095_v62 = vmul.f32 %v3558_v59, %v3558_v59 }
 0xbf3   :  { %2098 = vadd.xlane.f32.xlu2 %v2095_v62 }
 0xc31   :  { %v1941_v9 = vpop.xlane.xlu0 %1940 }
 0xc32   :  { %2745 = vrcp.f32 %v1941_v9  ;;  %v3583_v9 = vld [vmem:[%s3727_s3 + $0xc] ss:$0 sm:$0xff] }
 0xc33   :  { %v2076_v60 = vpop.f32.mrf.mxu3 }
 0xc34   :  { %v2077_v57 = vadd.f32 %v3554_v52, %v2076_v60 }
 0xc36   :  { %v3565_v16 = vadd.f32 %v2077_v57, %v3373_v43  ;;  %v2188_v43 = vld [vmem:[#allocation8 + $0x1d0] sm:$0xff] }
 0xc37   :  { %2203 = vmatpush.msra.mxu0 %v2188_v43  ;;  %v2274_v43 = vld [vmem:[#allocation9 + $0x170] sm:$0xff] }
 0xc38   :  { %v2746_v0 = vpop.eup %2745  ;;  %2087 = vadd.xlane.f32.xlu1 %v3565_v16  ;;  %v2096_v8 = vmul.f32 %v3565_v16, %v3565_v16  ;;  %2294 = vmatpush.msrb.mxu2 %v2274_v43 }
 0xc39   :  { %v1947_v1 = vmul.f32 %v2746_v0, %v2742_v46  ;;  %2204 = vmatpush.msra.mxu0 %v2186_v10  ;;  %v2272_v10 = vld [vmem:[#allocation9 + $0x160] sm:$0xff] }
 0xc3a   :  { %2100 = vadd.xlane.f32.xlu2 %v2096_v8  ;;  %2295 = vmatpush.msrb.mxu2 %v2273_v20 }
 0xc3b   :  { %2568 = vmatmul.msk.f32.gmra.mxu2 %vm419_vm14, %v1947_v1  ;;  %2205 = vmatpush.msra.mxu0 %v2184_v19  ;;  %v2271_v19 = vld [vmem:[#allocation9 + $0x158] sm:$0xff] }
 0xc3c   :  { %2296 = vmatpush.msrb.mxu2 %v2272_v10 }
 0xc3d   :  { %2206 = vmatpush.msra.mxu0 %v2182_v22  ;;  %v2270_v22 = vld [vmem:[#allocation9 + $0x150] sm:$0xff] }
 0xc3e   :  { %2297 = vmatpush.msrb.mxu2 %v2271_v19 }
 0xc3f   :  { %2207 = vmatpush.msra.mxu0 %v2180_v56 }
 0xc40   :  { %2298 = vmatpush.msrb.mxu2 %v2270_v22 }
 0xc41   :  { %2208 = vmatpush.msra.mxu0 %v2178_v26  ;;  %v2268_v26 = vld [vmem:[#allocation9 + $0x140] sm:$0xff] }
 0xc42   :  { %2299 = vmatpush.msrb.mxu2 %v2269_v24 }
 0xc43   :  { %2209 = vmatpush.msra.mxu0 %v2176_v48 }
 0xc44   :  { %2300 = vmatpush.msrb.mxu2 %v2268_v26 }
 0xc45   :  { %2210 = vmatpush.msra.mxu0 %v2174_v12  ;;  %v2266_v12 = vld [vmem:[#allocation9 + $0x130] sm:$0xff] }
 0xc47   :  { %2211 = vmatpush.msra.mxu0 %v2172_v18  ;;  %v2265_v18 = vld [vmem:[#allocation9 + $0x128] sm:$0xff] }
 0xc49   :  { %2212 = vmatpush.msra.mxu0 %v2170_v27 }
 0xc4b   :  { %2213 = vmatpush.msra.mxu0 %v2168_v29 }
 0xc4d   :  { %v1807_v17 = vpop.xlane.xlu2 %1806  ;;  %2214 = vmatpush.msra.mxu0 %v2166_v33  ;;  %v2261_v33 = vld [vmem:[#allocation9 + $0x108] sm:$0xff] }
 0xc4e   :  { %2747 = vrcp.f32 %v1807_v17 }
 0xc4f   :  { %2215 = vmatpush.msra.mxu0 %v2164_v35  ;;  %v2290_v35 = vld [vmem:[#allocation9 + $0x1f0] sm:$0xff] }
 0xc50   :  { %2319 = vmatpush.msrb.mxu3 %v2290_v35 }
 0xc51   :  { %2216 = vmatpush.msra.mxu0 %v2162_v6  ;;  %v2569_v6 = vld [vmem:[%s3732_s8 + $0x2] sm:$0x3] }
 0xc52   :  { %2320 = vmatpush.msrb.mxu3 %v2289_v36 }
 0xc54   :  { %v2748_v11 = vpop.eup %2747 }
 0xc55   :  { %v1813_v25 = vmul.f32 %v2748_v11, %v2744_v51 }
 0xc57   :  { %2558 = vmatmul.msk.f32.gmra.mxu0 %vm419_vm14, %v1813_v25  ;;  %v2267_v25 = vld [vmem:[#allocation9 + $0x138] sm:$0xff] }
 0xc58   :  { %2301 = vmatpush.msrb.mxu2 %v2267_v25 }
 0xc5a   :  { %2302 = vmatpush.msrb.mxu2 %v2266_v12 }
 0xc5c   :  { %2303 = vmatpush.msrb.mxu2 %v2265_v18 }
 0xc5e   :  { %2304 = vmatpush.msrb.mxu2 %v2264_v28 }
 0xc64   :  { %v2086_v39 = vpop.xlane.xlu1 %2085 }
 0xc65   :  { %v2092_v50 = vmul.f32 %v2086_v39, %v3003_v45  ;;  %v2288_v39 = vld [vmem:[#allocation9 + $0x1e0] sm:$0xff] }
 0xc66   :  { %v2099_v38 = vpop.xlane.xlu2 %2098  ;;  %2321 = vmatpush.msrb.mxu3 %v2288_v39 }
 0xc67   :  { %v2108_v37 = vmul.f32 %v2092_v50, %v2092_v50  ;;  %v2105_v40 = vmul.f32 %v2099_v38, %v3003_v45  ;;  %v2114_v54 = vsub.f32 %v3558_v59, %v2092_v50  ;;  %v3605_v50 = vperm.slane %v2569_v6, 0  ;;  %v2287_v38 = vld [vmem:[#allocation9 + $0x1d8] sm:$0xff] }
 0xc68   :  { %2322 = vmatpush.msrb.mxu3 %v2287_v38 }
 0xc69   :  { %v2111_v41 = vsub.f32 %v2105_v40, %v2108_v37  ;;  %v2286_v37 = vld [vmem:[#allocation9 + $0x1d0] sm:$0xff] }
 0xc6a   :  { %2323 = vmatpush.msrb.mxu3 %v2286_v37 }
 0xc6b   :  { %v2117_v42 = vadd.f32 1e-05, %v2111_v41 }
 0xc6d   :  { %2749 = vrsqrt.f32 %v2117_v42  ;;  %vm2126_vm3 = vweird.f32 %v2117_v42 }
 0xc73   :  { %v2750_v46 = vpop.eup %2749 }
 0xc74   :  { %v2121_v49 = vmul.f32 %v2750_v46, %v2117_v42  ;;  %vm2127_vm14 = vweird.f32 %v2750_v46  ;;  %v2285_v42 = vld [vmem:[#allocation9 + $0x1c8] sm:$0xff] }
 0xc75   :  { %vm2128_vm1 = vmor %vm2126_vm3, %vm2127_vm14  ;;  %2324 = vmatpush.msrb.mxu3 %v2285_v42  ;;  %vm2395_vm14 = vcmask 1040384  }
 0xc76   :  { %v2122_v3 = vmul.f32 %v2750_v46, %v2121_v49  ;;  %v2284_v49 = vld [vmem:[#allocation9 + $0x1c0] sm:$0xff] }
 0xc77   :  { %2325 = vmatpush.msrb.mxu3 %v2284_v49 }
 0xc78   :  { %v2123_v44 = vmul.f32 0.5, %v2122_v3  ;;  %v2283_v3 = vld [vmem:[#allocation9 + $0x1b8] sm:$0xff] }
 0xc79   :  { %2326 = vmatpush.msrb.mxu3 %v2283_v3 }
 0xc7a   :  { %v2124_v30 = vsub.f32 1.5, %v2123_v44  ;;  %v2282_v44 = vld [vmem:[#allocation9 + $0x1b0] sm:$0xff] }
 0xc7b   :  { %2327 = vmatpush.msrb.mxu3 %v2282_v44 }
 0xc7c   :  { %v2125_v51 = vmul.f32 %v2750_v46, %v2124_v30  ;;  %v2281_v30 = vld [vmem:[#allocation9 + $0x1a8] sm:$0xff] }
 0xc7d   :  { %2328 = vmatpush.msrb.mxu3 %v2281_v30 }
 0xc7e   :  { %v2129_v55 = vsel %vm2128_vm1, %v2750_v46, %v2125_v51  ;;  %v2280_v51 = vld [vmem:[#allocation9 + $0x1a0] sm:$0xff] }
 0xc7f   :  { %v2150_v62 = vmul.f32 %v2129_v55, %v2114_v54  ;;  %2329 = vmatpush.msrb.mxu3 %v2280_v51  ;;  %v2279_v54 = vld [vmem:[#allocation9 + $0x198] sm:$0xff]  ;;  %v2278_v55 = vld [vmem:[#allocation9 + $0x190] sm:$0xff] }
 0xc81   :  { %v2154_v60 = vmul.f32 %v3578_v53, %v2150_v62  ;;  %2330 = vmatpush.msrb.mxu3 %v2279_v54  ;;  %v2277_v62 = vld [vmem:[#allocation9 + $0x188] sm:$0xff] }
 0xc83   :  { %v3587_v57 = vadd.f32 %v3583_v9, %v2154_v60  ;;  %2331 = vmatpush.msrb.mxu3 %v2278_v55  ;;  %v2276_v60 = vld [vmem:[#allocation9 + $0x180] sm:$0xff] }
 0xc85   :  { %2217 = vmatmul.f32.vlgmr.msra.gmra.mxu0 %v3587_v57  ;;  %2243 = vmatmul.f32.vlgmr.msrb.gmra.mxu1 %v3587_v57 }
 0xc86   :  { %2332 = vmatpush.msrb.mxu3 %v2277_v62 }
 0xc88   :  { %2333 = vmatpush.msrb.mxu3 %v2276_v60 }
 0xcab   :  { %v2088_v59 = vpop.xlane.xlu1 %2087 }
 0xcac   :  { %v2093_v0 = vmul.f32 %v2088_v59, %v3003_v45  ;;  %v2001_v59 = vpop.permute.xlu0 %2000 }
 0xcad   :  { %v2101_v8 = vpop.xlane.xlu2 %2100 }
 0xcae   :  { %v2109_v1 = vmul.f32 %v2093_v0, %v2093_v0  ;;  %v2106_v4 = vmul.f32 %v2101_v8, %v3003_v45  ;;  %v2115_v48 = vsub.f32 %v3565_v16, %v2093_v0  ;;  %v2263_v16 = vld [vmem:[#allocation9 + $0x118] sm:$0xff]  ;;  %v2031_v0 = vsel %vm368_vm8, %v3527_v5, %v2001_v59 }
 0xcaf   :  { %2305 = vmatpush.msrb.mxu2 %v2263_v16 }
 0xcb0   :  { %v2112_v7 = vsub.f32 %v2106_v4, %v2109_v1  ;;  %v3610_v1 = vperm.slane %v2569_v6, 1 }
 0xcb1   :  { %2306 = vmatpush.msrb.mxu2 %v2262_v31 }
 0xcb2   :  { %v2118_v61 = vadd.f32 1e-05, %v2112_v7 }
 0xcb3   :  { %2307 = vmatpush.msrb.mxu2 %v2261_v33 }
 0xcb4   :  { %2751 = vrsqrt.f32 %v2118_v61  ;;  %vm2136_vm6 = vweird.f32 %v2118_v61 }
 0xcb5   :  { %2308 = vmatpush.msrb.mxu2 %v2260_v32 }
 0xcba   :  { %v2752_v13 = vpop.eup %2751 }
 0xcbb   :  { %v2131_v17 = vmul.f32 %v2752_v13, %v2118_v61  ;;  %vm2137_vm2 = vweird.f32 %v2752_v13 }
 0xcbc   :  { %vm2138_vm7 = vmor %vm2136_vm6, %vm2137_vm2  ;;  %vm2465_vm2 = vcmask 254976  }
 0xcbd   :  { %v2132_v47 = vmul.f32 %v2752_v13, %v2131_v17 }
 0xcbe   :  { %v1990_v23 = vpop.f32.mrf.mxu2 }
 0xcbf   :  { %v2133_v56 = vmul.f32 0.5, %v2132_v47  ;;  %2024 = vrot.lane.b32.xlu2 %v1990_v23, %s2900_s18 }
 0xcc1   :  { %v2134_v11 = vsub.f32 1.5, %v2133_v56  ;;  %v2629_v56 = vld [vmem:[%s3727_s3 + $0xd] ss:$0 sm:$0xff] }
 0xcc3   :  { %v2135_v21 = vmul.f32 %v2752_v13, %v2134_v11 }
 0xcc5   :  { %v2139_v63 = vsel %vm2138_vm7, %v2752_v13, %v2135_v21 }
 0xcc6   :  { %v2151_v14 = vmul.f32 %v2139_v63, %v2115_v48 }
 0xcc8   :  { %v2155_v15 = vmul.f32 %v3578_v53, %v2151_v14 }
 0xcca   :  { %v3597_v27 = vadd.f32 %v3583_v9, %v2155_v15 }
 0xccc   :  { %2220 = vmatmul.f32.gmra.mxu0 %v3597_v27  ;;  %2246 = vmatmul.f32.gmra.mxu1 %v3597_v27 }
 0xcd4   :  { %v1856_v29 = vpop.f32.mrf.mxu0 }
 0xcd5   :  { %2012 = vrot.lane.b32.xlu1 %v1856_v29, %s2902_s20 }
 0xd02   :  { %v2218_v40 = vpop.f32.mrf.mxu0  ;;  %v2244_v61 = vpop.f32.mrf.mxu1 }
 0xd03   :  { %v2219_v41 = vadd.f32 %v2218_v40, %v3605_v50  ;;  %v2245_v10 = vadd.f32 %v2244_v61, %v3610_v1 }
 0xd05   :  { %v2253_v46 = vmax.f32 %v2219_v41, 0.0  ;;  %v2254_v17 = vmax.f32 %v2245_v10, 0.0 }
 0xd07   :  { %2309 = vmatmul.f32.vlgmr.msrb.gmra.mxu2 %v2253_v46 }
 0xd19   :  { %v2025_v4 = vpop.permute.xlu2 %2024 }
 0xd47   :  { %v2013_v8 = vpop.permute.xlu1 %2012 }
 0xd48   :  { %v2034_v7 = vsel %vm936_vm4, %v2031_v0, %v2013_v8 }
 0xd49   :  { %v2221_v2 = vpop.f32.mrf.mxu0  ;;  %v2037_v43 = vsel %vm940_vm5, %v2034_v7, %v2025_v4  ;;  %v2247_v19 = vpop.f32.mrf.mxu1 }
 0xd4a   :  { %v2222_v20 = vadd.f32 %v2221_v2, %v3605_v50  ;;  %2078 = vmatmul.f32.gmra.mxu3 %v2037_v43  ;;  %v2248_v5 = vadd.f32 %v2247_v19, %v3610_v1 }
 0xd4c   :  { %v2255_v13 = vmax.f32 %v2222_v20, 0.0  ;;  %v2256_v47 = vmax.f32 %v2248_v5, 0.0 }
 0xd4e   :  { %2312 = vmatmul.f32.gmra.mxu2 %v2255_v13 }
 0xd52   :  { %2334 = vmatmul.f32.vlgmr.msrb.gmra.mxu3 %v2254_v17 }
 0xd5a   :  { %2337 = vmatmul.f32.gmra.mxu3 %v2256_v47 }
 0xd8a   :  { %v2310_v11 = vpop.f32.mrf.mxu2 }
 0xd8b   :  { %v2311_v25 = vadd.f32 %v2629_v56, %v2310_v11 }
 0xdcd   :  { %v2079_v22 = vpop.f32.mrf.mxu3 }
 0xdce   :  { %v2080_v23 = vadd.f32 %v3554_v52, %v2079_v22 }
 0xdd0   :  { %v2084_v24 = vadd.f32 %v2080_v23, %v3379_v58 }
 0xdd1   :  { %v2313_v52 = vpop.f32.mrf.mxu2 }
 0xdd2   :  { %v2089_v26 = vsel %vm463_vm9, %v2084_v24, 0.0  ;;  %v2097_v21 = vmul.f32 %v2084_v24, %v2084_v24  ;;  %v2314_v18 = vadd.f32 %v2629_v56, %v2313_v52 }
 0xdd3   :  { %2090 = vadd.xlane.f32.xlu0 %v2089_v26 }
 0xdd4   :  { %v2102_v48 = vsel %vm463_vm9, %v2097_v21, 0.0 }
 0xdd5   :  { %v2335_v63 = vpop.f32.mrf.mxu3  ;;  %2103 = vadd.xlane.f32.xlu1 %v2102_v48 }
 0xdd6   :  { %v2336_v12 = vadd.f32 %v2335_v63, %v2311_v25 }
 0xdd8   :  { %v3625_v14 = vadd.f32 %v2336_v12, %v3587_v57  ;;  %v2631_v12 = vld [vmem:[%s3727_s3 + $0xf] ss:$0 sm:$0xff] }
 0xdda   :  { %2345 = vadd.xlane.f32.xlu2 %v3625_v14  ;;  %v2351_v29 = vmul.f32 %v3625_v14, %v3625_v14 }
 0xddd   :  { %v2338_v15 = vpop.f32.mrf.mxu3 }
 0xdde   :  { %v2339_v58 = vadd.f32 %v2338_v15, %v2314_v18 }
 0xde0   :  { %v3629_v28 = vadd.f32 %v2339_v58, %v3597_v27 }
 0xde2   :  { %2347 = vadd.xlane.f32.xlu0 %v3629_v28  ;;  %v2352_v16 = vmul.f32 %v3629_v28, %v3629_v28 }
 0xde4   :  { %2355 = vadd.xlane.f32.xlu1 %v2352_v16 }
 0xdea   :  { %2353 = vadd.xlane.f32.xlu0 %v2351_v29  ;;  %v2442_v29 = vld [vmem:[%s3734_s10 + $0x78] sm:$0xff] }
 0xdeb   :  { %2445 = vmatpush.msrb.mxu0 %v2442_v29 }
 0xe46   :  { %v2091_v57 = vpop.xlane.xlu0 %2090 }
 0xe47   :  { %v2094_v31 = vmul.f32 %v2091_v57, %v3003_v45  ;;  %v2441_v57 = vld [vmem:[%s3734_s10 + $0x70] sm:$0xff] }
 0xe48   :  { %v2104_v33 = vpop.xlane.xlu1 %2103  ;;  %2446 = vmatpush.msrb.mxu0 %v2441_v57 }
 0xe49   :  { %v2110_v32 = vmul.f32 %v2094_v31, %v2094_v31  ;;  %v2107_v34 = vmul.f32 %v2104_v33, %v3003_v45  ;;  %v2116_v59 = vsub.f32 %v2084_v24, %v2094_v31  ;;  %v2440_v31 = vld [vmem:[%s3734_s10 + $0x68] sm:$0xff]  ;;  %v2439_v33 = vld [vmem:[%s3734_s10 + $0x60] sm:$0xff] }
 0xe4a   :  { %2447 = vmatpush.msrb.mxu0 %v2440_v31 }
 0xe4b   :  { %v2113_v35 = vsub.f32 %v2107_v34, %v2110_v32  ;;  %v2438_v32 = vld [vmem:[%s3734_s10 + $0x58] sm:$0xff]  ;;  %v2437_v34 = vld [vmem:[%s3734_s10 + $0x50] sm:$0xff] }
 0xe4c   :  { %2448 = vmatpush.msrb.mxu0 %v2439_v33 }
 0xe4d   :  { %v2119_v27 = vadd.f32 1e-05, %v2113_v35  ;;  %v2346_v37 = vpop.xlane.xlu2 %2345  ;;  %v2436_v35 = vld [vmem:[%s3734_s10 + $0x48] sm:$0xff] }
 0xe4e   :  { %v2349_v3 = vmul.f32 %v2346_v37, %v3003_v45  ;;  %2449 = vmatpush.msrb.mxu0 %v2438_v32 }
 0xe4f   :  { %2753 = vrsqrt.f32 %v2119_v27  ;;  %vm2146_vm4 = vweird.f32 %v2119_v27 }
 0xe50   :  { %v2359_v62 = vmul.f32 %v2349_v3, %v2349_v3  ;;  %v2363_v21 = vsub.f32 %v3625_v14, %v2349_v3  ;;  %2450 = vmatpush.msrb.mxu0 %v2437_v34  ;;  %v2428_v3 = vld [vmem:[%s3734_s10 + $0x8] sm:$0xff] }
 0xe52   :  { %2451 = vmatpush.msrb.mxu0 %v2436_v35 }
 0xe55   :  { %v2754_v36 = vpop.eup %2753  ;;  %v2348_v6 = vpop.xlane.xlu0 %2347 }
 0xe56   :  { %v2141_v39 = vmul.f32 %v2754_v36, %v2119_v27  ;;  %v2350_v38 = vmul.f32 %v2348_v6, %v3003_v45  ;;  %vm2147_vm8 = vweird.f32 %v2754_v36  ;;  %v2435_v27 = vld [vmem:[%s3734_s10 + $0x40] sm:$0xff] }
 0xe57   :  { %v2356_v40 = vpop.xlane.xlu1 %2355  ;;  %vm2148_vm5 = vmor %vm2146_vm4, %vm2147_vm8  ;;  %2452 = vmatpush.msrb.mxu0 %v2435_v27 }
 0xe58   :  { %v2142_v41 = vmul.f32 %v2754_v36, %v2141_v39  ;;  %v2360_v42 = vmul.f32 %v2350_v38, %v2350_v38  ;;  %v2358_v46 = vmul.f32 %v2356_v40, %v3003_v45  ;;  %v2434_v39 = vld [vmem:[%s3734_s10 + $0x38] sm:$0xff]  ;;  %v2433_v40 = vld [vmem:[%s3734_s10 + $0x30] sm:$0xff] }
 0xe59   :  { %2453 = vmatpush.msrb.mxu0 %v2434_v39 }
 0xe5a   :  { %v2143_v49 = vmul.f32 0.5, %v2142_v41  ;;  %v2362_v44 = vsub.f32 %v2358_v46, %v2360_v42  ;;  %v2432_v46 = vld [vmem:[%s3734_s10 + $0x28] sm:$0xff] }
 0xe5b   :  { %2454 = vmatpush.msrb.mxu0 %v2433_v40 }
 0xe5c   :  { %v2144_v30 = vsub.f32 1.5, %v2143_v49  ;;  %v2366_v51 = vadd.f32 1e-05, %v2362_v44  ;;  %v2429_v49 = vld [vmem:[%s3734_s10 + $0x10] sm:$0xff] }
 0xe5d   :  { %v2354_v54 = vpop.xlane.xlu0 %2353  ;;  %2455 = vmatpush.msrb.mxu0 %v2432_v46 }
 0xe5e   :  { %v2145_v55 = vmul.f32 %v2754_v36, %v2144_v30  ;;  %2755 = vrsqrt.f32 %v2366_v51  ;;  %v2357_v60 = vmul.f32 %v2354_v54, %v3003_v45  ;;  %vm2383_vm11 = vweird.f32 %v2366_v51  ;;  %v2427_v30 = vld [vmem:[%s3734_s10] sm:$0xff] }
 0xe60   :  { %v2361_v0 = vsub.f32 %v2357_v60, %v2359_v62  ;;  %v2149_v8 = vsel %vm2148_vm5, %v2754_v36, %v2145_v55 }
 0xe61   :  { %v2152_v4 = vmul.f32 %v2149_v8, %v2116_v59 }
 0xe62   :  { %v2365_v7 = vadd.f32 1e-05, %v2361_v0 }
 0xe63   :  { %v2156_v61 = vmul.f32 %v3578_v53, %v2152_v4  ;;  %v2364_v53 = vsub.f32 %v3629_v28, %v2350_v38 }
 0xe64   :  { %v2756_v2 = vpop.eup %2755  ;;  %2757 = vrsqrt.f32 %v2365_v7  ;;  %vm2373_vm15 = vweird.f32 %v2365_v7 }
 0xe65   :  { %v2378_v43 = vmul.f32 %v2756_v2, %v2366_v51  ;;  %v2160_v20 = vadd.f32 %v3583_v9, %v2156_v61  ;;  %vm2384_vm10 = vweird.f32 %v2756_v2  ;;  %v2630_v9 = vld [vmem:[%s3727_s3 + $0xe] ss:$0 sm:$0xff] }
 0xe66   :  { %vm2385_vm12 = vmor %vm2383_vm11, %vm2384_vm10 }
 0xe67   :  { %v2379_v10 = vmul.f32 %v2756_v2, %v2378_v43  ;;  %2223 = vmatmul.f32.gmra.mxu0 %v2160_v20  ;;  %2249 = vmatmul.f32.gmra.mxu1 %v2160_v20  ;;  %v2632_v20 = vld [vmem:[%s3727_s3 + $0x10] ss:$0 sm:$0xff] }
 0xe69   :  { %v2380_v13 = vmul.f32 0.5, %v2379_v10 }
 0xe6a   :  { %v2758_v17 = vpop.eup %2757 }
 0xe6b   :  { %v2381_v19 = vsub.f32 1.5, %v2380_v13  ;;  %v2368_v5 = vmul.f32 %v2758_v17, %v2365_v7  ;;  %vm2374_vm13 = vweird.f32 %v2758_v17  ;;  %v2633_v13 = vld [vmem:[%s3727_s3 + $0x11] ss:$0 sm:$0xff] }
 0xe6c   :  { %vm2375_vm0 = vmor %vm2373_vm15, %vm2374_vm13 }
 0xe6d   :  { %v2382_v47 = vmul.f32 %v2756_v2, %v2381_v19  ;;  %v2369_v22 = vmul.f32 %v2758_v17, %v2368_v5 }
 0xe6f   :  { %v2386_v23 = vsel %vm2385_vm12, %v2756_v2, %v2382_v47  ;;  %v2370_v56 = vmul.f32 0.5, %v2369_v22  ;;  %v2634_v22 = vld [vmem:[%s3727_s3 + $0x12] ss:$0 sm:$0xff] }
 0xe70   :  { %v2388_v11 = vmul.f32 %v2386_v23, %v2364_v53 }
 0xe71   :  { %v2371_v24 = vsub.f32 1.5, %v2370_v56 }
 0xe72   :  { %v2391_v63 = vmul.f32 %v2630_v9, %v2388_v11 }
 0xe73   :  { %v2372_v26 = vmul.f32 %v2758_v17, %v2371_v24 }
 0xe74   :  { %v2394_v15 = vadd.f32 %v2631_v12, %v2391_v63 }
 0xe75   :  { %v2376_v25 = vsel %vm2375_vm0, %v2758_v17, %v2372_v26 }
 0xe76   :  { %v2387_v48 = vmul.f32 %v2376_v25, %v2363_v21 }
 0xe78   :  { %v2390_v52 = vmul.f32 %v2630_v9, %v2387_v48 }
 0xe7a   :  { %v2393_v18 = vadd.f32 %v2631_v12, %v2390_v52 }
 0xe7c   :  { %v3652_v58 = vsel %vm2395_vm14, %v2393_v18, %v2394_v15 }
 0xe7d   :  { %v2399_v28 = vsel %vm463_vm9, %v3652_v58, 0.0  ;;  %v2403_v14 = vmul.f32 %v3652_v58, %v3652_v58 }
 0xe7e   :  { %2400 = vadd.xlane.f32.xlu2 %v2399_v28 }
 0xe7f   :  { %v2404_v16 = vsel %vm463_vm9, %v2403_v14, 0.0 }
 0xe80   :  { %2405 = vadd.xlane.f32.xlu0 %v2404_v16 }
 0xee4   :  { %v2224_v36 = vpop.f32.mrf.mxu0  ;;  %v2250_v6 = vpop.f32.mrf.mxu1 }
 0xee5   :  { %v2225_v38 = vadd.f32 %v2224_v36, %v3605_v50  ;;  %v2251_v37 = vadd.f32 %v2250_v6, %v3610_v1  ;;  %v2431_v50 = vld [vmem:[%s3734_s10 + $0x20] sm:$0xff]  ;;  %v2430_v1 = vld [vmem:[%s3734_s10 + $0x18] sm:$0xff] }
 0xee6   :  { %2456 = vmatpush.msrb.mxu0 %v2431_v50 }
 0xee7   :  { %v2257_v41 = vmax.f32 %v2225_v38, 0.0  ;;  %v2258_v42 = vmax.f32 %v2251_v37, 0.0 }
 0xee8   :  { %2457 = vmatpush.msrb.mxu0 %v2430_v1 }
 0xee9   :  { %2315 = vmatmul.f32.gmra.mxu2 %v2257_v41  ;;  %2340 = vmatmul.f32.gmra.mxu3 %v2258_v42 }
 0xeea   :  { %2458 = vmatpush.msrb.mxu0 %v2429_v49 }
 0xeec   :  { %2459 = vmatpush.msrb.mxu0 %v2428_v3 }
 0xeee   :  { %2460 = vmatpush.msrb.mxu0 %v2427_v30 }
 0xef1   :  { %v2401_v44 = vpop.xlane.xlu2 %2400 }
 0xef2   :  { %v2402_v51 = vmul.f32 %v2401_v44, %v3003_v45 }
 0xef3   :  { %v2406_v54 = vpop.xlane.xlu0 %2405 }
 0xef4   :  { %v2408_v55 = vmul.f32 %v2402_v51, %v2402_v51  ;;  %v2407_v62 = vmul.f32 %v2406_v54, %v3003_v45  ;;  %v2410_v43 = vsub.f32 %v3652_v58, %v2402_v51 }
 0xef6   :  { %v2409_v60 = vsub.f32 %v2407_v62, %v2408_v55 }
 0xef8   :  { %v2411_v59 = vadd.f32 1e-05, %v2409_v60 }
 0xefa   :  { %2759 = vrsqrt.f32 %v2411_v59  ;;  %vm2418_vm3 = vweird.f32 %v2411_v59 }
 0xf00   :  { %v2760_v0 = vpop.eup %2759 }
 0xf01   :  { %v2413_v8 = vmul.f32 %v2760_v0, %v2411_v59  ;;  %vm2419_vm9 = vweird.f32 %v2760_v0 }
 0xf02   :  { %vm2420_vm1 = vmor %vm2418_vm3, %vm2419_vm9 }
 0xf03   :  { %v2414_v4 = vmul.f32 %v2760_v0, %v2413_v8 }
 0xf05   :  { %v2415_v7 = vmul.f32 0.5, %v2414_v4 }
 0xf07   :  { %v2416_v61 = vsub.f32 1.5, %v2415_v7 }
 0xf09   :  { %v2417_v2 = vmul.f32 %v2760_v0, %v2416_v61 }
 0xf0b   :  { %v2421_v45 = vsel %vm2420_vm1, %v2760_v0, %v2417_v2 }
 0xf0c   :  { %v2422_v10 = vmul.f32 %v2421_v45, %v2410_v43 }
 0xf0e   :  { %v2424_v17 = vmul.f32 %v2632_v20, %v2422_v10 }
 0xf10   :  { %v2426_v19 = vadd.f32 %v2633_v13, %v2424_v17 }
 0xf12   :  { %2461 = vmatmul.f32.vlgmr.msrb.gmra.mxu0 %v2426_v19 }
 0xf6c   :  { %v2316_v5 = vpop.f32.mrf.mxu2  ;;  %v2341_v47 = vpop.f32.mrf.mxu3 }
 0xf8f   :  { %v2462_v23 = vpop.f32.mrf.mxu0 }
 0xf90   :  { %v2463_v56 = vadd.f32 %v2634_v22, %v2462_v23 }
 0xf92   :  { %2466 = vst.msk [vmem:[#allocation11] sm:$0x3] %vm2465_vm2, %v2463_v56 }
 0xf93   :  { %2477 = dma.vmem_to_hbm [thread:$0]  %s2473_s1, 32, %s2475_s12, [#allocation5]  }
 0xf94   :  { %2887 = dma.done.wait [#allocation5], 32  }
 0xf95   :  { %2888 = vsyncadd [#allocation5], 4294967264 }
 0xf96   :  { %2482 = vsyncpa [#allocation4], 1 }
 0xf97   :  { %2483 = vsyncpa [#allocation7], 1 }
 0xf98   :  { %2484 = vsyncpa [#allocation10], 1 }
 0xf99   :  { %2485 = vsyncpa [#allocation5], 1 }

</bundles_post_ra>
